<compile_context>
chip_gen: v6e
topology: v6e:2x2x1
jax: 0.10.0
libtpu: 0.0.40
codegen_flags: <defaults>
</compile_context>

<pallas_src>
import math

import jax
import jax.numpy as jnp
import numpy as np
from jax.experimental import pallas as pl
from jax.experimental.pallas import tpu as pltpu


def _gelu(x):
    # tanh-form GELU: the transcendental goes to the EUP slot instead of a
    # long VALU polynomial.  Max abs deviation from exact erf-GELU ~5e-4.
    c = 0.7978845608028654  # sqrt(2/pi)
    return 0.5 * x * (1.0 + jnp.tanh(c * (x + 0.044715 * x * x * x)))


# ----------------------------------------------------------------------------
# Fused kernel: one grid step per batch tile of `bt` images.
#   fc1  : (bt*H*W, Cin) @ (Cin, HID)  + bias -> GELU     (1x1 conv + folded BN)
#   dw   : 3x3 depthwise conv, zero pad 1 + bias -> GELU  (zero-halo scratch)
#   fc2  : (bt*H*W, HID) @ (HID, Cout) + bias -> GELU
# ----------------------------------------------------------------------------
def _newmlp_kernel(x_ref, w1_ref, b1_ref, wdw_ref, bdw_ref, w2_ref, b2_ref,
                   o_ref, pad_ref):
    # x_ref : (M, Cin)  with M = bt*H*W rows of the current batch tile
    # o_ref : (M, Cout)
    # pad_ref: (bt, H+2, W+2, HID) VMEM scratch (zero halo for the dw conv)
    BT, HP, WP, HID = pad_ref.shape
    H, W = HP - 2, WP - 2

    # --- fc1: 1x1 conv (matmul over channels) + folded BN + GELU ------------
    h1 = jnp.dot(x_ref[...], w1_ref[...], preferred_element_type=jnp.float32)
    h1 = _gelu(h1 + b1_ref[...])                       # (M, HID)

    # --- depthwise 3x3 conv, zero padding 1 ---------------------------------
    # Zero only the 1-pixel halo; the interior is fully overwritten below.
    zrow = jnp.zeros((BT, 1, WP, HID), jnp.float32)
    pad_ref[:, 0:1, :, :] = zrow
    pad_ref[:, HP - 1:HP, :, :] = zrow
    zcol = jnp.zeros((BT, HP, 1, HID), jnp.float32)
    pad_ref[:, :, 0:1, :] = zcol
    pad_ref[:, :, WP - 1:WP, :] = zcol
    pad_ref[:, 1:H + 1, 1:W + 1, :] = h1.reshape(BT, H, W, HID)

    wdw = wdw_ref[...]                                 # (3, 3, HID)
    acc = None
    for dh in range(3):
        for dw in range(3):
            tap = wdw[dh:dh + 1, dw:dw + 1, :]         # (1, 1, HID)
            term = pad_ref[:, dh:dh + H, dw:dw + W, :] * tap
            acc = term if acc is None else acc + term
    h2 = _gelu(acc + bdw_ref[...])                     # (bt, H, W, HID)

    # --- fc2: 1x1 conv + folded BN + GELU ------------------------------------
    h2f = h2.reshape(BT * H * W, HID)
    h3 = jnp.dot(h2f, w2_ref[...], preferred_element_type=jnp.float32)
    o_ref[...] = _gelu(h3 + b2_ref[...])               # (M, Cout)


def newmlp_pallas(x_bnc, w1, b1, wdw, bdw, w2, b2, *, block_batch=None):
    B, N, C = x_bnc.shape
    H = W = int(math.sqrt(N))
    assert H * W == N, "sequence length must be a perfect square"
    HID = w1.shape[1]
    Cout = w2.shape[1]

    # Batch tile: target >= 256 matmul rows per grid step (128 saturates the
    # v5e MXU, 256 the v6e/v7x MXU) while evenly dividing B.
    if block_batch is None:
        bt = min(B, max(1, -(-256 // N)))
        while B % bt != 0:
            bt -= 1
    else:
        bt = block_batch
        assert B % bt == 0
    M = bt * N
    nblocks = B // bt

    # (B,N,C) -> (B*H*W, C) is a pure reshape (see layout note above), done in
    # the wrapper so the kernel sees matmul-ready 2D refs.
    x2d = x_bnc.reshape(B * N, C)

    out2d = pl.pallas_call(
        _newmlp_kernel,
        out_shape=jax.ShapeDtypeStruct((B * N, Cout), jnp.float32),
        grid_spec=pltpu.PrefetchScalarGridSpec(
            num_scalar_prefetch=0,
            grid=(nblocks,),
            in_specs=[
                pl.BlockSpec((M, C), lambda i: (i, 0)),
                pl.BlockSpec((C, HID), lambda i: (0, 0)),
                pl.BlockSpec((1, HID), lambda i: (0, 0)),
                pl.BlockSpec((3, 3, HID), lambda i: (0, 0, 0)),
                pl.BlockSpec((1, HID), lambda i: (0, 0)),
                pl.BlockSpec((HID, Cout), lambda i: (0, 0)),
                pl.BlockSpec((1, Cout), lambda i: (0, 0)),
            ],
            out_specs=pl.BlockSpec((M, Cout), lambda i: (i, 0)),
            scratch_shapes=[pltpu.VMEM((bt, H + 2, W + 2, HID), jnp.float32)],
        ),
        # Batch-tile steps are independent -> megacore-parallel on v7x.
        compiler_params=pltpu.CompilerParams(dimension_semantics=("parallel",)),
    )(x2d, w1, b1.reshape(1, -1), wdw, bdw.reshape(1, -1), w2, b2.reshape(1, -1))

    return out2d.reshape(B, N, Cout)


# ----------------------------------------------------------------------------
# Pure-JAX reference (NHWC, exact erf-GELU like torch.nn.GELU) for validation.
# ----------------------------------------------------------------------------
def newmlp_ref(x_bnc, w1, b1, wdw, bdw, w2, b2):
    B, N, C = x_bnc.shape
    H = W = int(math.sqrt(N))
    HID = w1.shape[1]
    x = x_bnc.reshape(B, H, W, C)
    h = jax.nn.gelu(jnp.einsum("bhwc,cd->bhwd", x, w1) + b1, approximate=False)
    dwk = wdw.reshape(3, 3, 1, HID)                    # HWIO, depthwise
    h = jax.lax.conv_general_dilated(
        h, dwk, window_strides=(1, 1), padding=((1, 1), (1, 1)),
        dimension_numbers=("NHWC", "HWIO", "NHWC"), feature_group_count=HID)
    h = jax.nn.gelu(h + bdw, approximate=False)
    h = jax.nn.gelu(jnp.einsum("bhwd,dc->bhwc", h, w2) + b2, approximate=False)
    return h.reshape(B, N, -1)


# ----------------------------------------------------------------------------
# Parameter setup: deterministic init + eval-mode BN folded into conv params.
# ----------------------------------------------------------------------------
def _fold_bn(w, b, gamma, beta, mean, var, eps=1e-5):
    scale = gamma / jnp.sqrt(var + eps)     # per output channel (last dim of w)
    return w * scale, b * scale + (beta - mean * scale)


def make_params(key, C, HID):
    ks = jax.random.split(key, 18)
    f32 = jnp.float32

    def bn(k0, k1, k2, k3, dim):
        gamma = jax.random.uniform(k0, (dim,), f32, 0.5, 1.5)
        beta = 0.1 * jax.random.normal(k1, (dim,), f32)
        mean = 0.1 * jax.random.normal(k2, (dim,), f32)
        var = jax.random.uniform(k3, (dim,), f32, 0.5, 1.5)
        return gamma, beta, mean, var

    # fc1: 1x1 conv (C -> HID)
    w1 = 0.2 * jax.random.normal(ks[0], (C, HID), f32)
    b1 = 0.1 * jax.random.normal(ks[1], (HID,), f32)
    w1, b1 = _fold_bn(w1, b1, *bn(ks[2], ks[3], ks[4], ks[5], HID))

    # dw: 3x3 depthwise conv (HID groups); wdw[dh, dw, c] == torch_w[c, 0, dh, dw]
    wdw = 0.2 * jax.random.normal(ks[6], (3, 3, HID), f32)
    bdw = 0.1 * jax.random.normal(ks[7], (HID,), f32)
    wdw, bdw = _fold_bn(wdw, bdw, *bn(ks[8], ks[9], ks[10], ks[11], HID))

    # fc2: 1x1 conv (HID -> C)
    w2 = 0.2 * jax.random.normal(ks[12], (HID, C), f32)
    b2 = 0.1 * jax.random.normal(ks[13], (C,), f32)
    w2, b2 = _fold_bn(w2, b2, *bn(ks[14], ks[15], ks[16], ks[17], C))

    return w1, b1, wdw, bdw, w2, b2


if __name__ == "__main__":
    B, H, W = 8, 8, 8          # N = H*W = 64; bt = 4 -> grid = 2 (even, v7x-friendly)
    C, HID = 16, 32            # in_features=16, hidden_features=32
    N = H * W

    key = jax.random.PRNGKey(0)
    kx, kp = jax.random.split(key)
    x = jax.random.normal(kx, (B, N, C), jnp.float32)
    params = make_params(kp, C, HID)

    out = jax.block_until_ready(newmlp_pallas(x, *params))
    ref = jax.block_until_ready(newmlp_ref(x, *params))

    assert out.shape == (B, N, C), out.shape
    # Tolerance covers the tanh-form GELU used in the kernel (<=~5e-4 per
    # activation vs. the exact erf GELU of the reference, compounded over the
    # three conv+GELU stages); matmuls / depthwise conv are f32-exact.
    np.testing.assert_allclose(np.asarray(out), np.asarray(ref), rtol=3e-3, atol=3e-3)
    print("KERNEL_OK")
</pallas_src>

<mosaic_0001>
module attributes {stable_mosaic.version = 11 : i64} {
  func.func @_newmlp_kernel(%arg0: i32, %arg1: memref<256x16xf32, #tpu.memory_space<vmem>>, %arg2: memref<16x32xf32, #tpu.memory_space<vmem>>, %arg3: memref<1x32xf32, #tpu.memory_space<vmem>>, %arg4: memref<3x3x32xf32, #tpu.memory_space<vmem>>, %arg5: memref<1x32xf32, #tpu.memory_space<vmem>>, %arg6: memref<32x16xf32, #tpu.memory_space<vmem>>, %arg7: memref<1x16xf32, #tpu.memory_space<vmem>>, %arg8: memref<256x16xf32, #tpu.memory_space<vmem>>, %arg9: memref<4x10x10x32xf32, #tpu.memory_space<vmem>>) attributes {dimension_semantics = [#tpu.dimension_semantics<parallel>], iteration_bounds = array<i64: 2>, scalar_prefetch = 0 : i64, scratch_operands = 1 : i64, tpu.core_type = #tpu.core_type<tc>, window_params = [{transform_indices = @transform_0, window_bounds = array<i64: 256, 16>}, {pipeline_mode = #tpu.pipeline_mode<synchronous>, transform_indices = @transform_1, window_bounds = array<i64: 16, 32>}, {pipeline_mode = #tpu.pipeline_mode<synchronous>, transform_indices = @transform_2, window_bounds = array<i64: 1, 32>}, {pipeline_mode = #tpu.pipeline_mode<synchronous>, transform_indices = @transform_3, window_bounds = array<i64: 3, 3, 32>}, {pipeline_mode = #tpu.pipeline_mode<synchronous>, transform_indices = @transform_4, window_bounds = array<i64: 1, 32>}, {pipeline_mode = #tpu.pipeline_mode<synchronous>, transform_indices = @transform_5, window_bounds = array<i64: 32, 16>}, {pipeline_mode = #tpu.pipeline_mode<synchronous>, transform_indices = @transform_6, window_bounds = array<i64: 1, 16>}, {transform_indices = @transform_7, window_bounds = array<i64: 256, 16>}]} {
    %c0 = arith.constant 0 : index
    %c0_0 = arith.constant 0 : index
    %0 = vector.load %arg1[%c0, %c0_0] : memref<256x16xf32, #tpu.memory_space<vmem>>, vector<256x16xf32>
    %c0_1 = arith.constant 0 : index
    %c0_2 = arith.constant 0 : index
    %1 = vector.load %arg2[%c0_1, %c0_2] : memref<16x32xf32, #tpu.memory_space<vmem>>, vector<16x32xf32>
    %cst = arith.constant dense<0.000000e+00> : vector<256x32xf32>
    %2 = tpu.matmul %0, %1, %cst {dimension_numbers = #tpu.dot_dimension_numbers<[1], [0], [0], [1], [0, 0, 1, 1], [], []>} : vector<256x16xf32>, vector<16x32xf32>, vector<256x32xf32> -> vector<256x32xf32>
    %c0_3 = arith.constant 0 : index
    %c0_4 = arith.constant 0 : index
    %3 = vector.load %arg3[%c0_3, %c0_4] : memref<1x32xf32, #tpu.memory_space<vmem>>, vector<1x32xf32>
    %4 = vector.broadcast %3 : vector<1x32xf32> to vector<256x32xf32>
    %5 = arith.addf %2, %4 : vector<256x32xf32>
    %cst_5 = arith.constant 5.000000e-01 : f32
    %6 = vector.broadcast %cst_5 : f32 to vector<256x32xf32>
    %7 = arith.mulf %6, %5 : vector<256x32xf32>
    %cst_6 = arith.constant 4.471500e-02 : f32
    %8 = vector.broadcast %cst_6 : f32 to vector<256x32xf32>
    %9 = arith.mulf %8, %5 : vector<256x32xf32>
    %10 = arith.mulf %9, %5 : vector<256x32xf32>
    %11 = arith.mulf %10, %5 : vector<256x32xf32>
    %12 = arith.addf %5, %11 : vector<256x32xf32>
    %cst_7 = arith.constant 0.797884583 : f32
    %13 = vector.broadcast %cst_7 : f32 to vector<256x32xf32>
    %14 = arith.mulf %13, %12 : vector<256x32xf32>
    %15 = math.tanh %14 : vector<256x32xf32>
    %cst_8 = arith.constant 1.000000e+00 : f32
    %16 = vector.broadcast %cst_8 : f32 to vector<256x32xf32>
    %17 = arith.addf %16, %15 : vector<256x32xf32>
    %18 = arith.mulf %7, %17 : vector<256x32xf32>
    %cst_9 = arith.constant 0.000000e+00 : f32
    %19 = vector.broadcast %cst_9 : f32 to vector<4x1x10x32xf32>
    %c0_10 = arith.constant 0 : index
    %c0_11 = arith.constant 0 : index
    %c0_12 = arith.constant 0 : index
    %c0_13 = arith.constant 0 : index
    %20 = vector.load %arg9[%c0_10, %c0_11, %c0_12, %c0_13] : memref<4x10x10x32xf32, #tpu.memory_space<vmem>>, vector<4x1x10x32xf32>
    tpu.vector_store %arg9[%c0_10, %c0_11, %c0_12, %c0_13], %19 {strides = array<i32>} : memref<4x10x10x32xf32, #tpu.memory_space<vmem>>, vector<4x1x10x32xf32>,
    %c0_14 = arith.constant 0 : index
    %c9 = arith.constant 9 : index
    %c0_15 = arith.constant 0 : index
    %c0_16 = arith.constant 0 : index
    %21 = vector.load %arg9[%c0_14, %c9, %c0_15, %c0_16] : memref<4x10x10x32xf32, #tpu.memory_space<vmem>>, vector<4x1x10x32xf32>
    tpu.vector_store %arg9[%c0_14, %c9, %c0_15, %c0_16], %19 {strides = array<i32>} : memref<4x10x10x32xf32, #tpu.memory_space<vmem>>, vector<4x1x10x32xf32>,
    %cst_17 = arith.constant 0.000000e+00 : f32
    %22 = vector.broadcast %cst_17 : f32 to vector<4x10x1x32xf32>
    %c0_18 = arith.constant 0 : index
    %c0_19 = arith.constant 0 : index
    %c0_20 = arith.constant 0 : index
    %c0_21 = arith.constant 0 : index
    %23 = vector.load %arg9[%c0_18, %c0_19, %c0_20, %c0_21] : memref<4x10x10x32xf32, #tpu.memory_space<vmem>>, vector<4x10x1x32xf32>
    tpu.vector_store %arg9[%c0_18, %c0_19, %c0_20, %c0_21], %22 {strides = array<i32>} : memref<4x10x10x32xf32, #tpu.memory_space<vmem>>, vector<4x10x1x32xf32>,
    %c0_22 = arith.constant 0 : index
    %c0_23 = arith.constant 0 : index
    %c9_24 = arith.constant 9 : index
    %c0_25 = arith.constant 0 : index
    %24 = vector.load %arg9[%c0_22, %c0_23, %c9_24, %c0_25] : memref<4x10x10x32xf32, #tpu.memory_space<vmem>>, vector<4x10x1x32xf32>
    tpu.vector_store %arg9[%c0_22, %c0_23, %c9_24, %c0_25], %22 {strides = array<i32>} : memref<4x10x10x32xf32, #tpu.memory_space<vmem>>, vector<4x10x1x32xf32>,
    %25 = vector.shape_cast %18 : vector<256x32xf32> to vector<4x8x8x32xf32>
    %c0_26 = arith.constant 0 : index
    %c1 = arith.constant 1 : index
    %c1_27 = arith.constant 1 : index
    %c0_28 = arith.constant 0 : index
    %26 = vector.load %arg9[%c0_26, %c1, %c1_27, %c0_28] : memref<4x10x10x32xf32, #tpu.memory_space<vmem>>, vector<4x8x8x32xf32>
    tpu.vector_store %arg9[%c0_26, %c1, %c1_27, %c0_28], %25 {strides = array<i32>} : memref<4x10x10x32xf32, #tpu.memory_space<vmem>>, vector<4x8x8x32xf32>,
    %c0_29 = arith.constant 0 : index
    %c0_30 = arith.constant 0 : index
    %c0_31 = arith.constant 0 : index
    %27 = vector.load %arg4[%c0_29, %c0_30, %c0_31] : memref<3x3x32xf32, #tpu.memory_space<vmem>>, vector<3x3x32xf32>
    %28 = vector.extract_strided_slice %27 {offsets = [0, 0, 0], sizes = [1, 1, 32], strides = [1, 1, 1]} : vector<3x3x32xf32> to vector<1x1x32xf32>
    %c0_32 = arith.constant 0 : index
    %c0_33 = arith.constant 0 : index
    %c0_34 = arith.constant 0 : index
    %c0_35 = arith.constant 0 : index
    %29 = vector.load %arg9[%c0_32, %c0_33, %c0_34, %c0_35] : memref<4x10x10x32xf32, #tpu.memory_space<vmem>>, vector<4x8x8x32xf32>
    %30 = vector.shape_cast %28 : vector<1x1x32xf32> to vector<1x1x1x32xf32>
    %31 = vector.broadcast %30 : vector<1x1x1x32xf32> to vector<4x8x8x32xf32>
    %32 = arith.mulf %29, %31 : vector<4x8x8x32xf32>
    %33 = vector.extract_strided_slice %27 {offsets = [0, 1, 0], sizes = [1, 1, 32], strides = [1, 1, 1]} : vector<3x3x32xf32> to vector<1x1x32xf32>
    %c0_36 = arith.constant 0 : index
    %c0_37 = arith.constant 0 : index
    %c1_38 = arith.constant 1 : index
    %c0_39 = arith.constant 0 : index
    %34 = vector.load %arg9[%c0_36, %c0_37, %c1_38, %c0_39] : memref<4x10x10x32xf32, #tpu.memory_space<vmem>>, vector<4x8x8x32xf32>
    %35 = vector.shape_cast %33 : vector<1x1x32xf32> to vector<1x1x1x32xf32>
    %36 = vector.broadcast %35 : vector<1x1x1x32xf32> to vector<4x8x8x32xf32>
    %37 = arith.mulf %34, %36 : vector<4x8x8x32xf32>
    %38 = arith.addf %32, %37 : vector<4x8x8x32xf32>
    %39 = vector.extract_strided_slice %27 {offsets = [0, 2, 0], sizes = [1, 1, 32], strides = [1, 1, 1]} : vector<3x3x32xf32> to vector<1x1x32xf32>
    %c0_40 = arith.constant 0 : index
    %c0_41 = arith.constant 0 : index
    %c2 = arith.constant 2 : index
    %c0_42 = arith.constant 0 : index
    %40 = vector.load %arg9[%c0_40, %c0_41, %c2, %c0_42] : memref<4x10x10x32xf32, #tpu.memory_space<vmem>>, vector<4x8x8x32xf32>
    %41 = vector.shape_cast %39 : vector<1x1x32xf32> to vector<1x1x1x32xf32>
    %42 = vector.broadcast %41 : vector<1x1x1x32xf32> to vector<4x8x8x32xf32>
    %43 = arith.mulf %40, %42 : vector<4x8x8x32xf32>
    %44 = arith.addf %38, %43 : vector<4x8x8x32xf32>
    %45 = vector.extract_strided_slice %27 {offsets = [1, 0, 0], sizes = [1, 1, 32], strides = [1, 1, 1]} : vector<3x3x32xf32> to vector<1x1x32xf32>
    %c0_43 = arith.constant 0 : index
    %c1_44 = arith.constant 1 : index
    %c0_45 = arith.constant 0 : index
    %c0_46 = arith.constant 0 : index
    %46 = vector.load %arg9[%c0_43, %c1_44, %c0_45, %c0_46] : memref<4x10x10x32xf32, #tpu.memory_space<vmem>>, vector<4x8x8x32xf32>
    %47 = vector.shape_cast %45 : vector<1x1x32xf32> to vector<1x1x1x32xf32>
    %48 = vector.broadcast %47 : vector<1x1x1x32xf32> to vector<4x8x8x32xf32>
    %49 = arith.mulf %46, %48 : vector<4x8x8x32xf32>
    %50 = arith.addf %44, %49 : vector<4x8x8x32xf32>
    %51 = vector.extract_strided_slice %27 {offsets = [1, 1, 0], sizes = [1, 1, 32], strides = [1, 1, 1]} : vector<3x3x32xf32> to vector<1x1x32xf32>
    %c0_47 = arith.constant 0 : index
    %c1_48 = arith.constant 1 : index
    %c1_49 = arith.constant 1 : index
    %c0_50 = arith.constant 0 : index
    %52 = vector.load %arg9[%c0_47, %c1_48, %c1_49, %c0_50] : memref<4x10x10x32xf32, #tpu.memory_space<vmem>>, vector<4x8x8x32xf32>
    %53 = vector.shape_cast %51 : vector<1x1x32xf32> to vector<1x1x1x32xf32>
    %54 = vector.broadcast %53 : vector<1x1x1x32xf32> to vector<4x8x8x32xf32>
    %55 = arith.mulf %52, %54 : vector<4x8x8x32xf32>
    %56 = arith.addf %50, %55 : vector<4x8x8x32xf32>
    %57 = vector.extract_strided_slice %27 {offsets = [1, 2, 0], sizes = [1, 1, 32], strides = [1, 1, 1]} : vector<3x3x32xf32> to vector<1x1x32xf32>
    %c0_51 = arith.constant 0 : index
    %c1_52 = arith.constant 1 : index
    %c2_53 = arith.constant 2 : index
    %c0_54 = arith.constant 0 : index
    %58 = vector.load %arg9[%c0_51, %c1_52, %c2_53, %c0_54] : memref<4x10x10x32xf32, #tpu.memory_space<vmem>>, vector<4x8x8x32xf32>
    %59 = vector.shape_cast %57 : vector<1x1x32xf32> to vector<1x1x1x32xf32>
    %60 = vector.broadcast %59 : vector<1x1x1x32xf32> to vector<4x8x8x32xf32>
    %61 = arith.mulf %58, %60 : vector<4x8x8x32xf32>
    %62 = arith.addf %56, %61 : vector<4x8x8x32xf32>
    %63 = vector.extract_strided_slice %27 {offsets = [2, 0, 0], sizes = [1, 1, 32], strides = [1, 1, 1]} : vector<3x3x32xf32> to vector<1x1x32xf32>
    %c0_55 = arith.constant 0 : index
    %c2_56 = arith.constant 2 : index
    %c0_57 = arith.constant 0 : index
    %c0_58 = arith.constant 0 : index
    %64 = vector.load %arg9[%c0_55, %c2_56, %c0_57, %c0_58] : memref<4x10x10x32xf32, #tpu.memory_space<vmem>>, vector<4x8x8x32xf32>
    %65 = vector.shape_cast %63 : vector<1x1x32xf32> to vector<1x1x1x32xf32>
    %66 = vector.broadcast %65 : vector<1x1x1x32xf32> to vector<4x8x8x32xf32>
    %67 = arith.mulf %64, %66 : vector<4x8x8x32xf32>
    %68 = arith.addf %62, %67 : vector<4x8x8x32xf32>
    %69 = vector.extract_strided_slice %27 {offsets = [2, 1, 0], sizes = [1, 1, 32], strides = [1, 1, 1]} : vector<3x3x32xf32> to vector<1x1x32xf32>
    %c0_59 = arith.constant 0 : index
    %c2_60 = arith.constant 2 : index
    %c1_61 = arith.constant 1 : index
    %c0_62 = arith.constant 0 : index
    %70 = vector.load %arg9[%c0_59, %c2_60, %c1_61, %c0_62] : memref<4x10x10x32xf32, #tpu.memory_space<vmem>>, vector<4x8x8x32xf32>
    %71 = vector.shape_cast %69 : vector<1x1x32xf32> to vector<1x1x1x32xf32>
    %72 = vector.broadcast %71 : vector<1x1x1x32xf32> to vector<4x8x8x32xf32>
    %73 = arith.mulf %70, %72 : vector<4x8x8x32xf32>
    %74 = arith.addf %68, %73 : vector<4x8x8x32xf32>
    %75 = vector.extract_strided_slice %27 {offsets = [2, 2, 0], sizes = [1, 1, 32], strides = [1, 1, 1]} : vector<3x3x32xf32> to vector<1x1x32xf32>
    %c0_63 = arith.constant 0 : index
    %c2_64 = arith.constant 2 : index
    %c2_65 = arith.constant 2 : index
    %c0_66 = arith.constant 0 : index
    %76 = vector.load %arg9[%c0_63, %c2_64, %c2_65, %c0_66] : memref<4x10x10x32xf32, #tpu.memory_space<vmem>>, vector<4x8x8x32xf32>
    %77 = vector.shape_cast %75 : vector<1x1x32xf32> to vector<1x1x1x32xf32>
    %78 = vector.broadcast %77 : vector<1x1x1x32xf32> to vector<4x8x8x32xf32>
    %79 = arith.mulf %76, %78 : vector<4x8x8x32xf32>
    %80 = arith.addf %74, %79 : vector<4x8x8x32xf32>
    %c0_67 = arith.constant 0 : index
    %c0_68 = arith.constant 0 : index
    %81 = vector.load %arg5[%c0_67, %c0_68] : memref<1x32xf32, #tpu.memory_space<vmem>>, vector<1x32xf32>
    %82 = vector.shape_cast %81 : vector<1x32xf32> to vector<1x1x1x32xf32>
    %83 = vector.broadcast %82 : vector<1x1x1x32xf32> to vector<4x8x8x32xf32>
    %84 = arith.addf %80, %83 : vector<4x8x8x32xf32>
    %cst_69 = arith.constant 5.000000e-01 : f32
    %85 = vector.broadcast %cst_69 : f32 to vector<4x8x8x32xf32>
    %86 = arith.mulf %85, %84 : vector<4x8x8x32xf32>
    %cst_70 = arith.constant 4.471500e-02 : f32
    %87 = vector.broadcast %cst_70 : f32 to vector<4x8x8x32xf32>
    %88 = arith.mulf %87, %84 : vector<4x8x8x32xf32>
    %89 = arith.mulf %88, %84 : vector<4x8x8x32xf32>
    %90 = arith.mulf %89, %84 : vector<4x8x8x32xf32>
    %91 = arith.addf %84, %90 : vector<4x8x8x32xf32>
    %cst_71 = arith.constant 0.797884583 : f32
    %92 = vector.broadcast %cst_71 : f32 to vector<4x8x8x32xf32>
    %93 = arith.mulf %92, %91 : vector<4x8x8x32xf32>
    %94 = math.tanh %93 : vector<4x8x8x32xf32>
    %cst_72 = arith.constant 1.000000e+00 : f32
    %95 = vector.broadcast %cst_72 : f32 to vector<4x8x8x32xf32>
    %96 = arith.addf %95, %94 : vector<4x8x8x32xf32>
    %97 = arith.mulf %86, %96 : vector<4x8x8x32xf32>
    %98 = vector.shape_cast %97 : vector<4x8x8x32xf32> to vector<256x32xf32>
    %c0_73 = arith.constant 0 : index
    %c0_74 = arith.constant 0 : index
    %99 = vector.load %arg6[%c0_73, %c0_74] : memref<32x16xf32, #tpu.memory_space<vmem>>, vector<32x16xf32>
    %cst_75 = arith.constant dense<0.000000e+00> : vector<256x16xf32>
    %100 = tpu.matmul %98, %99, %cst_75 {dimension_numbers = #tpu.dot_dimension_numbers<[1], [0], [0], [1], [0, 0, 1, 1], [], []>} : vector<256x32xf32>, vector<32x16xf32>, vector<256x16xf32> -> vector<256x16xf32>
    %c0_76 = arith.constant 0 : index
    %c0_77 = arith.constant 0 : index
    %101 = vector.load %arg7[%c0_76, %c0_77] : memref<1x16xf32, #tpu.memory_space<vmem>>, vector<1x16xf32>
    %102 = vector.broadcast %101 : vector<1x16xf32> to vector<256x16xf32>
    %103 = arith.addf %100, %102 : vector<256x16xf32>
    %cst_78 = arith.constant 5.000000e-01 : f32
    %104 = vector.broadcast %cst_78 : f32 to vector<256x16xf32>
    %105 = arith.mulf %104, %103 : vector<256x16xf32>
    %cst_79 = arith.constant 4.471500e-02 : f32
    %106 = vector.broadcast %cst_79 : f32 to vector<256x16xf32>
    %107 = arith.mulf %106, %103 : vector<256x16xf32>
    %108 = arith.mulf %107, %103 : vector<256x16xf32>
    %109 = arith.mulf %108, %103 : vector<256x16xf32>
    %110 = arith.addf %103, %109 : vector<256x16xf32>
    %cst_80 = arith.constant 0.797884583 : f32
    %111 = vector.broadcast %cst_80 : f32 to vector<256x16xf32>
    %112 = arith.mulf %111, %110 : vector<256x16xf32>
    %113 = math.tanh %112 : vector<256x16xf32>
    %cst_81 = arith.constant 1.000000e+00 : f32
    %114 = vector.broadcast %cst_81 : f32 to vector<256x16xf32>
    %115 = arith.addf %114, %113 : vector<256x16xf32>
    %116 = arith.mulf %105, %115 : vector<256x16xf32>
    %c0_82 = arith.constant 0 : index
    %c0_83 = arith.constant 0 : index
    %117 = vector.load %arg8[%c0_82, %c0_83] : memref<256x16xf32, #tpu.memory_space<vmem>>, vector<256x16xf32>
    tpu.vector_store %arg8[%c0_82, %c0_83], %116 {strides = array<i32>} : memref<256x16xf32, #tpu.memory_space<vmem>>, vector<256x16xf32>,
    return
  }
  func.func @transform_0(%arg0: i32) -> (i32, i32) {
    %c0_i32 = arith.constant 0 : i32
    %c0_i32_0 = arith.constant 0 : i32
    return %arg0, %c0_i32 : i32, i32
  }
  func.func @transform_1(%arg0: i32) -> (i32, i32) {
    %c0_i32 = arith.constant 0 : i32
    %c0_i32_0 = arith.constant 0 : i32
    %c0_i32_1 = arith.constant 0 : i32
    return %c0_i32, %c0_i32_0 : i32, i32
  }
  func.func @transform_2(%arg0: i32) -> (i32, i32) {
    %c0_i32 = arith.constant 0 : i32
    %c0_i32_0 = arith.constant 0 : i32
    %c0_i32_1 = arith.constant 0 : i32
    return %c0_i32, %c0_i32_0 : i32, i32
  }
  func.func @transform_3(%arg0: i32) -> (i32, i32, i32) {
    %c0_i32 = arith.constant 0 : i32
    %c0_i32_0 = arith.constant 0 : i32
    %c0_i32_1 = arith.constant 0 : i32
    %c0_i32_2 = arith.constant 0 : i32
    return %c0_i32, %c0_i32_0, %c0_i32_1 : i32, i32, i32
  }
  func.func @transform_4(%arg0: i32) -> (i32, i32) {
    %c0_i32 = arith.constant 0 : i32
    %c0_i32_0 = arith.constant 0 : i32
    %c0_i32_1 = arith.constant 0 : i32
    return %c0_i32, %c0_i32_0 : i32, i32
  }
  func.func @transform_5(%arg0: i32) -> (i32, i32) {
    %c0_i32 = arith.constant 0 : i32
    %c0_i32_0 = arith.constant 0 : i32
    %c0_i32_1 = arith.constant 0 : i32
    return %c0_i32, %c0_i32_0 : i32, i32
  }
  func.func @transform_6(%arg0: i32) -> (i32, i32) {
    %c0_i32 = arith.constant 0 : i32
    %c0_i32_0 = arith.constant 0 : i32
    %c0_i32_1 = arith.constant 0 : i32
    return %c0_i32, %c0_i32_0 : i32, i32
  }
  func.func @transform_7(%arg0: i32) -> (i32, i32) {
    %c0_i32 = arith.constant 0 : i32
    %c0_i32_0 = arith.constant 0 : i32
    return %arg0, %c0_i32 : i32, i32
  }
}

</mosaic_0001>

<bundles_post_ra>
// kernel: tpu_custom_call.1
= control target key start
LH: loop header
LB: loop body
LE: loop exit
PB: predicated region body
PF: predicated region fallthrough
CT: control target
= control target key end

     0   :  { %s3480_s24 = smov 0   ;;  %s4776_s0 = inlined_call_operand.vmem [shape: f32[512,16], index: 0, kind: input, shape index: {}]   ;;  %s4777_s1 = inlined_call_operand.vmem [shape: f32[16,32], index: 1, kind: input, shape index: {}]   ;;  %s4778_s2 = inlined_call_operand.vmem [shape: f32[1,32], index: 2, kind: input, shape index: {}]   ;;  %s4779_s3 = inlined_call_operand.vmem [shape: f32[3,3,32], index: 3, kind: input, shape index: {}]   ;;  %s4780_s4 = inlined_call_operand.vmem [shape: f32[1,32], index: 4, kind: input, shape index: {}]   ;;  %s4781_s5 = inlined_call_operand.vmem [shape: f32[32,16], index: 5, kind: input, shape index: {}]   ;;  %s4782_s6 = inlined_call_operand.vmem [shape: f32[1,16], index: 6, kind: input, shape index: {}]   ;;  %s4783_s7 = inlined_call_operand.vmem [shape: f32[512,16], index: 7, kind: output, shape index: {}]  }
   0x1 LB: > { %s2973_s25 = sadd.s32 4294967295, %s3437_s24   ;;  %p2977_p0 = scmp.ge.s32.totalorder %s3437_s24, 1  ;;  %s3437_s24 = sphi %s3480_s24, %s17_s24  }
   0x2   : > { %p238_p1 = scmp.lt.s32.totalorder %s3437_s24, 3 }
   0x4   : > { %p239_p2 = pnand %p2977_p0, %p238_p1 }
   0x5   : > { %s2978_s30 = sshll.u32 (!%p239_p2), %s2973_s25, 5 }
   0x6   : > { %242 = sbr.rel (%p239_p2) target bundleno = 762 (0x2fa), region = 48  ;;  %p271_p3 = scmp.lt.s32.totalorder (!%p239_p2), %s2978_s30, 63 }
   0xb   : > { %v315_v0 = vld [vmem:[%s4777_s1 + $0x8] sm:$0xff]  ;;  %v314_v1 = vld [vmem:[%s4777_s1] sm:$0xff]  ;;  %s4785_s30 = smov (!%p271_p3, %s2978_s30), 63  ;;  %vm323_vm0 = vcmask 130048   ;;  %vm933_vm1 = vcmask 261120   ;;  %v3439_v34 = vmov 0.0   ;;  %v1101_v38 = vlaneseq }
   0xc   : > { %3121 = vmatprep.subr.mxu0 %v315_v0  ;;  %s2979_s8 = sshll.u32 %s4785_s30, 3  ;;  %934 = vst.msk [vmem:[#allocation2] sm:$0xff] %vm933_vm1, %v3439_v34  ;;  %vm935_vm2 = vcmask 254976   ;;  %vm952_vm3 = vcmask 253952   ;;  %937 = vst.msk [vmem:[#allocation2 + $0xa0] sm:$0xff] %vm933_vm1, %v3439_v34  ;;  %v2268_v35 = vld [vmem:[%s4781_s5 + $0x18] sm:$0xff] }
   0xd   : > { %3122 = vmatpush3.msra.mxu0 %v315_v0  ;;  %s3502_s11 = scalar_lea.vmem %s4776_s0, %s2979_s8  ;;  %939 = vst.msk [vmem:[#allocation2 + $0x140] sm:$0xff] %vm933_vm1, %v3439_v34  ;;  %941 = vst.msk [vmem:[#allocation2 + $0x1e0] sm:$0xff] %vm933_vm1, %v3439_v34  ;;  %3173 = vmatprep.subr.mxu1 %v2268_v35  ;;  %v2267_v36 = vld [vmem:[%s4781_s5 + $0x10] sm:$0xff]  ;;  %v2266_v37 = vld [vmem:[%s4781_s5 + $0x8] sm:$0xff]  ;;  %v1102_v39 = vshrl.u32 %v1101_v38, 7  ;;  %s4680_s16 = scalar_lea.vmem %s4783_s7, %s2979_s8 }
   0xe   : > { %3123 = vmatprep.subr.mxu0 %v314_v1  ;;  %v282_v2 = vld [vmem:[%s3502_s11] sm:$0xff]  ;;  %v283_v3 = vld [vmem:[%s3502_s11 + $0x8] sm:$0xff]  ;;  %v284_v4 = vld [vmem:[%s3502_s11 + $0x10] sm:$0xff]  ;;  %944 = vst.msk [vmem:[#allocation2 + $0x90] sm:$0xff] %vm933_vm1, %v3439_v34  ;;  %3174 = vmatpush3.msra.mxu1 %v2268_v35 }
   0xf   : > { %3124 = vmatpush3.msra.mxu0 %v314_v1  ;;  %3125 = vmatprep.mubr.msk.f32.mxu0 %vm323_vm0, %v282_v2  ;;  %v285_v5 = vld [vmem:[%s3502_s11 + $0x18] sm:$0xff]  ;;  %v286_v6 = vld [vmem:[%s3502_s11 + $0x20] sm:$0xff]  ;;  %v287_v7 = vld [vmem:[%s3502_s11 + $0x28] sm:$0xff]  ;;  %946 = vst.msk [vmem:[#allocation2 + $0x130] sm:$0xff] %vm933_vm1, %v3439_v34  ;;  %v1103_v40 = vsub.s32 0, %v1102_v39  ;;  %v1171_v41 = vsub.s32 1, %v1102_v39 }
  0x10   : > { %3126 = vmatmul.mubr.msk.f32.vlgmr.msra.gmra.mxu0 %vm323_vm0, %v283_v3  ;;  %v288_v8 = vld [vmem:[%s3502_s11 + $0x30] sm:$0xff]  ;;  %v289_v9 = vld [vmem:[%s3502_s11 + $0x38] sm:$0xff]  ;;  %v290_v10 = vld [vmem:[%s3502_s11 + $0x40] sm:$0xff]  ;;  %948 = vst.msk [vmem:[#allocation2 + $0x1d0] sm:$0xff] %vm933_vm1, %v3439_v34  ;;  %3175 = vmatprep.subr.mxu1 %v2267_v36  ;;  %v1271_v46 = vsub.s32 2, %v1102_v39 }
  0x11   : > { %3128 = vmatprep.mubr.msk.f32.mxu0 %vm323_vm0, %v284_v4  ;;  %v291_v11 = vld [vmem:[%s3502_s11 + $0x48] sm:$0xff]  ;;  %v292_v12 = vld [vmem:[%s3502_s11 + $0x50] sm:$0xff]  ;;  %v293_v13 = vld [vmem:[%s3502_s11 + $0x58] sm:$0xff]  ;;  %950 = vst.msk [vmem:[#allocation2 + $0x270] sm:$0xff] %vm933_vm1, %v3439_v34  ;;  %3176 = vmatpush3.msra.mxu1 %v2267_v36 }
  0x12   : > { %v294_v14 = vld [vmem:[%s3502_s11 + $0x60] sm:$0xff]  ;;  %v295_v15 = vld [vmem:[%s3502_s11 + $0x68] sm:$0xff]  ;;  %v296_v16 = vld [vmem:[%s3502_s11 + $0x70] sm:$0xff]  ;;  %936 = vst.msk [vmem:[#allocation2 + $0x8] sm:$0x3] %vm935_vm2, %v3439_v34  ;;  %3177 = vmatprep.subr.mxu1 %v2266_v37 }
  0x13   : > { %v297_v17 = vld [vmem:[%s3502_s11 + $0x78] sm:$0xff]  ;;  %v298_v18 = vld [vmem:[%s3502_s11 + $0x80] sm:$0xff]  ;;  %v299_v19 = vld [vmem:[%s3502_s11 + $0x88] sm:$0xff]  ;;  %953 = vst.msk [vmem:[#allocation2] sm:$0x1] %vm952_vm3, %v3439_v34  ;;  %3178 = vmatpush3.msra.mxu1 %v2266_v37 }
  0x14   : > { %3129 = vmatmul.mubr.msk.f32.gmra.mxu0 %vm323_vm0, %v285_v5  ;;  %v300_v20 = vld [vmem:[%s3502_s11 + $0x90] sm:$0xff]  ;;  %v301_v21 = vld [vmem:[%s3502_s11 + $0x98] sm:$0xff]  ;;  %v302_v22 = vld [vmem:[%s3502_s11 + $0xa0] sm:$0xff]  ;;  %954 = vst.msk [vmem:[#allocation2 + $0x10] sm:$0x1] %vm952_vm3, %v3439_v34 }
  0x15   : > { %3131 = vmatprep.mubr.msk.f32.mxu0 %vm323_vm0, %v286_v6  ;;  %v303_v23 = vld [vmem:[%s3502_s11 + $0xa8] sm:$0xff]  ;;  %v304_v24 = vld [vmem:[%s3502_s11 + $0xb0] sm:$0xff]  ;;  %v305_v25 = vld [vmem:[%s3502_s11 + $0xb8] sm:$0xff]  ;;  %955 = vst.msk [vmem:[#allocation2 + $0x20] sm:$0x1] %vm952_vm3, %v3439_v34 }
  0x16   : > { %v306_v26 = vld [vmem:[%s3502_s11 + $0xc0] sm:$0xff]  ;;  %v307_v27 = vld [vmem:[%s3502_s11 + $0xc8] sm:$0xff]  ;;  %v308_v28 = vld [vmem:[%s3502_s11 + $0xd0] sm:$0xff]  ;;  %994 = vst.msk [vmem:[#allocation2 + $0x19] sm:$0x1] %vm952_vm3, %v3439_v34 }
  0x17   : > { %v309_v29 = vld [vmem:[%s3502_s11 + $0xd8] sm:$0xff]  ;;  %v310_v30 = vld [vmem:[%s3502_s11 + $0xe0] sm:$0xff]  ;;  %v311_v31 = vld [vmem:[%s3502_s11 + $0xe8] sm:$0xff]  ;;  %995 = vst.msk [vmem:[#allocation2 + $0x29] sm:$0x1] %vm952_vm3, %v3439_v34 }
  0x18   : > { %3132 = vmatmul.mubr.msk.f32.gmra.mxu0 %vm323_vm0, %v287_v7  ;;  %v312_v32 = vld [vmem:[%s3502_s11 + $0xf0] sm:$0xff]  ;;  %v313_v33 = vld [vmem:[%s3502_s11 + $0xf8] sm:$0xff]  ;;  %938 = vst.msk [vmem:[#allocation2 + $0xa8] sm:$0x3] %vm935_vm2, %v3439_v34  ;;  %940 = vst.msk [vmem:[#allocation2 + $0x148] sm:$0x3] %vm935_vm2, %v3439_v34 }
  0x19   : > { %3134 = vmatprep.mubr.msk.f32.mxu0 %vm323_vm0, %v288_v8  ;;  %942 = vst.msk [vmem:[#allocation2 + $0x1e8] sm:$0x3] %vm935_vm2, %v3439_v34  ;;  %945 = vst.msk [vmem:[#allocation2 + $0x98] sm:$0x3] %vm935_vm2, %v3439_v34  ;;  %v1066_v42 = vld [vmem:[%s4779_s3] sm:$0x7] }
  0x1a   : > { %947 = vst.msk [vmem:[#allocation2 + $0x138] sm:$0x3] %vm935_vm2, %v3439_v34  ;;  %949 = vst.msk [vmem:[#allocation2 + $0x1d8] sm:$0x3] %vm935_vm2, %v3439_v34  ;;  %v2265_v43 = vld [vmem:[%s4781_s5] sm:$0xff]  ;;  %v3775_v44 = vrot.slane %v1066_v42, %v1103_v40  ;;  %v3777_v45 = vrot.slane %v1066_v42, %v1171_v41  ;;  %v3786_v52 = vrot.slane %v1066_v42, %v1271_v46 }
  0x1b   : > { %951 = vst.msk [vmem:[#allocation2 + $0x278] sm:$0x3] %vm935_vm2, %v3439_v34  ;;  %3179 = vmatprep.subr.mxu1 %v2265_v43  ;;  %v1069_v47 = vld [vmem:[#allocation2] sm:$0xff]  ;;  %v1068_v7 = vld [vmem:[%s4779_s3 + $0x8] sm:$0x7] }
  0x1c   : > { %3135 = vmatmul.mubr.msk.f32.gmra.mxu0 %vm323_vm0, %v289_v9  ;;  %956 = vst.msk [vmem:[#allocation2 + $0x30] sm:$0x1] %vm952_vm3, %v3439_v34  ;;  %957 = vst.msk [vmem:[#allocation2 + $0x40] sm:$0x1] %vm952_vm3, %v3439_v34  ;;  %v1137_v48 = vld [vmem:[#allocation2 + $0x1] sm:$0xff]  ;;  %3180 = vmatpush3.msra.mxu1 %v2265_v43  ;;  %v1105_v50 = vmul.f32 %v3775_v44, %v1069_v47 }
  0x1d   : > { %3137 = vmatprep.mubr.msk.f32.mxu0 %vm323_vm0, %v290_v10  ;;  %958 = vst.msk [vmem:[#allocation2 + $0x50] sm:$0x1] %vm952_vm3, %v3439_v34  ;;  %959 = vst.msk [vmem:[#allocation2 + $0x60] sm:$0x1] %vm952_vm3, %v3439_v34  ;;  %v3782_v49 = vld [vmem:[%s4778_s2] ss:$0 sm:$0xff]  ;;  %v1173_v51 = vmul.f32 %v3777_v45, %v1137_v48 }
  0x1e   : > { %960 = vst.msk [vmem:[#allocation2 + $0x70] sm:$0x1] %vm952_vm3, %v3439_v34  ;;  %961 = vst.msk [vmem:[#allocation2 + $0x80] sm:$0x1] %vm952_vm3, %v3439_v34  ;;  %v1067_v1 = vld [vmem:[%s4779_s3 + $0x4] sm:$0x7] }
  0x1f   : > { %964 = vst.msk [vmem:[#allocation2 + $0xb0] sm:$0x1] %vm952_vm3, %v3439_v34  ;;  %965 = vst.msk [vmem:[#allocation2 + $0xc0] sm:$0x1] %vm952_vm3, %v3439_v34  ;;  %v1145_v55 = vld [vmem:[#allocation2 + $0xa1] sm:$0xff]  ;;  %v1205_v59 = vadd.f32 %v1173_v51, %v1105_v50  ;;  %v3802_v10 = vrot.slane %v1067_v1, %v1103_v40 }
  0x20   : > { %3138 = vmatmul.mubr.msk.f32.gmra.mxu0 %vm323_vm0, %v291_v11  ;;  %966 = vst.msk [vmem:[#allocation2 + $0xd0] sm:$0x1] %vm952_vm3, %v3439_v34  ;;  %967 = vst.msk [vmem:[#allocation2 + $0xe0] sm:$0x1] %vm952_vm3, %v3439_v34  ;;  %v1181_v62 = vmul.f32 %v3777_v45, %v1145_v55 }
  0x21   : > { %3140 = vmatprep.mubr.msk.f32.mxu0 %vm323_vm0, %v292_v12  ;;  %968 = vst.msk [vmem:[#allocation2 + $0xf0] sm:$0x1] %vm952_vm3, %v3439_v34  ;;  %969 = vst.msk [vmem:[#allocation2 + $0x100] sm:$0x1] %vm952_vm3, %v3439_v34 }
  0x22   : > { %970 = vst.msk [vmem:[#allocation2 + $0x110] sm:$0x1] %vm952_vm3, %v3439_v34  ;;  %971 = vst.msk [vmem:[#allocation2 + $0x120] sm:$0x1] %vm952_vm3, %v3439_v34 }
  0x23   : > { %974 = vst.msk [vmem:[#allocation2 + $0x150] sm:$0x1] %vm952_vm3, %v3439_v34  ;;  %975 = vst.msk [vmem:[#allocation2 + $0x160] sm:$0x1] %vm952_vm3, %v3439_v34 }
  0x24   : > { %3141 = vmatmul.mubr.msk.f32.gmra.mxu0 %vm323_vm0, %v293_v13  ;;  %976 = vst.msk [vmem:[#allocation2 + $0x170] sm:$0x1] %vm952_vm3, %v3439_v34  ;;  %977 = vst.msk [vmem:[#allocation2 + $0x180] sm:$0x1] %vm952_vm3, %v3439_v34 }
  0x25   : > { %3143 = vmatprep.mubr.msk.f32.mxu0 %vm323_vm0, %v294_v14  ;;  %978 = vst.msk [vmem:[#allocation2 + $0x190] sm:$0x1] %vm952_vm3, %v3439_v34  ;;  %979 = vst.msk [vmem:[#allocation2 + $0x1a0] sm:$0x1] %vm952_vm3, %v3439_v34 }
  0x26   : > { %980 = vst.msk [vmem:[#allocation2 + $0x1b0] sm:$0x1] %vm952_vm3, %v3439_v34  ;;  %981 = vst.msk [vmem:[#allocation2 + $0x1c0] sm:$0x1] %vm952_vm3, %v3439_v34 }
  0x27   : > { %984 = vst.msk [vmem:[#allocation2 + $0x1f0] sm:$0x1] %vm952_vm3, %v3439_v34  ;;  %985 = vst.msk [vmem:[#allocation2 + $0x200] sm:$0x1] %vm952_vm3, %v3439_v34 }
  0x28   : > { %3144 = vmatmul.mubr.msk.f32.gmra.mxu0 %vm323_vm0, %v295_v15  ;;  %986 = vst.msk [vmem:[#allocation2 + $0x210] sm:$0x1] %vm952_vm3, %v3439_v34  ;;  %987 = vst.msk [vmem:[#allocation2 + $0x220] sm:$0x1] %vm952_vm3, %v3439_v34 }
  0x29   : > { %3146 = vmatprep.mubr.msk.f32.mxu0 %vm323_vm0, %v296_v16  ;;  %988 = vst.msk [vmem:[#allocation2 + $0x230] sm:$0x1] %vm952_vm3, %v3439_v34  ;;  %989 = vst.msk [vmem:[#allocation2 + $0x240] sm:$0x1] %vm952_vm3, %v3439_v34 }
  0x2a   : > { %990 = vst.msk [vmem:[#allocation2 + $0x250] sm:$0x1] %vm952_vm3, %v3439_v34  ;;  %991 = vst.msk [vmem:[#allocation2 + $0x260] sm:$0x1] %vm952_vm3, %v3439_v34 }
  0x2b   : > { %996 = vst.msk [vmem:[#allocation2 + $0x39] sm:$0x1] %vm952_vm3, %v3439_v34  ;;  %997 = vst.msk [vmem:[#allocation2 + $0x49] sm:$0x1] %vm952_vm3, %v3439_v34 }
  0x2c   : > { %3147 = vmatmul.mubr.msk.f32.gmra.mxu0 %vm323_vm0, %v297_v17  ;;  %998 = vst.msk [vmem:[#allocation2 + $0x59] sm:$0x1] %vm952_vm3, %v3439_v34  ;;  %999 = vst.msk [vmem:[#allocation2 + $0x69] sm:$0x1] %vm952_vm3, %v3439_v34 }
  0x2d   : > { %3149 = vmatprep.mubr.msk.f32.mxu0 %vm323_vm0, %v298_v18  ;;  %1000 = vst.msk [vmem:[#allocation2 + $0x79] sm:$0x1] %vm952_vm3, %v3439_v34  ;;  %1001 = vst.msk [vmem:[#allocation2 + $0x89] sm:$0x1] %vm952_vm3, %v3439_v34  ;;  %v3806_v18 = vrot.slane %v1067_v1, %v1171_v41 }
  0x2e   : > { %1004 = vst.msk [vmem:[#allocation2 + $0xb9] sm:$0x1] %vm952_vm3, %v3439_v34  ;;  %1005 = vst.msk [vmem:[#allocation2 + $0xc9] sm:$0x1] %vm952_vm3, %v3439_v34 }
  0x2f   : > { %1006 = vst.msk [vmem:[#allocation2 + $0xd9] sm:$0x1] %vm952_vm3, %v3439_v34  ;;  %1007 = vst.msk [vmem:[#allocation2 + $0xe9] sm:$0x1] %vm952_vm3, %v3439_v34 }
  0x30   : > { %3150 = vmatmul.mubr.msk.f32.gmra.mxu0 %vm323_vm0, %v299_v19  ;;  %1008 = vst.msk [vmem:[#allocation2 + $0xf9] sm:$0x1] %vm952_vm3, %v3439_v34  ;;  %1009 = vst.msk [vmem:[#allocation2 + $0x109] sm:$0x1] %vm952_vm3, %v3439_v34  ;;  %v3808_v19 = vrot.slane %v1067_v1, %v1271_v46 }
  0x31   : > { %3152 = vmatprep.mubr.msk.f32.mxu0 %vm323_vm0, %v300_v20  ;;  %1010 = vst.msk [vmem:[#allocation2 + $0x119] sm:$0x1] %vm952_vm3, %v3439_v34  ;;  %1011 = vst.msk [vmem:[#allocation2 + $0x129] sm:$0x1] %vm952_vm3, %v3439_v34  ;;  %v3810_v20 = vrot.slane %v1068_v7, %v1103_v40 }
  0x32   : > { %1014 = vst.msk [vmem:[#allocation2 + $0x159] sm:$0x1] %vm952_vm3, %v3439_v34  ;;  %1015 = vst.msk [vmem:[#allocation2 + $0x169] sm:$0x1] %vm952_vm3, %v3439_v34 }
  0x33   : > { %1016 = vst.msk [vmem:[#allocation2 + $0x179] sm:$0x1] %vm952_vm3, %v3439_v34  ;;  %1017 = vst.msk [vmem:[#allocation2 + $0x189] sm:$0x1] %vm952_vm3, %v3439_v34 }
  0x34   : > { %3153 = vmatmul.mubr.msk.f32.gmra.mxu0 %vm323_vm0, %v301_v21  ;;  %1018 = vst.msk [vmem:[#allocation2 + $0x199] sm:$0x1] %vm952_vm3, %v3439_v34  ;;  %1019 = vst.msk [vmem:[#allocation2 + $0x1a9] sm:$0x1] %vm952_vm3, %v3439_v34 }
  0x35   : > { %3155 = vmatprep.mubr.msk.f32.mxu0 %vm323_vm0, %v302_v22  ;;  %1020 = vst.msk [vmem:[#allocation2 + $0x1b9] sm:$0x1] %vm952_vm3, %v3439_v34  ;;  %1021 = vst.msk [vmem:[#allocation2 + $0x1c9] sm:$0x1] %vm952_vm3, %v3439_v34 }
  0x36   : > { %1024 = vst.msk [vmem:[#allocation2 + $0x1f9] sm:$0x1] %vm952_vm3, %v3439_v34  ;;  %1025 = vst.msk [vmem:[#allocation2 + $0x209] sm:$0x1] %vm952_vm3, %v3439_v34 }
  0x37   : > { %1026 = vst.msk [vmem:[#allocation2 + $0x219] sm:$0x1] %vm952_vm3, %v3439_v34  ;;  %1027 = vst.msk [vmem:[#allocation2 + $0x229] sm:$0x1] %vm952_vm3, %v3439_v34 }
  0x38   : > { %3156 = vmatmul.mubr.msk.f32.gmra.mxu0 %vm323_vm0, %v303_v23  ;;  %1028 = vst.msk [vmem:[#allocation2 + $0x239] sm:$0x1] %vm952_vm3, %v3439_v34  ;;  %1029 = vst.msk [vmem:[#allocation2 + $0x249] sm:$0x1] %vm952_vm3, %v3439_v34 }
  0x39   : > { %3158 = vmatprep.mubr.msk.f32.mxu0 %vm323_vm0, %v304_v24  ;;  %1030 = vst.msk [vmem:[#allocation2 + $0x259] sm:$0x1] %vm952_vm3, %v3439_v34  ;;  %1031 = vst.msk [vmem:[#allocation2 + $0x269] sm:$0x1] %vm952_vm3, %v3439_v34 }
  0x3a   : > { %962 = vst.msk [vmem:[#allocation2 + $0x90] sm:$0x1] %vm952_vm3, %v3439_v34  ;;  %963 = vst.msk [vmem:[#allocation2 + $0xa0] sm:$0x1] %vm952_vm3, %v3439_v34 }
  0x3b   : > { %972 = vst.msk [vmem:[#allocation2 + $0x130] sm:$0x1] %vm952_vm3, %v3439_v34  ;;  %973 = vst.msk [vmem:[#allocation2 + $0x140] sm:$0x1] %vm952_vm3, %v3439_v34 }
  0x3c   : > { %3159 = vmatmul.mubr.msk.f32.gmra.mxu0 %vm323_vm0, %v305_v25  ;;  %982 = vst.msk [vmem:[#allocation2 + $0x1d0] sm:$0x1] %vm952_vm3, %v3439_v34  ;;  %983 = vst.msk [vmem:[#allocation2 + $0x1e0] sm:$0x1] %vm952_vm3, %v3439_v34 }
  0x3d   : > { %3161 = vmatprep.mubr.msk.f32.mxu0 %vm323_vm0, %v306_v26  ;;  %992 = vst.msk [vmem:[#allocation2 + $0x270] sm:$0x1] %vm952_vm3, %v3439_v34  ;;  %993 = vst.msk [vmem:[#allocation2 + $0x9] sm:$0x1] %vm952_vm3, %v3439_v34 }
  0x3e   : > { %1002 = vst.msk [vmem:[#allocation2 + $0x99] sm:$0x1] %vm952_vm3, %v3439_v34  ;;  %1003 = vst.msk [vmem:[#allocation2 + $0xa9] sm:$0x1] %vm952_vm3, %v3439_v34 }
  0x3f   : > { %1012 = vst.msk [vmem:[#allocation2 + $0x139] sm:$0x1] %vm952_vm3, %v3439_v34  ;;  %1013 = vst.msk [vmem:[#allocation2 + $0x149] sm:$0x1] %vm952_vm3, %v3439_v34 }
  0x40   : > { %3162 = vmatmul.mubr.msk.f32.gmra.mxu0 %vm323_vm0, %v307_v27  ;;  %1022 = vst.msk [vmem:[#allocation2 + $0x1d9] sm:$0x1] %vm952_vm3, %v3439_v34  ;;  %1023 = vst.msk [vmem:[#allocation2 + $0x1e9] sm:$0x1] %vm952_vm3, %v3439_v34 }
  0x41   : > { %3164 = vmatprep.mubr.msk.f32.mxu0 %vm323_vm0, %v308_v28  ;;  %1032 = vst.msk [vmem:[#allocation2 + $0x279] sm:$0x1] %vm952_vm3, %v3439_v34  ;;  %v1077_v54 = vld [vmem:[#allocation2 + $0xa0] sm:$0xff]  ;;  %v3815_v28 = vrot.slane %v1068_v7, %v1171_v41  ;;  %v1645_v50 = vld [vmem:[#allocation2 + $0x90] sm:$0xff] }
  0x42   : > { %v1113_v61 = vmul.f32 %v3775_v44, %v1077_v54 }
  0x44   : > { %3165 = vmatmul.mubr.msk.f32.gmra.mxu0 %vm323_vm0, %v309_v29  ;;  %v1237_v53 = vld [vmem:[#allocation2 + $0x2] sm:$0xff]  ;;  %v1213_v11 = vadd.f32 %v1181_v62, %v1113_v61  ;;  %v3817_v29 = vrot.slane %v1068_v7, %v1271_v46 }
  0x45   : > { %3167 = vmatprep.mubr.msk.f32.mxu0 %vm323_vm0, %v310_v30  ;;  %v1273_v60 = vmul.f32 %v3786_v52, %v1237_v53  ;;  %v1245_v3 = vld [vmem:[#allocation2 + $0xa2] sm:$0xff] }
  0x46   : > { %v1281_v15 = vmul.f32 %v3786_v52, %v1245_v3 }
  0x47   : > { %v3800_v9 = vadd.f32 %v1273_v60, %v1205_v59  ;;  %v1745_v60 = vld [vmem:[#allocation2 + $0x91] sm:$0xff] }
  0x48   : > { %3168 = vmatmul.mubr.msk.f32.gmra.mxu0 %vm323_vm0, %v311_v31 }
  0x49   : > { %3170 = vmatprep.mubr.msk.f32.mxu0 %vm323_vm0, %v312_v32 }
  0x4c   : > { %3171 = vmatmul.mubr.msk.f32.gmra.mxu0 %vm323_vm0, %v313_v33  ;;  %v3819_v33 = vadd.f32 %v1281_v15, %v1213_v11 }
  0xd0   : > { %v3127_v56 = vpop.f32.mrf.mxu0 }
  0xd1   : > { %v492_v57 = vadd.f32 %v3127_v56, %v3782_v49 }
  0xd2   : > { %v486_v58 = vpop.f32.mrf.mxu0 }
  0xd3   : > { %v678_v63 = vmul.f32 0.044715, %v492_v57  ;;  %v487_v0 = vadd.f32 %v3782_v49, %v486_v58  ;;  %v3813_v25 = vmul.f32 0.5, %v492_v57 }
  0xd4   : > { %v3130_v2 = vpop.f32.mrf.mxu0 }
  0xd5   : > { %v710_v4 = vmul.f32 %v678_v63, %v492_v57  ;;  %v677_v5 = vmul.f32 0.044715, %v487_v0  ;;  %v502_v6 = vadd.f32 %v3130_v2, %v3782_v49  ;;  %v3821_v34 = vmul.f32 0.5, %v487_v0 }
  0xd6   : > { %v496_v8 = vpop.f32.mrf.mxu0  ;;  %v3834_v63 = vmul.f32 %v3810_v20, %v1645_v50 }
  0xd7   : > { %v742_v12 = vmul.f32 %v710_v4, %v492_v57  ;;  %v709_v13 = vmul.f32 %v677_v5, %v487_v0  ;;  %v680_v14 = vmul.f32 0.044715, %v502_v6  ;;  %v497_v16 = vadd.f32 %v3782_v49, %v496_v8 }
  0xd8   : > { %v3133_v17 = vpop.f32.mrf.mxu0  ;;  %v3825_v42 = vmul.f32 0.5, %v502_v6  ;;  %v3840_v8 = vmul.f32 %v3815_v28, %v1745_v60 }
  0xd9   : > { %v774_v21 = vadd.f32 %v742_v12, %v492_v57  ;;  %v741_v22 = vmul.f32 %v709_v13, %v487_v0  ;;  %v712_v23 = vmul.f32 %v680_v14, %v502_v6  ;;  %v512_v24 = vadd.f32 %v3133_v17, %v3782_v49 }
  0xda   : > { %v679_v26 = vmul.f32 0.044715, %v497_v16  ;;  %v506_v27 = vpop.f32.mrf.mxu0  ;;  %v3827_v53 = vmul.f32 0.5, %v497_v16 }
  0xdb   : > { %v806_v30 = vmul.f32 0.7978846, %v774_v21  ;;  %v773_v31 = vadd.f32 %v741_v22, %v487_v0  ;;  %v744_v32 = vmul.f32 %v712_v23, %v502_v6  ;;  %v682_v36 = vmul.f32 0.044715, %v512_v24 }
  0xdc   : > { %v711_v35 = vmul.f32 %v679_v26, %v497_v16  ;;  %v507_v37 = vadd.f32 %v3782_v49, %v506_v27  ;;  %v3136_v38 = vpop.f32.mrf.mxu0  ;;  %v3836_v1 = vmul.f32 0.5, %v512_v24 }
  0xdd   : > { %3238 = vtanh.f32 %v806_v30  ;;  %v805_v39 = vmul.f32 0.7978846, %v773_v31  ;;  %v776_v40 = vadd.f32 %v744_v32, %v502_v6  ;;  %v522_v41 = vadd.f32 %v3136_v38, %v3782_v49 }
  0xde   : > { %v743_v43 = vmul.f32 %v711_v35, %v497_v16  ;;  %v714_v46 = vmul.f32 %v682_v36, %v512_v24  ;;  %v681_v47 = vmul.f32 0.044715, %v507_v37  ;;  %v516_v48 = vpop.f32.mrf.mxu0  ;;  %v3849_v22 = vmul.f32 0.5, %v507_v37  ;;  %v1845_v35 = vld [vmem:[#allocation2 + $0x92] sm:$0xff] }
  0xdf   : > { %3240 = vtanh.f32 %v805_v39  ;;  %v808_v51 = vmul.f32 0.7978846, %v776_v40  ;;  %v684_v54 = vmul.f32 0.044715, %v522_v41  ;;  %v517_v58 = vadd.f32 %v3782_v49, %v516_v48 }
  0xe0   : > { %v775_v55 = vadd.f32 %v743_v43, %v497_v16  ;;  %v746_v56 = vmul.f32 %v714_v46, %v512_v24  ;;  %v713_v57 = vmul.f32 %v681_v47, %v507_v37  ;;  %v3139_v59 = vpop.f32.mrf.mxu0  ;;  %v3852_v27 = vmul.f32 0.5, %v522_v41 }
  0xe1   : > { %3242 = vtanh.f32 %v808_v51  ;;  %v716_v61 = vmul.f32 %v684_v54, %v522_v41  ;;  %v3831_v62 = vadd.f32 %v3139_v59, %v3782_v49  ;;  %v683_v6 = vmul.f32 0.044715, %v517_v58 }
  0xe2   : > { %v807_v0 = vmul.f32 0.7978846, %v775_v55  ;;  %v778_v2 = vadd.f32 %v746_v56, %v512_v24  ;;  %v745_v3 = vmul.f32 %v713_v57, %v507_v37  ;;  %v526_v4 = vpop.f32.mrf.mxu0  ;;  %v3868_v54 = vmul.f32 %v3817_v29, %v1845_v35 }
  0xe3   : > { %v748_v5 = vmul.f32 %v716_v61, %v522_v41  ;;  %v686_v7 = vmul.f32 0.044715, %v3831_v62  ;;  %v3843_v13 = vadd.f32 %v3782_v49, %v526_v4  ;;  %v715_v16 = vmul.f32 %v683_v6, %v517_v58 }
  0xe4   : > { %3244 = vtanh.f32 %v807_v0  ;;  %v810_v11 = vmul.f32 0.7978846, %v778_v2  ;;  %v777_v12 = vadd.f32 %v745_v3, %v507_v37  ;;  %v3142_v14 = vpop.f32.mrf.mxu0  ;;  %v3870_v56 = vmul.f32 0.5, %v517_v58 }
  0xe5   : > { %v780_v15 = vadd.f32 %v748_v5, %v522_v41  ;;  %v718_v17 = vmul.f32 %v686_v7, %v3831_v62  ;;  %v3847_v21 = vadd.f32 %v3142_v14, %v3782_v49  ;;  %v685_v24 = vmul.f32 0.044715, %v3843_v13 }
  0xe6   : > { %3246 = vtanh.f32 %v810_v11  ;;  %v809_v23 = vmul.f32 0.7978846, %v777_v12  ;;  %v536_v26 = vpop.f32.mrf.mxu0  ;;  %v747_v31 = vmul.f32 %v715_v16, %v517_v58 }
  0xe7   : > { %v812_v30 = vmul.f32 0.7978846, %v780_v15  ;;  %v750_v32 = vmul.f32 %v718_v17, %v3831_v62  ;;  %v717_v36 = vmul.f32 %v685_v24, %v3843_v13  ;;  %v688_v38 = vmul.f32 0.044715, %v3847_v21 }
  0xe8   : > { %3248 = vtanh.f32 %v809_v23  ;;  %v3858_v39 = vadd.f32 %v3782_v49, %v536_v26  ;;  %v3145_v37 = vpop.f32.mrf.mxu0  ;;  %v779_v40 = vadd.f32 %v747_v31, %v517_v58 }
  0xe9   : > { %3250 = vtanh.f32 %v812_v30  ;;  %v782_v43 = vadd.f32 %v750_v32, %v3831_v62  ;;  %v3862_v41 = vadd.f32 %v3145_v37, %v3782_v49  ;;  %v749_v47 = vmul.f32 %v717_v36, %v3843_v13 }
  0xea   : > { %v3239_v46 = vpop.eup %3238  ;;  %v720_v48 = vmul.f32 %v688_v38, %v3847_v21  ;;  %v687_v50 = vmul.f32 0.044715, %v3858_v39  ;;  %v546_v51 = vpop.f32.mrf.mxu0  ;;  %v811_v57 = vmul.f32 0.7978846, %v779_v40 }
  0xeb   : > { %v870_v55 = vadd.f32 1.0, %v3239_v46  ;;  %v814_v59 = vmul.f32 0.7978846, %v782_v43  ;;  %v781_v61 = vadd.f32 %v749_v47, %v3843_v13  ;;  %v690_v3 = vmul.f32 0.044715, %v3862_v41 }
  0xec   : > { %v3241_v60 = vpop.eup %3240  ;;  %v752_v0 = vmul.f32 %v720_v48, %v3847_v21  ;;  %v719_v2 = vmul.f32 %v687_v50, %v3858_v39  ;;  %v3148_v4 = vpop.f32.mrf.mxu0  ;;  %3252 = vtanh.f32 %v811_v57  ;;  %v3878_v7 = vadd.f32 %v3782_v49, %v546_v51 }
  0xed   : > { %v902_v5 = vmul.f32 %v870_v55, %v3813_v25  ;;  %v869_v6 = vadd.f32 1.0, %v3241_v60  ;;  %3254 = vtanh.f32 %v814_v59  ;;  %v813_v11 = vmul.f32 0.7978846, %v781_v61 }
  0xee   : > { %v3243_v58 = vpop.eup %3242  ;;  %v784_v12 = vadd.f32 %v752_v0, %v3847_v21  ;;  %v751_v14 = vmul.f32 %v719_v2, %v3858_v39  ;;  %v556_v15 = vpop.f32.mrf.mxu0  ;;  %v3885_v25 = vmul.f32 0.5, %v3831_v62  ;;  %v722_v23 = vmul.f32 %v690_v3, %v3862_v41 }
  0xef   : > { %1035 = vst.msk [vmem:[#allocation2 + $0x21] sm:$0xff] %vm933_vm1, %v902_v5  ;;  %v901_v16 = vmul.f32 %v869_v6, %v3821_v34  ;;  %v872_v17 = vadd.f32 1.0, %v3243_v58  ;;  %3256 = vtanh.f32 %v813_v11  ;;  %v689_v30 = vmul.f32 0.044715, %v3878_v7 }
  0xf0   : > { %v816_v24 = vmul.f32 0.7978846, %v784_v12  ;;  %v783_v26 = vadd.f32 %v751_v14, %v3858_v39  ;;  %v3151_v31 = vpop.f32.mrf.mxu0  ;;  %v754_v34 = vmul.f32 %v722_v23, %v3862_v41  ;;  %v3894_v36 = vadd.f32 %v3148_v4, %v3782_v49 }
  0xf1   : > { %v3245_v32 = vpop.eup %3244  ;;  %1034 = vst.msk [vmem:[#allocation2 + $0x11] sm:$0xff] %vm933_vm1, %v901_v16  ;;  %v904_v35 = vmul.f32 %v872_v17, %v3825_v42  ;;  %v3897_v62 = vadd.f32 %v3782_v49, %v556_v15  ;;  %v721_v40 = vmul.f32 %v689_v30, %v3878_v7  ;;  %v3902_v47 = vmul.f32 0.5, %v3843_v13 }
  0xf2   : > { %v871_v38 = vadd.f32 1.0, %v3245_v32  ;;  %3258 = vtanh.f32 %v816_v24  ;;  %v815_v37 = vmul.f32 0.7978846, %v783_v26  ;;  %v566_v43 = vpop.f32.mrf.mxu0  ;;  %v3905_v42 = vmul.f32 0.5, %v3847_v21 }
  0xf3   : > { %v3247_v46 = vpop.eup %3246  ;;  %1037 = vst.msk [vmem:[#allocation2 + $0x41] sm:$0xff] %vm933_vm1, %v904_v35  ;;  %v786_v48 = vadd.f32 %v754_v34, %v3862_v41  ;;  %v692_v50 = vmul.f32 0.044715, %v3894_v36  ;;  %v753_v57 = vmul.f32 %v721_v40, %v3878_v7  ;;  %v691_v13 = vmul.f32 0.044715, %v3897_v62 }
  0xf4   : > { %v903_v51 = vmul.f32 %v871_v38, %v3827_v53  ;;  %v874_v55 = vadd.f32 1.0, %v3247_v46  ;;  %3260 = vtanh.f32 %v815_v37  ;;  %v3154_v59 = vpop.f32.mrf.mxu0  ;;  %v3914_v21 = vadd.f32 %v3151_v31, %v3782_v49 }
  0xf5   : > { %v3249_v60 = vpop.eup %3248  ;;  %v818_v61 = vmul.f32 0.7978846, %v786_v48  ;;  %v724_v0 = vmul.f32 %v692_v50, %v3894_v36  ;;  %v785_v4 = vadd.f32 %v753_v57, %v3878_v7  ;;  %v3920_v5 = vadd.f32 %v3782_v49, %v566_v43 }
  0xf6   : > { %v3251_v2 = vpop.eup %3250  ;;  %1036 = vst.msk [vmem:[#allocation2 + $0x31] sm:$0xff] %vm933_vm1, %v903_v51  ;;  %v906_v3 = vmul.f32 %v874_v55, %v3836_v1  ;;  %v873_v53 = vadd.f32 1.0, %v3249_v60  ;;  %v576_v6 = vpop.f32.mrf.mxu0  ;;  %v723_v12 = vmul.f32 %v691_v13, %v3897_v62  ;;  %v3927_v15 = vmul.f32 0.5, %v3858_v39 }
  0xf7   : > { %v876_v58 = vadd.f32 1.0, %v3251_v2  ;;  %3262 = vtanh.f32 %v818_v61  ;;  %v756_v11 = vmul.f32 %v724_v0, %v3894_v36  ;;  %v817_v1 = vmul.f32 0.7978846, %v785_v4 }
  0xf8   : > { %1039 = vst.msk [vmem:[#allocation2 + $0x61] sm:$0xff] %vm933_vm1, %v906_v3  ;;  %v905_v14 = vmul.f32 %v873_v53, %v3849_v22  ;;  %v694_v16 = vmul.f32 0.044715, %v3914_v21  ;;  %v3157_v17 = vpop.f32.mrf.mxu0  ;;  %v3932_v24 = vmul.f32 0.5, %v3862_v41  ;;  %v755_v30 = vmul.f32 %v723_v12, %v3897_v62 }
  0xf9   : > { %v908_v23 = vmul.f32 %v876_v58, %v3852_v27  ;;  %v788_v26 = vadd.f32 %v756_v11, %v3894_v36  ;;  %v3253_v31 = vpop.eup %3252  ;;  %3264 = vtanh.f32 %v817_v1  ;;  %v693_v39 = vmul.f32 0.044715, %v3920_v5 }
  0xfa   : > { %1038 = vst.msk [vmem:[#allocation2 + $0x51] sm:$0xff] %vm933_vm1, %v905_v14  ;;  %v726_v22 = vmul.f32 %v694_v16, %v3914_v21  ;;  %v3940_v32 = vadd.f32 %v3154_v59, %v3782_v49  ;;  %v586_v35 = vpop.f32.mrf.mxu0  ;;  %v3255_v27 = vpop.eup %3254  ;;  %v875_v41 = vadd.f32 1.0, %v3253_v31  ;;  %v787_v38 = vadd.f32 %v755_v30, %v3897_v62 }
  0xfb   : > { %1041 = vst.msk [vmem:[#allocation2 + $0x81] sm:$0xff] %vm933_vm1, %v908_v23  ;;  %v820_v34 = vmul.f32 0.7978846, %v788_v26  ;;  %v3945_v37 = vadd.f32 %v3782_v49, %v576_v6  ;;  %v878_v40 = vadd.f32 1.0, %v3255_v27  ;;  %v3948_v43 = vmul.f32 0.5, %v3878_v7 }
  0xfc   : > { %v758_v46 = vmul.f32 %v726_v22, %v3914_v21  ;;  %v725_v48 = vmul.f32 %v693_v39, %v3920_v5  ;;  %v3160_v50 = vpop.f32.mrf.mxu0  ;;  %v3257_v51 = vpop.eup %3256  ;;  %v907_v55 = vmul.f32 %v875_v41, %v3870_v56  ;;  %v819_v57 = vmul.f32 0.7978846, %v787_v38 }
  0xfd   : > { %3266 = vtanh.f32 %v820_v34  ;;  %v696_v59 = vmul.f32 0.044715, %v3940_v32  ;;  %v910_v60 = vmul.f32 %v878_v40, %v3885_v25  ;;  %v877_v61 = vadd.f32 1.0, %v3257_v51 }
  0xfe   : > { %v790_v0 = vadd.f32 %v758_v46, %v3914_v21  ;;  %v757_v7 = vmul.f32 %v725_v48, %v3920_v5  ;;  %v596_v13 = vpop.f32.mrf.mxu0  ;;  %1040 = vst.msk [vmem:[#allocation2 + $0x71] sm:$0xff] %vm933_vm1, %v907_v55  ;;  %v3959_v3 = vmul.f32 0.5, %v3894_v36  ;;  %3268 = vtanh.f32 %v819_v57 }
  0xff   : > { %v3259_v2 = vpop.eup %3258  ;;  %v728_v56 = vmul.f32 %v696_v59, %v3940_v32  ;;  %v695_v53 = vmul.f32 0.044715, %v3945_v37  ;;  %1043 = vst.msk [vmem:[#allocation2 + $0xc1] sm:$0xff] %vm933_vm1, %v910_v60  ;;  %v909_v25 = vmul.f32 %v877_v61, %v3902_v47  ;;  %v3969_v1 = vadd.f32 %v3157_v17, %v3782_v49 }
 0x100   : > { %v880_v4 = vadd.f32 1.0, %v3259_v2  ;;  %v822_v6 = vmul.f32 0.7978846, %v790_v0  ;;  %v789_v58 = vadd.f32 %v757_v7, %v3920_v5  ;;  %v3163_v11 = vpop.f32.mrf.mxu0  ;;  %v3972_v16 = vadd.f32 %v3782_v49, %v586_v35 }
 0x101   : > { %v3261_v12 = vpop.eup %3260  ;;  %v760_v14 = vmul.f32 %v728_v56, %v3940_v32  ;;  %v727_v36 = vmul.f32 %v695_v53, %v3945_v37  ;;  %1042 = vst.msk [vmem:[#allocation2 + $0xb1] sm:$0xff] %vm933_vm1, %v909_v25  ;;  %v659_v31 = vmul.f32 0.5, %v3897_v62  ;;  %v698_v17 = vmul.f32 0.044715, %v3969_v1 }
 0x102   : > { %v912_v47 = vmul.f32 %v880_v4, %v3905_v42  ;;  %v879_v23 = vadd.f32 1.0, %v3261_v12  ;;  %3270 = vtanh.f32 %v822_v6  ;;  %v821_v26 = vmul.f32 0.7978846, %v789_v58  ;;  %v606_v30 = vpop.f32.mrf.mxu0 }
 0x103   : > { %v792_v22 = vadd.f32 %v760_v14, %v3940_v32  ;;  %v759_v39 = vmul.f32 %v727_v36, %v3945_v37  ;;  %v3983_v41 = vmul.f32 0.5, %v3914_v21  ;;  %v697_v42 = vmul.f32 0.044715, %v3972_v16 }
 0x104   : > { %v3263_v27 = vpop.eup %3262  ;;  %1045 = vst.msk [vmem:[#allocation2 + $0xe1] sm:$0xff] %vm933_vm1, %v912_v47  ;;  %v911_v35 = vmul.f32 %v879_v23, %v3927_v15  ;;  %3272 = vtanh.f32 %v821_v26  ;;  %v3166_v34 = vpop.f32.mrf.mxu0  ;;  %v730_v46 = vmul.f32 %v698_v17, %v3969_v1  ;;  %v3991_v51 = vadd.f32 %v3160_v50, %v3782_v49 }
 0x105   : > { %v882_v38 = vadd.f32 1.0, %v3263_v27  ;;  %v824_v62 = vmul.f32 0.7978846, %v792_v22  ;;  %v791_v40 = vadd.f32 %v759_v39, %v3945_v37  ;;  %v729_v48 = vmul.f32 %v697_v42, %v3972_v16 }
 0x106   : > { %1044 = vst.msk [vmem:[#allocation2 + $0xd1] sm:$0xff] %vm933_vm1, %v911_v35  ;;  %v3994_v21 = vadd.f32 %v3782_v49, %v596_v13  ;;  %v3997_v15 = vadd.f32 %v3163_v11, %v3782_v49  ;;  %v3265_v55 = vpop.eup %3264  ;;  %v762_v60 = vmul.f32 %v730_v46, %v3969_v1  ;;  %v616_v61 = vpop.f32.mrf.mxu0  ;;  %v661_v7 = vmul.f32 0.5, %v3920_v5 }
 0x107   : > { %v914_v57 = vmul.f32 %v882_v38, %v3932_v24  ;;  %3274 = vtanh.f32 %v824_v62  ;;  %v823_v59 = vmul.f32 0.7978846, %v791_v40  ;;  %v881_v0 = vadd.f32 1.0, %v3265_v55 }
 0x108   : > { %v761_v50 = vmul.f32 %v729_v48, %v3972_v16  ;;  %v700_v2 = vmul.f32 0.044715, %v3991_v51  ;;  %v4006_v13 = vmul.f32 0.5, %v3940_v32  ;;  %v794_v24 = vadd.f32 %v762_v60, %v3969_v1  ;;  %v3169_v14 = vpop.f32.mrf.mxu0 }
 0x109   : > { %1047 = vst.msk [vmem:[#allocation2 + $0x101] sm:$0xff] %vm933_vm1, %v914_v57  ;;  %3276 = vtanh.f32 %v823_v59  ;;  %v699_v56 = vmul.f32 0.044715, %v3994_v21  ;;  %v913_v25 = vmul.f32 %v881_v0, %v3948_v43  ;;  %v4012_v4 = vmul.f32 0.5, %v3945_v37 }
 0x10a   : > { %v3267_v53 = vpop.eup %3266  ;;  %v793_v5 = vadd.f32 %v761_v50, %v3972_v16  ;;  %v732_v6 = vmul.f32 %v700_v2, %v3991_v51  ;;  %v826_v11 = vmul.f32 0.7978846, %v794_v24  ;;  %v702_v12 = vmul.f32 0.044715, %v3997_v15  ;;  %v626_v62 = vpop.f32.mrf.mxu0 }
 0x10b   : > { %v884_v58 = vadd.f32 1.0, %v3267_v53  ;;  %v731_v32 = vmul.f32 %v699_v56, %v3994_v21  ;;  %v3269_v36 = vpop.eup %3268  ;;  %1046 = vst.msk [vmem:[#allocation2 + $0xf1] sm:$0xff] %vm933_vm1, %v913_v25  ;;  %v4021_v37 = vadd.f32 %v3782_v49, %v606_v30  ;;  %v4024_v23 = vadd.f32 %v3166_v34, %v3782_v49 }
 0x10c   : > { %v825_v47 = vmul.f32 0.7978846, %v793_v5  ;;  %v764_v43 = vmul.f32 %v732_v6, %v3991_v51  ;;  %v883_v22 = vadd.f32 1.0, %v3269_v36  ;;  %3278 = vtanh.f32 %v826_v11  ;;  %v3172_v53 = vpop.f32.mrf.mxu0 }
 0x10d   : > { %v916_v26 = vmul.f32 %v884_v58, %v3959_v3  ;;  %v763_v39 = vmul.f32 %v731_v32, %v3994_v21  ;;  %v4029_v17 = vmul.f32 0.5, %v3969_v1  ;;  %v734_v35 = vmul.f32 %v702_v12, %v3997_v15 }
 0x10e   : > { %3280 = vtanh.f32 %v825_v47  ;;  %v796_v27 = vadd.f32 %v764_v43, %v3991_v51  ;;  %v915_v30 = vmul.f32 %v883_v22, %v659_v31  ;;  %v4035_v34 = vmul.f32 0.5, %v3972_v16 }
 0x10f   : > { %v3271_v42 = vpop.eup %3270  ;;  %1049 = vst.msk [vmem:[#allocation2 + $0x121] sm:$0xff] %vm933_vm1, %v916_v26  ;;  %v795_v3 = vadd.f32 %v763_v39, %v3994_v21  ;;  %v701_v38 = vmul.f32 0.044715, %v4021_v37  ;;  %v766_v46 = vmul.f32 %v734_v35, %v3997_v15  ;;  %v704_v48 = vmul.f32 0.044715, %v4024_v23 }
 0x110   : > { %v886_v40 = vadd.f32 1.0, %v3271_v42  ;;  %v828_v1 = vmul.f32 0.7978846, %v796_v27  ;;  %1048 = vst.msk [vmem:[#allocation2 + $0x111] sm:$0xff] %vm933_vm1, %v915_v30  ;;  %v4044_v16 = vadd.f32 %v3782_v49, %v616_v61  ;;  %v4047_v59 = vadd.f32 %v3169_v14, %v3782_v49  ;;  %v636_v42 = vpop.f32.mrf.mxu0  ;;  %v1337_v30 = vld [vmem:[#allocation2 + $0x10] sm:$0xff] }
 0x111   : > { %v3273_v55 = vpop.eup %3272  ;;  %v827_v57 = vmul.f32 0.7978846, %v795_v3  ;;  %v733_v31 = vmul.f32 %v701_v38, %v4021_v37  ;;  %v798_v50 = vadd.f32 %v766_v46, %v3997_v15  ;;  %v4052_v2 = vmul.f32 0.5, %v3991_v51 }
 0x112   : > { %v918_v60 = vmul.f32 %v886_v40, %v3983_v41  ;;  %v885_v0 = vadd.f32 1.0, %v3273_v55  ;;  %3282 = vtanh.f32 %v828_v1  ;;  %v736_v56 = vmul.f32 %v704_v48, %v4024_v23 }
 0x113   : > { %3284 = vtanh.f32 %v827_v57  ;;  %v765_v24 = vmul.f32 %v733_v31, %v4021_v37  ;;  %v4058_v5 = vmul.f32 0.5, %v3994_v21  ;;  %v830_v41 = vmul.f32 0.7978846, %v798_v50  ;;  %v1437_v50 = vld [vmem:[#allocation2 + $0x11] sm:$0xff] }
 0x114   : > { %v3275_v61 = vpop.eup %3274  ;;  %1051 = vst.msk [vmem:[#allocation2 + $0x161] sm:$0xff] %vm933_vm1, %v918_v60  ;;  %v917_v25 = vmul.f32 %v885_v0, %v661_v7  ;;  %v703_v6 = vmul.f32 0.044715, %v4044_v16  ;;  %v768_v11 = vmul.f32 %v736_v56, %v4024_v23  ;;  %v706_v32 = vmul.f32 0.044715, %v4047_v59 }
 0x115   : > { %v888_v58 = vadd.f32 1.0, %v3275_v61  ;;  %v797_v51 = vadd.f32 %v765_v24, %v4021_v37  ;;  %3286 = vtanh.f32 %v830_v41  ;;  %v4067_v7 = vadd.f32 %v3782_v49, %v626_v62 }
 0x116   : > { %v3277_v12 = vpop.eup %3276  ;;  %1050 = vst.msk [vmem:[#allocation2 + $0x151] sm:$0xff] %vm933_vm1, %v917_v25  ;;  %v735_v14 = vmul.f32 %v703_v6, %v4044_v16  ;;  %v4070_v21 = vadd.f32 %v3172_v53, %v3782_v49  ;;  %v800_v26 = vadd.f32 %v768_v11, %v4024_v23  ;;  %v4075_v22 = vmul.f32 0.5, %v3997_v15 }
 0x117   : > { %v920_v36 = vmul.f32 %v888_v58, %v4006_v13  ;;  %v887_v47 = vadd.f32 1.0, %v3277_v12  ;;  %v829_v43 = vmul.f32 0.7978846, %v797_v51  ;;  %v738_v27 = vmul.f32 %v706_v32, %v4047_v59  ;;  %v1638_v32 = vld [vmem:[#allocation2 + $0x20] sm:$0xff] }
 0x118   : > { %v767_v39 = vmul.f32 %v735_v14, %v4044_v16  ;;  %v705_v35 = vmul.f32 0.044715, %v4067_v7  ;;  %v4083_v13 = vmul.f32 0.5, %v4021_v37  ;;  %v832_v38 = vmul.f32 0.7978846, %v800_v26 }
 0x119   : > { %1053 = vst.msk [vmem:[#allocation2 + $0x181] sm:$0xff] %vm933_vm1, %v920_v36  ;;  %v919_v3 = vmul.f32 %v887_v47, %v4012_v4  ;;  %3288 = vtanh.f32 %v829_v43  ;;  %v3279_v62 = vpop.eup %3278  ;;  %v770_v40 = vmul.f32 %v738_v27, %v4047_v59  ;;  %v708_v46 = vmul.f32 0.044715, %v4070_v21 }
 0x11a   : > { %v799_v15 = vadd.f32 %v767_v39, %v4044_v16  ;;  %v737_v1 = vmul.f32 %v705_v35, %v4067_v7  ;;  %v890_v55 = vadd.f32 1.0, %v3279_v62  ;;  %3290 = vtanh.f32 %v832_v38 }
 0x11b   : > { %v3281_v48 = vpop.eup %3280  ;;  %1052 = vst.msk [vmem:[#allocation2 + $0x171] sm:$0xff] %vm933_vm1, %v919_v3  ;;  %v4091_v4 = vadd.f32 %v3782_v49, %v636_v42  ;;  %v1373_v37 = vmul.f32 %v3802_v10, %v1337_v30  ;;  %v802_v60 = vadd.f32 %v770_v40, %v4047_v59  ;;  %v4098_v56 = vmul.f32 0.5, %v4024_v23  ;;  %v1537_v49 = vld [vmem:[#allocation2 + $0x12] sm:$0xff]  ;;  %v1738_v42 = vld [vmem:[#allocation2 + $0x21] sm:$0xff] }
 0x11c   : > { %v889_v57 = vadd.f32 1.0, %v3281_v48  ;;  %v831_v31 = vmul.f32 0.7978846, %v799_v15  ;;  %v769_v0 = vmul.f32 %v737_v1, %v4067_v7  ;;  %v922_v24 = vmul.f32 %v890_v55, %v4029_v17 }
 0x11d   : > { %v740_v53 = vmul.f32 %v708_v46, %v4070_v21  ;;  %v707_v61 = vmul.f32 0.044715, %v4091_v4  ;;  %v834_v41 = vmul.f32 0.7978846, %v802_v60  ;;  %v1405_v23 = vadd.f32 %v1373_v37, %v3800_v9 }
 0x11e   : > { %v921_v25 = vmul.f32 %v889_v57, %v4035_v34  ;;  %3292 = vtanh.f32 %v831_v31  ;;  %v801_v6 = vadd.f32 %v769_v0, %v4067_v7  ;;  %1055 = vst.msk [vmem:[#allocation2 + $0x1a1] sm:$0xff] %vm933_vm1, %v922_v24  ;;  %v1473_v11 = vmul.f32 %v3806_v18, %v1437_v50 }
 0x11f   : > { %v3283_v58 = vpop.eup %3282  ;;  %v772_v51 = vmul.f32 %v740_v53, %v4070_v21  ;;  %v739_v17 = vmul.f32 %v707_v61, %v4091_v4  ;;  %3294 = vtanh.f32 %v834_v41  ;;  %v1573_v36 = vmul.f32 %v3808_v19, %v1537_v49  ;;  %v1639_v41 = vld [vmem:[#allocation2 + $0x30] sm:$0xff] }
 0x120   : > { %v3285_v12 = vpop.eup %3284  ;;  %1054 = vst.msk [vmem:[#allocation2 + $0x191] sm:$0xff] %vm933_vm1, %v921_v25  ;;  %v892_v34 = vadd.f32 1.0, %v3283_v58  ;;  %v833_v14 = vmul.f32 0.7978846, %v801_v6  ;;  %v1505_v39 = vadd.f32 %v1473_v11, %v1405_v23  ;;  %v4115_v9 = vmul.f32 0.5, %v4044_v16  ;;  %v1739_v11 = vld [vmem:[#allocation2 + $0x31] sm:$0xff] }
 0x121   : > { %v891_v47 = vadd.f32 1.0, %v3285_v12  ;;  %v804_v43 = vadd.f32 %v772_v51, %v4070_v21  ;;  %v771_v26 = vmul.f32 %v739_v17, %v4091_v4  ;;  %v1674_v35 = vmul.f32 %v3810_v20, %v1638_v32  ;;  %v1839_v12 = vld [vmem:[#allocation2 + $0x32] sm:$0xff] }
 0x122   : > { %v924_v27 = vmul.f32 %v892_v34, %v4052_v2  ;;  %3296 = vtanh.f32 %v833_v14  ;;  %v3287_v3 = vpop.eup %3286  ;;  %v1605_v40 = vadd.f32 %v1573_v36, %v1505_v39  ;;  %v4122_v46 = vmul.f32 0.5, %v4047_v59  ;;  %v1838_v2 = vld [vmem:[#allocation2 + $0x22] sm:$0xff] }
 0x123   : > { %v923_v38 = vmul.f32 %v891_v47, %v4058_v5  ;;  %v836_v62 = vmul.f32 0.7978846, %v804_v43  ;;  %v803_v15 = vadd.f32 %v771_v26, %v4091_v4  ;;  %v894_v1 = vadd.f32 1.0, %v3287_v3 }
 0x124   : > { %1057 = vst.msk [vmem:[#allocation2 + $0x1c1] sm:$0xff] %vm933_vm1, %v924_v27  ;;  %v1106_v16 = vmul.f32 %v1337_v30, %v3775_v44  ;;  %v1174_v48 = vmul.f32 %v1437_v50, %v3777_v45  ;;  %v1706_v5 = vadd.f32 %v1674_v35, %v1605_v40  ;;  %v1774_v37 = vmul.f32 %v3815_v28, %v1738_v42 }
 0x125   : > { %1056 = vst.msk [vmem:[#allocation2 + $0x1b1] sm:$0xff] %vm933_vm1, %v923_v38  ;;  %3298 = vtanh.f32 %v836_v62  ;;  %v835_v55 = vmul.f32 0.7978846, %v803_v15  ;;  %v926_v31 = vmul.f32 %v894_v1, %v4075_v22  ;;  %v4130_v60 = vmul.f32 0.5, %v4067_v7  ;;  %v4144_v7 = vld [vmem:[%s4780_s4] ss:$0 sm:$0xff] }
 0x126   : > { %v3289_v57 = vpop.eup %3288  ;;  %v1206_v59 = vadd.f32 %v1174_v48, %v1106_v16  ;;  %v1274_v0 = vmul.f32 %v1537_v49, %v3786_v52  ;;  %v1806_v30 = vadd.f32 %v1774_v37, %v1706_v5  ;;  %v1874_v50 = vmul.f32 %v3817_v29, %v1838_v2  ;;  %v1740_v5 = vld [vmem:[#allocation2 + $0x41] sm:$0xff] }
 0x127   : > { %v893_v24 = vadd.f32 1.0, %v3289_v57  ;;  %3300 = vtanh.f32 %v835_v55  ;;  %v3291_v53 = vpop.eup %3290  ;;  %1059 = vst.msk [vmem:[#allocation2 + $0x201] sm:$0xff] %vm933_vm1, %v926_v31  ;;  %v4136_v61 = vmul.f32 0.5, %v4070_v21  ;;  %v4139_v25 = vmul.f32 0.5, %v4091_v4 }
 0x128   : > { %v1306_v22 = vadd.f32 %v1274_v0, %v1206_v59  ;;  %v1374_v49 = vmul.f32 %v1638_v32, %v3802_v10  ;;  %v896_v58 = vadd.f32 1.0, %v3291_v53  ;;  %v1906_v51 = vadd.f32 %v1874_v50, %v1806_v30  ;;  %v1840_v50 = vld [vmem:[#allocation2 + $0x42] sm:$0xff] }
 0x129   : > { %v925_v6 = vmul.f32 %v893_v24, %v4083_v13  ;;  %v1107_v17 = vmul.f32 %v1638_v32, %v3775_v44  ;;  %v1474_v23 = vmul.f32 %v1738_v42, %v3806_v18  ;;  %v1574_v4 = vmul.f32 %v1838_v2, %v3808_v19 }
 0x12a   : > { %v1406_v21 = vadd.f32 %v1374_v49, %v1306_v22  ;;  %v1175_v34 = vmul.f32 %v1738_v42, %v3777_v45  ;;  %v928_v36 = vmul.f32 %v896_v58, %v4098_v56  ;;  %v4155_v13 = vadd.f32 %v4144_v7, %v1906_v51 }
 0x12b   : > { %v3293_v14 = vpop.eup %3292  ;;  %1058 = vst.msk [vmem:[#allocation2 + $0x1f1] sm:$0xff] %vm933_vm1, %v925_v6  ;;  %v1675_v47 = vmul.f32 %v3810_v20, %v1639_v41  ;;  %v1275_v32 = vmul.f32 %v1838_v2, %v3786_v52  ;;  %v1375_v27 = vmul.f32 %v1639_v41, %v3802_v10  ;;  %v1775_v3 = vmul.f32 %v3815_v28, %v1739_v11  ;;  %v1640_v2 = vld [vmem:[#allocation2 + $0x40] sm:$0xff] }
 0x12c   : > { %v895_v43 = vadd.f32 1.0, %v3293_v14  ;;  %v1506_v26 = vadd.f32 %v1474_v23, %v1406_v21  ;;  %v1207_v39 = vadd.f32 %v1175_v34, %v1107_v17  ;;  %v3295_v35 = vpop.eup %3294  ;;  %1061 = vst.msk [vmem:[#allocation2 + $0x221] sm:$0xff] %vm933_vm1, %v928_v36  ;;  %v2009_v42 = vmul.f32 0.044715, %v4155_v13 }
 0x12d   : > { %v1875_v56 = vmul.f32 %v3817_v29, %v1839_v12  ;;  %v1475_v38 = vmul.f32 %v1739_v11, %v3806_v18  ;;  %v898_v15 = vadd.f32 1.0, %v3295_v35  ;;  %v1575_v55 = vmul.f32 %v1839_v12, %v3808_v19 }
 0x12e   : > { %v927_v62 = vmul.f32 %v895_v43, %v4115_v9  ;;  %v1606_v40 = vadd.f32 %v1574_v4, %v1506_v26  ;;  %v1307_v1 = vadd.f32 %v1275_v32, %v1207_v39  ;;  %v2041_v48 = vmul.f32 %v2009_v42, %v4155_v13  ;;  %v1641_v39 = vld [vmem:[#allocation2 + $0x50] sm:$0xff] }
 0x12f   : > { %v3297_v16 = vpop.eup %3296  ;;  %v1108_v37 = vmul.f32 %v1639_v41, %v3775_v44  ;;  %v1176_v57 = vmul.f32 %v1739_v11, %v3777_v45  ;;  %v930_v31 = vmul.f32 %v898_v15, %v4122_v46  ;;  %v1676_v30 = vmul.f32 %v3810_v20, %v1640_v2  ;;  %v1841_v15 = vld [vmem:[#allocation2 + $0x52] sm:$0xff] }
 0x130   : > { %1060 = vst.msk [vmem:[#allocation2 + $0x211] sm:$0xff] %vm933_vm1, %v927_v62  ;;  %v897_v59 = vadd.f32 1.0, %v3297_v16  ;;  %v1707_v9 = vadd.f32 %v1675_v47, %v1606_v40  ;;  %v1407_v0 = vadd.f32 %v1375_v27, %v1307_v1  ;;  %v2073_v24 = vmul.f32 %v2041_v48, %v4155_v13 }
 0x131   : > { %v1208_v53 = vadd.f32 %v1176_v57, %v1108_v37  ;;  %v1276_v22 = vmul.f32 %v1839_v12, %v3786_v52  ;;  %1063 = vst.msk [vmem:[#allocation2 + $0x241] sm:$0xff] %vm933_vm1, %v930_v31  ;;  %v1776_v46 = vmul.f32 %v3815_v28, %v1740_v5  ;;  %v1376_v23 = vmul.f32 %v1640_v2, %v3802_v10  ;;  %v1642_v31 = vld [vmem:[#allocation2 + $0x60] sm:$0xff] }
 0x132   : > { %v3299_v49 = vpop.eup %3298  ;;  %v929_v41 = vmul.f32 %v897_v59, %v4130_v60  ;;  %v1807_v6 = vadd.f32 %v1775_v3, %v1707_v9  ;;  %v1507_v58 = vadd.f32 %v1475_v38, %v1407_v0  ;;  %v2105_v17 = vadd.f32 %v2073_v24, %v4155_v13  ;;  %v1742_v24 = vld [vmem:[#allocation2 + $0x61] sm:$0xff] }
 0x133   : > { %v900_v51 = vadd.f32 1.0, %v3299_v49  ;;  %v1308_v21 = vadd.f32 %v1276_v22, %v1208_v53  ;;  %v1876_v34 = vmul.f32 %v3817_v29, %v1840_v50  ;;  %v1476_v14 = vmul.f32 %v1740_v5, %v3806_v18  ;;  %v1842_v22 = vld [vmem:[#allocation2 + $0x62] sm:$0xff] }
 0x134   : > { %v3301_v4 = vpop.eup %3300  ;;  %1062 = vst.msk [vmem:[#allocation2 + $0x231] sm:$0xff] %vm933_vm1, %v929_v41  ;;  %v1907_v11 = vadd.f32 %v1875_v56, %v1807_v6  ;;  %v1607_v12 = vadd.f32 %v1575_v55, %v1507_v58  ;;  %v2137_v47 = vmul.f32 0.7978846, %v2105_v17  ;;  %v1109_v27 = vmul.f32 %v1640_v2, %v3775_v44 }
 0x135   : > { %v932_v60 = vmul.f32 %v900_v51, %v4136_v61  ;;  %v899_v36 = vadd.f32 1.0, %v3301_v4  ;;  %v1408_v32 = vadd.f32 %v1376_v23, %v1308_v21  ;;  %v1177_v35 = vmul.f32 %v1740_v5, %v3777_v45  ;;  %v1741_v61 = vld [vmem:[#allocation2 + $0x51] sm:$0xff] }
 0x136   : > { %v1946_v43 = vadd.f32 %v4144_v7, %v1907_v11  ;;  %v1708_v26 = vadd.f32 %v1676_v30, %v1607_v12  ;;  %3302 = vtanh.f32 %v2137_v47  ;;  %v1576_v56 = vmul.f32 %v1840_v50, %v3808_v19 }
 0x137   : > { %1065 = vst.msk [vmem:[#allocation2 + $0x261] sm:$0xff] %vm933_vm1, %v932_v60  ;;  %v931_v42 = vmul.f32 %v899_v36, %v4139_v25  ;;  %v1508_v3 = vadd.f32 %v1476_v14, %v1408_v32  ;;  %v1209_v40 = vadd.f32 %v1177_v35, %v1109_v27  ;;  %v1277_v1 = vmul.f32 %v1840_v50, %v3786_v52 }
 0x138   : > { %v2010_v38 = vmul.f32 0.044715, %v1946_v43  ;;  %v1808_v62 = vadd.f32 %v1776_v46, %v1708_v26  ;;  %v4193_v2 = vmul.f32 0.5, %v4155_v13  ;;  %v1677_v48 = vmul.f32 %v3810_v20, %v1641_v39 }
 0x139   : > { %1064 = vst.msk [vmem:[#allocation2 + $0x251] sm:$0xff] %vm933_vm1, %v931_v42  ;;  %v1608_v16 = vadd.f32 %v1576_v56, %v1508_v3  ;;  %v1377_v25 = vmul.f32 %v1641_v39, %v3802_v10  ;;  %v1777_v37 = vmul.f32 %v3815_v28, %v1741_v61  ;;  %v1309_v57 = vadd.f32 %v1277_v1, %v1209_v40 }
 0x13a   : > { %v2042_v55 = vmul.f32 %v2010_v38, %v1946_v43  ;;  %v1908_v5 = vadd.f32 %v1876_v34, %v1808_v62  ;;  %v1877_v9 = vmul.f32 %v3817_v29, %v1841_v15  ;;  %v1477_v0 = vmul.f32 %v1741_v61, %v3806_v18 }
 0x13b   : > { %v1709_v59 = vadd.f32 %v1677_v48, %v1608_v16  ;;  %v1110_v13 = vmul.f32 %v1641_v39, %v3775_v44  ;;  %v1409_v53 = vadd.f32 %v1377_v25, %v1309_v57  ;;  %v1178_v49 = vmul.f32 %v1741_v61, %v3777_v45  ;;  %v1643_v39 = vld [vmem:[#allocation2 + $0x70] sm:$0xff] }
 0x13c   : > { %v2074_v30 = vmul.f32 %v2042_v55, %v1946_v43  ;;  %v1947_v50 = vadd.f32 %v4144_v7, %v1908_v5  ;;  %v4203_v41 = vmul.f32 0.5, %v1946_v43  ;;  %v1577_v58 = vmul.f32 %v1841_v15, %v3808_v19  ;;  %v1743_v16 = vld [vmem:[#allocation2 + $0x71] sm:$0xff] }
 0x13d   : > { %v1809_v6 = vadd.f32 %v1777_v37, %v1709_v59  ;;  %v1678_v46 = vmul.f32 %v3810_v20, %v1642_v31  ;;  %v1509_v21 = vadd.f32 %v1477_v0, %v1409_v53  ;;  %v1778_v23 = vmul.f32 %v3815_v28, %v1742_v24  ;;  %v1843_v0 = vld [vmem:[#allocation2 + $0x72] sm:$0xff] }
 0x13e   : > { %v2106_v51 = vadd.f32 %v2074_v30, %v1946_v43  ;;  %v2011_v17 = vmul.f32 0.044715, %v1947_v50  ;;  %v1878_v11 = vmul.f32 %v3817_v29, %v1842_v22  ;;  %v1210_v12 = vadd.f32 %v1178_v49, %v1110_v13 }
 0x13f   : > { %v1909_v4 = vadd.f32 %v1877_v9, %v1809_v6  ;;  %v1278_v34 = vmul.f32 %v1841_v15, %v3786_v52  ;;  %v1609_v36 = vadd.f32 %v1577_v58, %v1509_v21  ;;  %v1378_v47 = vmul.f32 %v1642_v31, %v3802_v10  ;;  %v1644_v58 = vld [vmem:[#allocation2 + $0x80] sm:$0xff] }
 0x140   : > { %v2138_v14 = vmul.f32 0.7978846, %v2106_v51  ;;  %v2043_v60 = vmul.f32 %v2011_v17, %v1947_v50  ;;  %v1478_v43 = vmul.f32 %v1742_v24, %v3806_v18  ;;  %v1111_v27 = vmul.f32 %v1642_v31, %v3775_v44 }
 0x141   : > { %v4212_v32 = vadd.f32 %v4144_v7, %v1909_v4  ;;  %v1310_v26 = vadd.f32 %v1278_v34, %v1210_v12  ;;  %v1710_v42 = vadd.f32 %v1678_v46, %v1609_v36  ;;  %v1179_v3 = vmul.f32 %v1742_v24, %v3777_v45  ;;  %v1744_v46 = vld [vmem:[#allocation2 + $0x81] sm:$0xff] }
 0x142   : > { %3304 = vtanh.f32 %v2138_v14  ;;  %v2075_v35 = vmul.f32 %v2043_v60, %v1947_v50  ;;  %v4217_v56 = vmul.f32 0.5, %v1947_v50  ;;  %v1279_v62 = vmul.f32 %v1842_v22, %v3786_v52  ;;  %v1844_v12 = vld [vmem:[#allocation2 + $0x82] sm:$0xff]  ;;  %v1345_v14 = vld [vmem:[#allocation2 + $0xb0] sm:$0xff] }
 0x143   : > { %v2012_v61 = vmul.f32 0.044715, %v4212_v32  ;;  %v1410_v38 = vadd.f32 %v1378_v47, %v1310_v26  ;;  %v3303_v15 = vpop.eup %3302  ;;  %v1810_v1 = vadd.f32 %v1778_v23, %v1710_v42  ;;  %v1211_v48 = vadd.f32 %v1179_v3, %v1111_v27  ;;  %v1445_v42 = vld [vmem:[#allocation2 + $0xb1] sm:$0xff] }
 0x144   : > { %v2107_v40 = vadd.f32 %v2075_v35, %v1947_v50  ;;  %v1379_v25 = vmul.f32 %v1643_v39, %v3802_v10  ;;  %v2201_v55 = vadd.f32 1.0, %v3303_v15  ;;  %v1578_v57 = vmul.f32 %v1842_v22, %v3808_v19 }
 0x145   : > { %v2044_v5 = vmul.f32 %v2012_v61, %v4212_v32  ;;  %v1510_v37 = vadd.f32 %v1478_v43, %v1410_v38  ;;  %v1910_v59 = vadd.f32 %v1878_v11, %v1810_v1  ;;  %v1679_v9 = vmul.f32 %v3810_v20, %v1643_v39 }
 0x146   : > { %v2139_v31 = vmul.f32 0.7978846, %v2107_v40  ;;  %v1311_v24 = vadd.f32 %v1279_v62, %v1211_v48  ;;  %v2233_v13 = vmul.f32 %v2201_v55, %v4193_v2  ;;  %v1779_v53 = vmul.f32 %v3815_v28, %v1743_v16 }
 0x147   : > { %v2076_v30 = vmul.f32 %v2044_v5, %v4212_v32  ;;  %v1610_v50 = vadd.f32 %v1578_v57, %v1510_v37  ;;  %v4229_v49 = vadd.f32 %v4144_v7, %v1910_v59  ;;  %v1479_v22 = vmul.f32 %v1743_v16, %v3806_v18 }
 0x148   : > { %3306 = vtanh.f32 %v2139_v31  ;;  %v1411_v6 = vadd.f32 %v1379_v25, %v1311_v24  ;;  %3181 = vmatprep.mubr.msk.f32.mxu1 %vm933_vm1, %v2233_v13  ;;  %v1879_v2 = vmul.f32 %v3817_v29, %v1843_v0  ;;  %v1112_v21 = vmul.f32 %v1643_v39, %v3775_v44 }
 0x149   : > { %v2108_v51 = vadd.f32 %v2076_v30, %v4212_v32  ;;  %v1711_v17 = vadd.f32 %v1679_v9, %v1610_v50  ;;  %v2013_v23 = vmul.f32 0.044715, %v4229_v49  ;;  %v1579_v11 = vmul.f32 %v1843_v0, %v3808_v19 }
 0x14a   : > { %v1511_v4 = vadd.f32 %v1479_v22, %v1411_v6  ;;  %v1180_v34 = vmul.f32 %v1743_v16, %v3777_v45  ;;  %v1680_v47 = vmul.f32 %v3810_v20, %v1644_v58  ;;  %v1780_v26 = vmul.f32 %v3815_v28, %v1744_v46  ;;  %v1545_v16 = vld [vmem:[#allocation2 + $0xb2] sm:$0xff] }
 0x14b   : > { %v2140_v60 = vmul.f32 0.7978846, %v2108_v51  ;;  %v1811_v36 = vadd.f32 %v1779_v53, %v1711_v17  ;;  %v2045_v43 = vmul.f32 %v2013_v23, %v4229_v49  ;;  %v1280_v39 = vmul.f32 %v1843_v0, %v3786_v52  ;;  %v1646_v0 = vld [vmem:[#allocation2 + $0xc0] sm:$0xff] }
 0x14c   : > { %v1611_v27 = vadd.f32 %v1579_v11, %v1511_v4  ;;  %v1212_v35 = vadd.f32 %v1180_v34, %v1112_v21  ;;  %v1880_v61 = vmul.f32 %v3817_v29, %v1844_v12  ;;  %v1381_v38 = vmul.f32 %v3802_v10, %v1345_v14 }
 0x14d   : > { %3308 = vtanh.f32 %v2140_v60  ;;  %v1911_v3 = vadd.f32 %v1879_v2, %v1811_v36  ;;  %v2077_v62 = vmul.f32 %v2045_v43, %v4229_v49  ;;  %v1380_v1 = vmul.f32 %v1644_v58, %v3802_v10  ;;  %v1846_v2 = vld [vmem:[#allocation2 + $0xc2] sm:$0xff] }
 0x14e   : > { %v1712_v15 = vadd.f32 %v1680_v47, %v1611_v27  ;;  %v1312_v40 = vadd.f32 %v1280_v39, %v1212_v35  ;;  %v1480_v55 = vmul.f32 %v1744_v46, %v3806_v18  ;;  %v1413_v5 = vadd.f32 %v1381_v38, %v3819_v33  ;;  %v1746_v33 = vld [vmem:[#allocation2 + $0xc1] sm:$0xff] }
 0x14f   : > { %v3305_v48 = vpop.eup %3304  ;;  %v1950_v25 = vadd.f32 %v4144_v7, %v1911_v3  ;;  %v1481_v37 = vmul.f32 %v3806_v18, %v1445_v42  ;;  %v2109_v31 = vadd.f32 %v2077_v62, %v4229_v49  ;;  %v1580_v13 = vmul.f32 %v1844_v12, %v3808_v19 }
 0x150   : > { %v2202_v57 = vadd.f32 1.0, %v3305_v48  ;;  %v1812_v59 = vadd.f32 %v1780_v26, %v1712_v15  ;;  %v1412_v9 = vadd.f32 %v1380_v1, %v1312_v40  ;;  %v1581_v50 = vmul.f32 %v3808_v19, %v1545_v16 }
 0x151   : > { %v2014_v24 = vmul.f32 0.044715, %v1950_v25  ;;  %v1513_v30 = vadd.f32 %v1481_v37, %v1413_v5  ;;  %v2141_v6 = vmul.f32 0.7978846, %v2109_v31  ;;  %v1682_v17 = vmul.f32 %v3810_v20, %v1646_v0  ;;  %v1647_v37 = vld [vmem:[#allocation2 + $0xd0] sm:$0xff] }
 0x152   : > { %v2234_v53 = vmul.f32 %v2202_v57, %v4203_v41  ;;  %v1912_v22 = vadd.f32 %v1880_v61, %v1812_v59  ;;  %v1512_v58 = vadd.f32 %v1480_v55, %v1412_v9  ;;  %v1114_v21 = vmul.f32 %v1345_v14, %v3775_v44 }
 0x153   : > { %v2046_v46 = vmul.f32 %v2014_v24, %v1950_v25  ;;  %v1613_v51 = vadd.f32 %v1581_v50, %v1513_v30  ;;  %3310 = vtanh.f32 %v2141_v6  ;;  %v1182_v11 = vmul.f32 %v1445_v42, %v3777_v45  ;;  %v1747_v30 = vld [vmem:[#allocation2 + $0xd1] sm:$0xff] }
 0x154   : > { %3182 = vmatmul.mubr.msk.f32.vlgmr.msra.gmra.mxu1 %vm933_vm1, %v2234_v53  ;;  %v1951_v23 = vadd.f32 %v4144_v7, %v1912_v22  ;;  %v1612_v4 = vadd.f32 %v1580_v13, %v1512_v58  ;;  %v1980_v12 = vmul.f32 0.5, %v4212_v32  ;;  %v1782_v36 = vmul.f32 %v3815_v28, %v1746_v33  ;;  %v1847_v22 = vld [vmem:[#allocation2 + $0xd2] sm:$0xff] }
 0x155   : > { %v3307_v41 = vpop.eup %3306  ;;  %v2078_v34 = vmul.f32 %v2046_v46, %v1950_v25  ;;  %v1714_v60 = vadd.f32 %v1682_v17, %v1613_v51  ;;  %v1882_v14 = vmul.f32 %v3817_v29, %v1846_v2  ;;  %v1214_v39 = vadd.f32 %v1182_v11, %v1114_v21 }
 0x156   : > { %v2203_v47 = vadd.f32 1.0, %v3307_v41  ;;  %v2015_v26 = vmul.f32 0.044715, %v1951_v23  ;;  %v1713_v43 = vadd.f32 %v3834_v63, %v1612_v4  ;;  %v1282_v3 = vmul.f32 %v1545_v16, %v3786_v52 }
 0x157   : > { %v2110_v27 = vadd.f32 %v2078_v34, %v1950_v25  ;;  %v1814_v35 = vadd.f32 %v1782_v36, %v1714_v60  ;;  %v1981_v61 = vmul.f32 0.5, %v4229_v49  ;;  %v1382_v1 = vmul.f32 %v1646_v0, %v3802_v10 }
 0x158   : > { %v2235_v42 = vmul.f32 %v2203_v47, %v4217_v56  ;;  %v2047_v32 = vmul.f32 %v2015_v26, %v1951_v23  ;;  %v1813_v38 = vadd.f32 %v3840_v8, %v1713_v43  ;;  %v1314_v40 = vadd.f32 %v1282_v3, %v1214_v39 }
 0x159   : > { %v2142_v62 = vmul.f32 0.7978846, %v2110_v27  ;;  %v1914_v15 = vadd.f32 %v1882_v14, %v1814_v35  ;;  %v4270_v48 = vmul.f32 0.5, %v1950_v25  ;;  %v1482_v56 = vmul.f32 %v1746_v33, %v3806_v18  ;;  %v1648_v27 = vld [vmem:[#allocation2 + $0xe0] sm:$0xff] }
 0x15a   : > { %v3309_v63 = vpop.eup %3308  ;;  %3184 = vmatprep.mubr.msk.f32.mxu1 %vm933_vm1, %v2235_v42  ;;  %v2079_v55 = vmul.f32 %v2047_v32, %v1951_v23  ;;  %v1913_v16 = vadd.f32 %v3868_v54, %v1813_v38  ;;  %v1414_v8 = vadd.f32 %v1382_v1, %v1314_v40  ;;  %v1115_v59 = vmul.f32 %v1646_v0, %v3775_v44  ;;  %v1748_v32 = vld [vmem:[#allocation2 + $0xe1] sm:$0xff] }
 0x15b   : > { %v2204_v5 = vadd.f32 1.0, %v3309_v63  ;;  %3312 = vtanh.f32 %v2142_v62  ;;  %v1953_v49 = vadd.f32 %v4144_v7, %v1914_v15  ;;  %v1183_v9 = vmul.f32 %v1746_v33, %v3777_v45  ;;  %v1848_v63 = vld [vmem:[#allocation2 + $0xe2] sm:$0xff] }
 0x15c   : > { %v2111_v57 = vadd.f32 %v2079_v55, %v1951_v23  ;;  %v1952_v31 = vadd.f32 %v4144_v7, %v1913_v16  ;;  %v1514_v13 = vadd.f32 %v1482_v56, %v1414_v8  ;;  %v1582_v54 = vmul.f32 %v1846_v2, %v3808_v19 }
 0x15d   : > { %v2236_v25 = vmul.f32 %v2204_v5, %v1980_v12  ;;  %v2017_v24 = vmul.f32 0.044715, %v1953_v49  ;;  %v1683_v6 = vmul.f32 %v3810_v20, %v1647_v37  ;;  %v1215_v58 = vadd.f32 %v1183_v9, %v1115_v59  ;;  %v1649_v9 = vld [vmem:[#allocation2 + $0xf0] sm:$0xff] }
 0x15e   : > { %v2143_v50 = vmul.f32 0.7978846, %v2111_v57  ;;  %v2016_v53 = vmul.f32 0.044715, %v1952_v31  ;;  %v1614_v51 = vadd.f32 %v1582_v54, %v1514_v13  ;;  %v1283_v0 = vmul.f32 %v1846_v2, %v3786_v52 }
 0x15f   : > { %3185 = vmatmul.mubr.msk.f32.gmra.mxu1 %vm933_vm1, %v2236_v25  ;;  %v2049_v46 = vmul.f32 %v2017_v24, %v1953_v49  ;;  %v1383_v33 = vmul.f32 %v1647_v37, %v3802_v10  ;;  %v4283_v17 = vmul.f32 0.5, %v1951_v23  ;;  %v1783_v4 = vmul.f32 %v3815_v28, %v1747_v30 }
 0x160   : > { %3314 = vtanh.f32 %v2143_v50  ;;  %v2048_v21 = vmul.f32 %v2016_v53, %v1952_v31  ;;  %v3311_v11 = vpop.eup %3310  ;;  %v1715_v12 = vadd.f32 %v1683_v6, %v1614_v51  ;;  %v1883_v34 = vmul.f32 %v3817_v29, %v1847_v22  ;;  %v1749_v53 = vld [vmem:[#allocation2 + $0xf1] sm:$0xff] }
 0x161   : > { %v2081_v41 = vmul.f32 %v2049_v46, %v1953_v49  ;;  %v1315_v60 = vadd.f32 %v1283_v0, %v1215_v58  ;;  %v2205_v36 = vadd.f32 1.0, %v3311_v11  ;;  %v4287_v26 = vmul.f32 0.5, %v1953_v49  ;;  %v1849_v6 = vld [vmem:[#allocation2 + $0xf2] sm:$0xff] }
 0x162   : > { %v2080_v47 = vmul.f32 %v2048_v21, %v1952_v31  ;;  %v1483_v2 = vmul.f32 %v1747_v30, %v3806_v18  ;;  %v1815_v14 = vadd.f32 %v1783_v4, %v1715_v12  ;;  %v1116_v35 = vmul.f32 %v1647_v37, %v3775_v44 }
 0x163   : > { %v2113_v43 = vadd.f32 %v2081_v41, %v1953_v49  ;;  %v1415_v23 = vadd.f32 %v1383_v33, %v1315_v60  ;;  %v2237_v39 = vmul.f32 %v2205_v36, %v1981_v61  ;;  %v4291_v3 = vmul.f32 0.5, %v1952_v31 }
 0x164   : > { %v2112_v42 = vadd.f32 %v2080_v47, %v1952_v31  ;;  %v1184_v38 = vmul.f32 %v1747_v30, %v3777_v45  ;;  %v1915_v15 = vadd.f32 %v1883_v34, %v1815_v14  ;;  %v1583_v1 = vmul.f32 %v1847_v22, %v3808_v19 }
 0x165   : > { %v2145_v62 = vmul.f32 0.7978846, %v2113_v43  ;;  %v1515_v40 = vadd.f32 %v1483_v2, %v1415_v23  ;;  %3187 = vmatprep.mubr.msk.f32.mxu1 %vm933_vm1, %v2237_v39  ;;  %v1684_v16 = vmul.f32 %v3810_v20, %v1648_v27  ;;  %v1284_v61 = vmul.f32 %v1847_v22, %v3786_v52  ;;  %v1750_v39 = vld [vmem:[#allocation2 + $0x101] sm:$0xff] }
 0x166   : > { %v2144_v55 = vmul.f32 0.7978846, %v2112_v42  ;;  %v1216_v56 = vadd.f32 %v1184_v38, %v1116_v35  ;;  %v4299_v5 = vadd.f32 %v4144_v7, %v1915_v15  ;;  %v1784_v8 = vmul.f32 %v3815_v28, %v1748_v32  ;;  %v1650_v35 = vld [vmem:[#allocation2 + $0x100] sm:$0xff] }
 0x167   : > { %3316 = vtanh.f32 %v2145_v62  ;;  %v1615_v49 = vadd.f32 %v1583_v1, %v1515_v40  ;;  %v1884_v57 = vmul.f32 %v3817_v29, %v1848_v63  ;;  %v1384_v59 = vmul.f32 %v1648_v27, %v3802_v10 }
 0x168   : > { %v3313_v37 = vpop.eup %3312  ;;  %3318 = vtanh.f32 %v2144_v55  ;;  %v1316_v31 = vadd.f32 %v1284_v61, %v1216_v56  ;;  %v2018_v24 = vmul.f32 0.044715, %v4299_v5  ;;  %v1484_v54 = vmul.f32 %v1748_v32, %v3806_v18  ;;  %v1850_v55 = vld [vmem:[#allocation2 + $0x102] sm:$0xff] }
 0x169   : > { %v2206_v25 = vadd.f32 1.0, %v3313_v37  ;;  %v1716_v13 = vadd.f32 %v1684_v16, %v1615_v49  ;;  %v1584_v50 = vmul.f32 %v1848_v63, %v3808_v19  ;;  %v1117_v22 = vmul.f32 %v1648_v27, %v3775_v44 }
 0x16a   : > { %v1416_v30 = vadd.f32 %v1384_v59, %v1316_v31  ;;  %v1185_v58 = vmul.f32 %v1748_v32, %v3777_v45  ;;  %v2050_v51 = vmul.f32 %v2018_v24, %v4299_v5  ;;  %v1685_v33 = vmul.f32 %v3810_v20, %v1649_v9 }
 0x16b   : > { %v2238_v46 = vmul.f32 %v2206_v25, %v4270_v48  ;;  %v1816_v0 = vadd.f32 %v1784_v8, %v1716_v13  ;;  %v1285_v11 = vmul.f32 %v1848_v63, %v3786_v52  ;;  %v1385_v41 = vmul.f32 %v1649_v9, %v3802_v10 }
 0x16c   : > { %v1516_v21 = vadd.f32 %v1484_v54, %v1416_v30  ;;  %v1217_v4 = vadd.f32 %v1185_v58, %v1117_v22  ;;  %v2082_v34 = vmul.f32 %v2050_v51, %v4299_v5  ;;  %v1785_v36 = vmul.f32 %v3815_v28, %v1749_v53  ;;  %v1651_v22 = vld [vmem:[#allocation2 + $0x110] sm:$0xff] }
 0x16d   : > { %v3315_v12 = vpop.eup %3314  ;;  %3188 = vmatmul.mubr.msk.f32.gmra.mxu1 %vm933_vm1, %v2238_v46  ;;  %v1916_v60 = vadd.f32 %v1884_v57, %v1816_v0  ;;  %v1885_v48 = vmul.f32 %v3817_v29, %v1849_v6  ;;  %v1485_v14 = vmul.f32 %v1749_v53, %v3806_v18  ;;  %v1118_v42 = vmul.f32 %v1649_v9, %v3775_v44 }
 0x16e   : > { %v2207_v47 = vadd.f32 1.0, %v3315_v12  ;;  %v1616_v2 = vadd.f32 %v1584_v50, %v1516_v21  ;;  %v1317_v43 = vadd.f32 %v1285_v11, %v1217_v4  ;;  %v2114_v23 = vadd.f32 %v2082_v34, %v4299_v5 }
 0x16f   : > { %v4321_v27 = vadd.f32 %v4144_v7, %v1916_v60  ;;  %v1186_v32 = vmul.f32 %v1749_v53, %v3777_v45  ;;  %v1585_v40 = vmul.f32 %v1849_v6, %v3808_v19  ;;  %v1286_v56 = vmul.f32 %v1849_v6, %v3786_v52 }
 0x170   : > { %v2239_v38 = vmul.f32 %v2207_v47, %v4283_v17  ;;  %v1717_v62 = vadd.f32 %v1685_v33, %v1616_v2  ;;  %v1417_v15 = vadd.f32 %v1385_v41, %v1317_v43  ;;  %v2146_v1 = vmul.f32 0.7978846, %v2114_v23  ;;  %v1851_v2 = vld [vmem:[#allocation2 + $0x112] sm:$0xff] }
 0x171   : > { %v2019_v63 = vmul.f32 0.044715, %v4321_v27  ;;  %v1218_v16 = vadd.f32 %v1186_v32, %v1118_v42  ;;  %v1686_v8 = vmul.f32 %v3810_v20, %v1650_v35  ;;  %v1786_v37 = vmul.f32 %v3815_v28, %v1750_v39 }
 0x172   : > { %3190 = vmatprep.mubr.msk.f32.mxu1 %vm933_vm1, %v2239_v38  ;;  %v1817_v61 = vadd.f32 %v1785_v36, %v1717_v62  ;;  %v1517_v49 = vadd.f32 %v1485_v14, %v1417_v15  ;;  %3320 = vtanh.f32 %v2146_v1  ;;  %v1386_v31 = vmul.f32 %v1650_v35, %v3802_v10  ;;  %v1751_v36 = vld [vmem:[#allocation2 + $0x111] sm:$0xff]  ;;  %v1652_v15 = vld [vmem:[#allocation2 + $0x120] sm:$0xff] }
 0x173   : > { %v2051_v17 = vmul.f32 %v2019_v63, %v4321_v27  ;;  %v1318_v57 = vadd.f32 %v1286_v56, %v1218_v16  ;;  %v1886_v24 = vmul.f32 %v3817_v29, %v1850_v55  ;;  %v1486_v13 = vmul.f32 %v1750_v39, %v3806_v18 }
 0x174   : > { %v3317_v59 = vpop.eup %3316  ;;  %v1917_v9 = vadd.f32 %v1885_v48, %v1817_v61  ;;  %v1617_v25 = vadd.f32 %v1585_v40, %v1517_v49  ;;  %v1586_v6 = vmul.f32 %v1850_v55, %v3808_v19  ;;  %v1119_v0 = vmul.f32 %v1650_v35, %v3775_v44  ;;  %v1752_v49 = vld [vmem:[#allocation2 + $0x121] sm:$0xff] }
 0x175   : > { %v3319_v54 = vpop.eup %3318  ;;  %v2209_v30 = vadd.f32 1.0, %v3317_v59  ;;  %v2083_v50 = vmul.f32 %v2051_v17, %v4321_v27  ;;  %v1418_v53 = vadd.f32 %v1386_v31, %v1318_v57  ;;  %v1187_v11 = vmul.f32 %v1750_v39, %v3777_v45 }
 0x176   : > { %v2208_v58 = vadd.f32 1.0, %v3319_v54  ;;  %v4339_v46 = vadd.f32 %v4144_v7, %v1917_v9  ;;  %v1718_v51 = vadd.f32 %v1686_v8, %v1617_v25  ;;  %v1687_v60 = vmul.f32 %v3810_v20, %v1651_v22 }
 0x177   : > { %v2241_v33 = vmul.f32 %v2209_v30, %v4287_v26  ;;  %v2115_v21 = vadd.f32 %v2083_v50, %v4321_v27  ;;  %v1518_v4 = vadd.f32 %v1486_v13, %v1418_v53  ;;  %v1219_v43 = vadd.f32 %v1187_v11, %v1119_v0  ;;  %v1153_v0 = vld [vmem:[#allocation2 + $0x141] sm:$0xff] }
 0x178   : > { %v2240_v41 = vmul.f32 %v2208_v58, %v4291_v3  ;;  %v2020_v12 = vmul.f32 0.044715, %v4339_v46  ;;  %v1818_v34 = vadd.f32 %v1786_v37, %v1718_v51  ;;  %v1287_v14 = vmul.f32 %v1850_v55, %v3786_v52  ;;  %v1085_v51 = vld [vmem:[#allocation2 + $0x140] sm:$0xff] }
 0x179   : > { %v2147_v48 = vmul.f32 0.7978846, %v2115_v21  ;;  %v1618_v47 = vadd.f32 %v1586_v6, %v1518_v4  ;;  %v1387_v35 = vmul.f32 %v1651_v22, %v3802_v10  ;;  %v1787_v39 = vmul.f32 %v3815_v28, %v1751_v36 }
 0x17a   : > { %3191 = vmatmul.mubr.msk.f32.gmra.mxu1 %vm933_vm1, %v2240_v41  ;;  %v2052_v26 = vmul.f32 %v2020_v12, %v4339_v46  ;;  %v1918_v23 = vadd.f32 %v1886_v24, %v1818_v34  ;;  %v1319_v42 = vadd.f32 %v1287_v14, %v1219_v43  ;;  %v1887_v62 = vmul.f32 %v3817_v29, %v1851_v2  ;;  %v1852_v24 = vld [vmem:[#allocation2 + $0x122] sm:$0xff]  ;;  %v1653_v41 = vld [vmem:[#allocation2 + $0x130] sm:$0xff] }
 0x17b   : > { %3193 = vmatprep.mubr.msk.f32.mxu1 %vm933_vm1, %v2241_v33  ;;  %3322 = vtanh.f32 %v2147_v48  ;;  %v1719_v3 = vadd.f32 %v1687_v60, %v1618_v47  ;;  %v1487_v63 = vmul.f32 %v1751_v36, %v3806_v18  ;;  %v1120_v55 = vmul.f32 %v1651_v22, %v3775_v44  ;;  %v1253_v12 = vld [vmem:[#allocation2 + $0x142] sm:$0xff]  ;;  %v1753_v43 = vld [vmem:[#allocation2 + $0x131] sm:$0xff] }
 0x17c   : > { %v2084_v32 = vmul.f32 %v2052_v26, %v4339_v46  ;;  %v4356_v38 = vadd.f32 %v4144_v7, %v1918_v23  ;;  %v1419_v1 = vadd.f32 %v1387_v35, %v1319_v42  ;;  %v1986_v16 = vmul.f32 0.5, %v4299_v5  ;;  %v1353_v23 = vld [vmem:[#allocation2 + $0x150] sm:$0xff] }
 0x17d   : > { %v1819_v40 = vadd.f32 %v1787_v39, %v1719_v3  ;;  %v1188_v8 = vmul.f32 %v1751_v36, %v3777_v45  ;;  %v1587_v57 = vmul.f32 %v1851_v2, %v3808_v19  ;;  %v1688_v31 = vmul.f32 %v3810_v20, %v1652_v15 }
 0x17e   : > { %v2116_v56 = vadd.f32 %v2084_v32, %v4339_v46  ;;  %v2021_v61 = vmul.f32 0.044715, %v4356_v38  ;;  %v1519_v17 = vadd.f32 %v1487_v63, %v1419_v1  ;;  %v1288_v5 = vmul.f32 %v1851_v2, %v3786_v52 }
 0x17f   : > { %v1919_v37 = vadd.f32 %v1887_v62, %v1819_v40  ;;  %v3321_v59 = vpop.eup %3320  ;;  %v1220_v13 = vadd.f32 %v1188_v8, %v1120_v55  ;;  %v1788_v53 = vmul.f32 %v3815_v28, %v1752_v49  ;;  %v1388_v58 = vmul.f32 %v1652_v15, %v3802_v10  ;;  %v1853_v40 = vld [vmem:[#allocation2 + $0x132] sm:$0xff] }
 0x180   : > { %v2148_v9 = vmul.f32 0.7978846, %v2116_v56  ;;  %v2053_v25 = vmul.f32 %v2021_v61, %v4356_v38  ;;  %v2210_v54 = vadd.f32 1.0, %v3321_v59  ;;  %v1619_v50 = vadd.f32 %v1587_v57, %v1519_v17  ;;  %v1453_v17 = vld [vmem:[#allocation2 + $0x151] sm:$0xff] }
 0x181   : > { %v1958_v30 = vadd.f32 %v4144_v7, %v1919_v37  ;;  %v1320_v22 = vadd.f32 %v1288_v5, %v1220_v13  ;;  %v1888_v11 = vmul.f32 %v3817_v29, %v1852_v24  ;;  %v1488_v36 = vmul.f32 %v1752_v49, %v3806_v18  ;;  %v1553_v59 = vld [vmem:[#allocation2 + $0x152] sm:$0xff] }
 0x182   : > { %3324 = vtanh.f32 %v2148_v9  ;;  %v2085_v6 = vmul.f32 %v2053_v25, %v4356_v38  ;;  %v2242_v33 = vmul.f32 %v2210_v54, %v1986_v16  ;;  %v1720_v4 = vadd.f32 %v1688_v31, %v1619_v50 }
 0x183   : > { %v2022_v21 = vmul.f32 0.044715, %v1958_v30  ;;  %v1420_v60 = vadd.f32 %v1388_v58, %v1320_v22  ;;  %v1588_v48 = vmul.f32 %v1852_v24, %v3808_v19  ;;  %v1121_v14 = vmul.f32 %v3775_v44, %v1085_v51  ;;  %v1754_v22 = vld [vmem:[#allocation2 + $0x161] sm:$0xff] }
 0x184   : > { %v2117_v34 = vadd.f32 %v2085_v6, %v4356_v38  ;;  %3194 = vmatmul.mubr.msk.f32.gmra.mxu1 %vm933_vm1, %v2242_v33  ;;  %v1820_v2 = vadd.f32 %v1788_v53, %v1720_v4  ;;  %v1189_v26 = vmul.f32 %v3777_v45, %v1153_v0  ;;  %v1689_v39 = vmul.f32 %v3810_v20, %v1653_v41  ;;  %v1654_v6 = vld [vmem:[#allocation2 + $0x160] sm:$0xff] }
 0x185   : > { %v2054_v47 = vmul.f32 %v2022_v21, %v1958_v30  ;;  %v1520_v3 = vadd.f32 %v1488_v36, %v1420_v60  ;;  %v1289_v42 = vmul.f32 %v3786_v52, %v1253_v12  ;;  %v1987_v32 = vmul.f32 0.5, %v4321_v27  ;;  %v1854_v60 = vld [vmem:[#allocation2 + $0x162] sm:$0xff] }
 0x186   : > { %v2149_v35 = vmul.f32 0.7978846, %v2117_v34  ;;  %v1920_v15 = vadd.f32 %v1888_v11, %v1820_v2  ;;  %v1221_v1 = vadd.f32 %v1189_v26, %v1121_v14  ;;  %v1789_v16 = vmul.f32 %v3815_v28, %v1753_v43  ;;  %v1655_v43 = vld [vmem:[#allocation2 + $0x170] sm:$0xff] }
 0x187   : > { %v2086_v62 = vmul.f32 %v2054_v47, %v1958_v30  ;;  %v1620_v55 = vadd.f32 %v1588_v48, %v1520_v3  ;;  %v1389_v56 = vmul.f32 %v3802_v10, %v1353_v23  ;;  %v1988_v27 = vmul.f32 0.5, %v4339_v46 }
 0x188   : > { %v3323_v63 = vpop.eup %3322  ;;  %3326 = vtanh.f32 %v2149_v35  ;;  %v4386_v8 = vadd.f32 %v4144_v7, %v1920_v15  ;;  %v1321_v37 = vadd.f32 %v1289_v42, %v1221_v1  ;;  %v1889_v31 = vmul.f32 %v3817_v29, %v1853_v40  ;;  %v1755_v15 = vld [vmem:[#allocation2 + $0x171] sm:$0xff] }
 0x189   : > { %v2211_v61 = vadd.f32 1.0, %v3323_v63  ;;  %v2118_v49 = vadd.f32 %v2086_v62, %v1958_v30  ;;  %v1721_v57 = vadd.f32 %v1689_v39, %v1620_v55  ;;  %v1122_v9 = vmul.f32 %v1353_v23, %v3775_v44 }
 0x18a   : > { %v1989_v24 = vmul.f32 0.5, %v4356_v38  ;;  %v2023_v5 = vmul.f32 0.044715, %v4386_v8  ;;  %v1421_v50 = vadd.f32 %v1389_v56, %v1321_v37  ;;  %v1489_v53 = vmul.f32 %v3806_v18, %v1453_v17 }
 0x18b   : > { %v2243_v25 = vmul.f32 %v2211_v61, %v1987_v32  ;;  %v2150_v13 = vmul.f32 0.7978846, %v2118_v49  ;;  %v1821_v54 = vadd.f32 %v1789_v16, %v1721_v57  ;;  %v1190_v46 = vmul.f32 %v1453_v17, %v3777_v45 }
 0x18c   : > { %v4396_v58 = vmul.f32 0.5, %v1958_v30  ;;  %v2055_v51 = vmul.f32 %v2023_v5, %v4386_v8  ;;  %v1589_v38 = vmul.f32 %v3808_v19, %v1553_v59  ;;  %v1521_v33 = vadd.f32 %v1489_v53, %v1421_v50 }
 0x18d   : > { %3196 = vmatprep.mubr.msk.f32.mxu1 %vm933_vm1, %v2243_v25  ;;  %3328 = vtanh.f32 %v2150_v13  ;;  %v1921_v0 = vadd.f32 %v1889_v31, %v1821_v54  ;;  %v1222_v21 = vadd.f32 %v1190_v46, %v1122_v9  ;;  %v1290_v4 = vmul.f32 %v1553_v59, %v3786_v52  ;;  %v1855_v9 = vld [vmem:[#allocation2 + $0x172] sm:$0xff]  ;;  %v1656_v46 = vld [vmem:[#allocation2 + $0x180] sm:$0xff] }
 0x18e   : > { %v2087_v41 = vmul.f32 %v2055_v51, %v4386_v8  ;;  %v1690_v12 = vmul.f32 %v3810_v20, %v1654_v6  ;;  %v1790_v34 = vmul.f32 %v3815_v28, %v1754_v22  ;;  %v1390_v30 = vmul.f32 %v1654_v6, %v3802_v10 }
 0x18f   : > { %v3325_v11 = vpop.eup %3324  ;;  %v4406_v48 = vadd.f32 %v4144_v7, %v1921_v0  ;;  %v1621_v47 = vadd.f32 %v1589_v38, %v1521_v33  ;;  %v1322_v2 = vadd.f32 %v1290_v4, %v1222_v21  ;;  %v1490_v26 = vmul.f32 %v1754_v22, %v3806_v18 }
 0x190   : > { %v2212_v36 = vadd.f32 1.0, %v3325_v11  ;;  %v2119_v14 = vadd.f32 %v2087_v41, %v4386_v8  ;;  %v1123_v23 = vmul.f32 %v1654_v6, %v3775_v44  ;;  %v1191_v35 = vmul.f32 %v1754_v22, %v3777_v45  ;;  %v4428_v6 = vld [vmem:[%s4780_s4] ss:$0 sm:$0xff]  ;;  %v1756_v41 = vld [vmem:[#allocation2 + $0x181] sm:$0xff] }
 0x191   : > { %v2024_v39 = vmul.f32 0.044715, %v4406_v48  ;;  %v1722_v42 = vadd.f32 %v1690_v12, %v1621_v47  ;;  %v1291_v32 = vmul.f32 %v1854_v60, %v3786_v52  ;;  %v1422_v7 = vadd.f32 %v1390_v30, %v1322_v2  ;;  %v1856_v2 = vld [vmem:[#allocation2 + $0x182] sm:$0xff] }
 0x192   : > { %v2244_v3 = vmul.f32 %v2212_v36, %v1988_v27  ;;  %v2151_v62 = vmul.f32 0.7978846, %v2119_v14  ;;  %v1223_v40 = vadd.f32 %v1191_v35, %v1123_v23  ;;  %v1391_v1 = vmul.f32 %v1655_v43, %v3802_v10 }
 0x193   : > { %v2056_v63 = vmul.f32 %v2024_v39, %v4406_v48  ;;  %v1822_v55 = vadd.f32 %v1790_v34, %v1722_v42  ;;  %v1890_v16 = vmul.f32 %v3817_v29, %v1854_v60  ;;  %v1590_v56 = vmul.f32 %v1854_v60, %v3808_v19 }
 0x194   : > { %3197 = vmatmul.mubr.msk.f32.gmra.mxu1 %vm933_vm1, %v2244_v3  ;;  %3330 = vtanh.f32 %v2151_v62  ;;  %v1522_v49 = vadd.f32 %v1490_v26, %v1422_v7  ;;  %v1691_v37 = vmul.f32 %v3810_v20, %v1655_v43  ;;  %v1323_v17 = vadd.f32 %v1291_v32, %v1223_v40 }
 0x195   : > { %v3327_v61 = vpop.eup %3326  ;;  %v2088_v57 = vmul.f32 %v2056_v63, %v4406_v48  ;;  %v1922_v31 = vadd.f32 %v1890_v16, %v1822_v55  ;;  %v1791_v59 = vmul.f32 %v3815_v28, %v1755_v15  ;;  %v1491_v5 = vmul.f32 %v1755_v15, %v3806_v18 }
 0x196   : > { %v2213_v27 = vadd.f32 1.0, %v3327_v61  ;;  %v1622_v25 = vadd.f32 %v1590_v56, %v1522_v49  ;;  %v1423_v13 = vadd.f32 %v1391_v1, %v1323_v17  ;;  %v1124_v54 = vmul.f32 %v1655_v43, %v3775_v44 }
 0x197   : > { %v2120_v53 = vadd.f32 %v2088_v57, %v4406_v48  ;;  %v4431_v22 = vadd.f32 %v4428_v6, %v1922_v31  ;;  %v1192_v51 = vmul.f32 %v1755_v15, %v3777_v45  ;;  %v1891_v0 = vmul.f32 %v3817_v29, %v1855_v9  ;;  %v1657_v15 = vld [vmem:[#allocation2 + $0x190] sm:$0xff] }
 0x198   : > { %v2245_v50 = vmul.f32 %v2213_v27, %v1989_v24  ;;  %v1723_v38 = vadd.f32 %v1691_v37, %v1622_v25  ;;  %v1523_v33 = vadd.f32 %v1491_v5, %v1423_v13  ;;  %v1591_v21 = vmul.f32 %v1855_v9, %v3808_v19  ;;  %v1757_v27 = vld [vmem:[#allocation2 + $0x191] sm:$0xff] }
 0x199   : > { %v2152_v4 = vmul.f32 0.7978846, %v2120_v53  ;;  %v2025_v11 = vmul.f32 0.044715, %v4431_v22  ;;  %v1224_v12 = vadd.f32 %v1192_v51, %v1124_v54  ;;  %v1292_v34 = vmul.f32 %v1855_v9, %v3786_v52  ;;  %v1857_v25 = vld [vmem:[#allocation2 + $0x192] sm:$0xff] }
 0x19a   : > { %v3329_v24 = vpop.eup %3328  ;;  %3199 = vmatprep.mubr.msk.f32.mxu1 %vm933_vm1, %v2245_v50  ;;  %v1823_v30 = vadd.f32 %v1791_v59, %v1723_v38  ;;  %v1623_v36 = vadd.f32 %v1591_v21, %v1523_v33  ;;  %v1692_v47 = vmul.f32 %v3810_v20, %v1656_v46  ;;  %v1392_v26 = vmul.f32 %v1656_v46, %v3802_v10 }
 0x19b   : > { %v2214_v60 = vadd.f32 1.0, %v3329_v24  ;;  %3332 = vtanh.f32 %v2152_v4  ;;  %v2057_v43 = vmul.f32 %v2025_v11, %v4431_v22  ;;  %v1324_v14 = vadd.f32 %v1292_v34, %v1224_v12 }
 0x19c   : > { %v1923_v35 = vadd.f32 %v1891_v0, %v1823_v30  ;;  %v1724_v3 = vadd.f32 %v1692_v47, %v1623_v36  ;;  %v1792_v39 = vmul.f32 %v3815_v28, %v1756_v41  ;;  %v1892_v32 = vmul.f32 %v3817_v29, %v1856_v2  ;;  %v1658_v30 = vld [vmem:[#allocation2 + $0x1a0] sm:$0xff] }
 0x19d   : > { %v2246_v23 = vmul.f32 %v2214_v60, %v4396_v58  ;;  %v2089_v42 = vmul.f32 %v2057_v43, %v4431_v22  ;;  %v1424_v62 = vadd.f32 %v1392_v26, %v1324_v14  ;;  %v1492_v7 = vmul.f32 %v1756_v41, %v3806_v18 }
 0x19e   : > { %v1962_v40 = vadd.f32 %v4428_v6, %v1923_v35  ;;  %v1824_v1 = vadd.f32 %v1792_v39, %v1724_v3  ;;  %v1125_v63 = vmul.f32 %v1656_v46, %v3775_v44  ;;  %v1193_v58 = vmul.f32 %v1756_v41, %v3777_v45  ;;  %v1758_v3 = vld [vmem:[#allocation2 + $0x1a1] sm:$0xff] }
 0x19f   : > { %3200 = vmatmul.mubr.msk.f32.gmra.mxu1 %vm933_vm1, %v2246_v23  ;;  %v1991_v55 = vmul.f32 0.5, %v4386_v8  ;;  %v2121_v16 = vadd.f32 %v2089_v42, %v4431_v22  ;;  %v1524_v56 = vadd.f32 %v1492_v7, %v1424_v62  ;;  %v1592_v61 = vmul.f32 %v1856_v2, %v3808_v19 }
 0x1a0   : > { %v2026_v49 = vmul.f32 0.044715, %v1962_v40  ;;  %v1924_v37 = vadd.f32 %v1892_v32, %v1824_v1  ;;  %v1693_v17 = vmul.f32 %v3810_v20, %v1657_v15  ;;  %v1225_v57 = vadd.f32 %v1193_v58, %v1125_v63 }
 0x1a1   : > { %v3331_v31 = vpop.eup %3330  ;;  %v2153_v59 = vmul.f32 0.7978846, %v2121_v16  ;;  %v1624_v9 = vadd.f32 %v1592_v61, %v1524_v56  ;;  %v1293_v13 = vmul.f32 %v1856_v2, %v3786_v52  ;;  %v1393_v5 = vmul.f32 %v1657_v15, %v3802_v10 }
 0x1a2   : > { %v2215_v8 = vadd.f32 1.0, %v3331_v31  ;;  %v1992_v54 = vmul.f32 0.5, %v4406_v48  ;;  %v2058_v50 = vmul.f32 %v2026_v49, %v1962_v40  ;;  %v1963_v53 = vadd.f32 %v4428_v6, %v1924_v37 }
 0x1a3   : > { %3334 = vtanh.f32 %v2153_v59  ;;  %v1725_v46 = vadd.f32 %v1693_v17, %v1624_v9  ;;  %v1793_v51 = vmul.f32 %v3815_v28, %v1757_v27  ;;  %v1325_v38 = vadd.f32 %v1293_v13, %v1225_v57  ;;  %v1659_v17 = vld [vmem:[#allocation2 + $0x1b0] sm:$0xff] }
 0x1a4   : > { %v2247_v0 = vmul.f32 %v2215_v8, %v1991_v55  ;;  %v2090_v33 = vmul.f32 %v2058_v50, %v1962_v40  ;;  %v2027_v21 = vmul.f32 0.044715, %v1963_v53  ;;  %v1893_v24 = vmul.f32 %v3817_v29, %v1857_v25  ;;  %v1759_v9 = vld [vmem:[#allocation2 + $0x1b1] sm:$0xff] }
 0x1a5   : > { %v1825_v4 = vadd.f32 %v1793_v51, %v1725_v46  ;;  %v1425_v11 = vadd.f32 %v1393_v5, %v1325_v38  ;;  %v1493_v41 = vmul.f32 %v1757_v27, %v3806_v18  ;;  %v1126_v12 = vmul.f32 %v1657_v15, %v3775_v44 }
 0x1a6   : > { %3202 = vmatprep.mubr.msk.f32.mxu1 %vm933_vm1, %v2247_v0  ;;  %v1993_v48 = vmul.f32 0.5, %v4431_v22  ;;  %v2122_v34 = vadd.f32 %v2090_v33, %v1962_v40  ;;  %v2059_v60 = vmul.f32 %v2027_v21, %v1963_v53  ;;  %v1194_v36 = vmul.f32 %v1757_v27, %v3777_v45 }
 0x1a7   : > { %v4466_v47 = vmul.f32 0.5, %v1962_v40  ;;  %v1925_v2 = vadd.f32 %v1893_v24, %v1825_v4  ;;  %v1525_v43 = vadd.f32 %v1493_v41, %v1425_v11  ;;  %v1593_v14 = vmul.f32 %v1857_v25, %v3808_v19  ;;  %v1858_v40 = vld [vmem:[#allocation2 + $0x1a2] sm:$0xff] }
 0x1a8   : > { %v3333_v26 = vpop.eup %3332  ;;  %v2154_v23 = vmul.f32 0.7978846, %v2122_v34  ;;  %v2091_v35 = vmul.f32 %v2059_v60, %v1963_v53  ;;  %v1226_v39 = vadd.f32 %v1194_v36, %v1126_v12  ;;  %v1294_v42 = vmul.f32 %v1857_v25, %v3786_v52 }
 0x1a9   : > { %v2216_v32 = vadd.f32 1.0, %v3333_v26  ;;  %v4471_v22 = vadd.f32 %v4428_v6, %v1925_v2  ;;  %v1625_v62 = vadd.f32 %v1593_v14, %v1525_v43  ;;  %v1694_v7 = vmul.f32 %v3810_v20, %v1658_v30 }
 0x1aa   : > { %3336 = vtanh.f32 %v2154_v23  ;;  %v2123_v15 = vadd.f32 %v2091_v35, %v1963_v53  ;;  %v1326_v1 = vadd.f32 %v1294_v42, %v1226_v39  ;;  %v1394_v63 = vmul.f32 %v1658_v30, %v3802_v10  ;;  %v1760_v39 = vld [vmem:[#allocation2 + $0x1c1] sm:$0xff] }
 0x1ab   : > { %v2248_v58 = vmul.f32 %v2216_v32, %v1992_v54  ;;  %v2028_v55 = vmul.f32 0.044715, %v4471_v22  ;;  %v1726_v16 = vadd.f32 %v1694_v7, %v1625_v62  ;;  %v1794_v56 = vmul.f32 %v3815_v28, %v1758_v3  ;;  %v1859_v54 = vld [vmem:[#allocation2 + $0x1b2] sm:$0xff]  ;;  %v1093_v62 = vld [vmem:[#allocation2 + $0x1e0] sm:$0xff] }
 0x1ac   : > { %v2155_v61 = vmul.f32 0.7978846, %v2123_v15  ;;  %v1426_v49 = vadd.f32 %v1394_v63, %v1326_v1  ;;  %v1494_v37 = vmul.f32 %v1758_v3, %v3806_v18  ;;  %v1127_v27 = vmul.f32 %v1658_v30, %v3775_v44  ;;  %v1660_v30 = vld [vmem:[#allocation2 + $0x1c0] sm:$0xff] }
 0x1ad   : > { %3203 = vmatmul.mubr.msk.f32.gmra.mxu1 %vm933_vm1, %v2248_v58  ;;  %v2060_v57 = vmul.f32 %v2028_v55, %v4471_v22  ;;  %v1826_v31 = vadd.f32 %v1794_v56, %v1726_v16  ;;  %v1894_v59 = vmul.f32 %v3817_v29, %v1858_v40  ;;  %v1195_v25 = vmul.f32 %v1758_v3, %v3777_v45  ;;  %v1860_v63 = vld [vmem:[#allocation2 + $0x1c2] sm:$0xff] }
 0x1ae   : > { %v4483_v13 = vmul.f32 0.5, %v1963_v53  ;;  %3338 = vtanh.f32 %v2155_v61  ;;  %v1526_v5 = vadd.f32 %v1494_v37, %v1426_v49  ;;  %v1594_v8 = vmul.f32 %v1858_v40, %v3808_v19  ;;  %v1161_v16 = vld [vmem:[#allocation2 + $0x1e1] sm:$0xff] }
 0x1af   : > { %v2092_v50 = vmul.f32 %v2060_v57, %v4471_v22  ;;  %v1926_v46 = vadd.f32 %v1894_v59, %v1826_v31  ;;  %v1695_v51 = vmul.f32 %v3810_v20, %v1659_v17  ;;  %v1227_v38 = vadd.f32 %v1195_v25, %v1127_v27  ;;  %v1261_v56 = vld [vmem:[#allocation2 + $0x1e2] sm:$0xff]  ;;  %v1661_v27 = vld [vmem:[#allocation2 + $0x1d0] sm:$0xff] }
 0x1b0   : > { %v3335_v0 = vpop.eup %3334  ;;  %v1626_v33 = vadd.f32 %v1594_v8, %v1526_v5  ;;  %v1795_v21 = vmul.f32 %v3815_v28, %v1759_v9  ;;  %v1295_v24 = vmul.f32 %v1858_v40, %v3786_v52  ;;  %v1395_v53 = vmul.f32 %v1659_v17, %v3802_v10  ;;  %v1361_v5 = vld [vmem:[#allocation2 + $0x1f0] sm:$0xff] }
 0x1b1   : > { %v2217_v4 = vadd.f32 1.0, %v3335_v0  ;;  %v2124_v11 = vadd.f32 %v2092_v50, %v4471_v22  ;;  %v4493_v41 = vadd.f32 %v4428_v6, %v1926_v46  ;;  %v1895_v12 = vmul.f32 %v3817_v29, %v1859_v54 }
 0x1b2   : > { %v1727_v34 = vadd.f32 %v1695_v51, %v1626_v33  ;;  %v1327_v60 = vadd.f32 %v1295_v24, %v1227_v38  ;;  %v1128_v36 = vmul.f32 %v1659_v17, %v3775_v44  ;;  %v1196_v2 = vmul.f32 %v1759_v9, %v3777_v45 }
 0x1b3   : > { %v2249_v43 = vmul.f32 %v2217_v4, %v1993_v48  ;;  %v2156_v14 = vmul.f32 0.7978846, %v2124_v11  ;;  %v2029_v26 = vmul.f32 0.044715, %v4493_v41  ;;  %v1495_v23 = vmul.f32 %v1759_v9, %v3806_v18  ;;  %v1861_v11 = vld [vmem:[#allocation2 + $0x1d2] sm:$0xff] }
 0x1b4   : > { %v1827_v35 = vadd.f32 %v1795_v21, %v1727_v34  ;;  %v1427_v3 = vadd.f32 %v1395_v53, %v1327_v60  ;;  %v1228_v42 = vadd.f32 %v1196_v2, %v1128_v36  ;;  %v1296_v32 = vmul.f32 %v1859_v54, %v3786_v52  ;;  %v1761_v21 = vld [vmem:[#allocation2 + $0x1d1] sm:$0xff] }
 0x1b5   : > { %3205 = vmatprep.mubr.msk.f32.mxu1 %vm933_vm1, %v2249_v43  ;;  %3340 = vtanh.f32 %v2156_v14  ;;  %v2061_v7 = vmul.f32 %v2029_v26, %v4493_v41  ;;  %v1595_v15 = vmul.f32 %v1859_v54, %v3808_v19  ;;  %v1696_v48 = vmul.f32 %v3810_v20, %v1660_v30  ;;  %v1461_v2 = vld [vmem:[#allocation2 + $0x1f1] sm:$0xff] }
 0x1b6   : > { %v1927_v40 = vadd.f32 %v1895_v12, %v1827_v35  ;;  %v1527_v1 = vadd.f32 %v1495_v23, %v1427_v3  ;;  %v1328_v58 = vadd.f32 %v1296_v32, %v1228_v42  ;;  %v1396_v55 = vmul.f32 %v1660_v30, %v3802_v10  ;;  %v1561_v42 = vld [vmem:[#allocation2 + $0x1f2] sm:$0xff] }
 0x1b7   : > { %v3337_v61 = vpop.eup %3336  ;;  %v2093_v49 = vmul.f32 %v2061_v7, %v4493_v41  ;;  %v1796_v37 = vmul.f32 %v3815_v28, %v1760_v39  ;;  %v1496_v17 = vmul.f32 %v1760_v39, %v3806_v18  ;;  %v1129_v57 = vmul.f32 %v3775_v44, %v1093_v62 }
 0x1b8   : > { %v2218_v31 = vadd.f32 1.0, %v3337_v61  ;;  %v4511_v59 = vadd.f32 %v4428_v6, %v1927_v40  ;;  %v1627_v9 = vadd.f32 %v1595_v15, %v1527_v1  ;;  %v1428_v25 = vadd.f32 %v1396_v55, %v1328_v58  ;;  %v1662_v1 = vld [vmem:[#allocation2 + $0x200] sm:$0xff] }
 0x1b9   : > { %v2125_v8 = vadd.f32 %v2093_v49, %v4493_v41  ;;  %v1596_v54 = vmul.f32 %v1860_v63, %v3808_v19  ;;  %v1197_v50 = vmul.f32 %v3777_v45, %v1161_v16  ;;  %v1297_v46 = vmul.f32 %v3786_v52, %v1261_v56 }
 0x1ba   : > { %v2250_v51 = vmul.f32 %v2218_v31, %v4466_v47  ;;  %v2030_v38 = vmul.f32 0.044715, %v4511_v59  ;;  %v1728_v0 = vadd.f32 %v1696_v48, %v1627_v9  ;;  %v1697_v33 = vmul.f32 %v3810_v20, %v1661_v27 }
 0x1bb   : > { %v3339_v24 = vpop.eup %3338  ;;  %v2157_v53 = vmul.f32 0.7978846, %v2125_v8  ;;  %v1528_v4 = vadd.f32 %v1496_v17, %v1428_v25  ;;  %v1229_v12 = vadd.f32 %v1197_v50, %v1129_v57  ;;  %v1397_v34 = vmul.f32 %v3802_v10, %v1361_v5  ;;  %v1762_v17 = vld [vmem:[#allocation2 + $0x201] sm:$0xff] }
 0x1bc   : > { %3206 = vmatmul.mubr.msk.f32.gmra.mxu1 %vm933_vm1, %v2250_v51  ;;  %v2219_v60 = vadd.f32 1.0, %v3339_v24  ;;  %v2062_v30 = vmul.f32 %v2030_v38, %v4511_v59  ;;  %v1828_v36 = vadd.f32 %v1796_v37, %v1728_v0  ;;  %v1896_v47 = vmul.f32 %v3817_v29, %v1860_v63  ;;  %v1663_v24 = vld [vmem:[#allocation2 + $0x210] sm:$0xff] }
 0x1bd   : > { %3342 = vtanh.f32 %v2157_v53  ;;  %v1628_v43 = vadd.f32 %v1596_v54, %v1528_v4  ;;  %v1797_v14 = vmul.f32 %v3815_v28, %v1761_v21  ;;  %v1329_v26 = vadd.f32 %v1297_v46, %v1229_v12 }
 0x1be   : > { %v2251_v23 = vmul.f32 %v2219_v60, %v4483_v13  ;;  %v2094_v35 = vmul.f32 %v2062_v30, %v4511_v59  ;;  %v1928_v3 = vadd.f32 %v1896_v47, %v1828_v36  ;;  %v1897_v39 = vmul.f32 %v3817_v29, %v1861_v11 }
 0x1bf   : > { %v1729_v32 = vadd.f32 %v1697_v33, %v1628_v43  ;;  %v1429_v62 = vadd.f32 %v1397_v34, %v1329_v26  ;;  %v1497_v7 = vmul.f32 %v3806_v18, %v1461_v2  ;;  %v1130_v15 = vmul.f32 %v1361_v5, %v3775_v44  ;;  %v1862_v5 = vld [vmem:[#allocation2 + $0x202] sm:$0xff] }
 0x1c0   : > { %3208 = vmatprep.mubr.msk.f32.mxu1 %vm933_vm1, %v2251_v23  ;;  %v1996_v48 = vmul.f32 0.5, %v4471_v22  ;;  %v2126_v40 = vadd.f32 %v2094_v35, %v4511_v59  ;;  %v4534_v13 = vadd.f32 %v4428_v6, %v1928_v3  ;;  %v1198_v63 = vmul.f32 %v1461_v2, %v3777_v45  ;;  %v1763_v2 = vld [vmem:[#allocation2 + $0x211] sm:$0xff] }
 0x1c1   : > { %v1997_v58 = vmul.f32 0.5, %v4493_v41  ;;  %v1829_v55 = vadd.f32 %v1797_v14, %v1729_v32  ;;  %v1529_v16 = vadd.f32 %v1497_v7, %v1429_v62  ;;  %v1597_v56 = vmul.f32 %v3808_v19, %v1561_v42  ;;  %v1863_v23 = vld [vmem:[#allocation2 + $0x212] sm:$0xff] }
 0x1c2   : > { %v3341_v61 = vpop.eup %3340  ;;  %v2158_v49 = vmul.f32 0.7978846, %v2126_v40  ;;  %v2031_v37 = vmul.f32 0.044715, %v4534_v13  ;;  %v1230_v22 = vadd.f32 %v1198_v63, %v1130_v15  ;;  %v1298_v27 = vmul.f32 %v1561_v42, %v3786_v52 }
 0x1c3   : > { %v2220_v57 = vadd.f32 1.0, %v3341_v61  ;;  %v1929_v31 = vadd.f32 %v1897_v39, %v1829_v55  ;;  %v1629_v9 = vadd.f32 %v1597_v56, %v1529_v16  ;;  %v1698_v25 = vmul.f32 %v3810_v20, %v1662_v1 }
 0x1c4   : > { %3344 = vtanh.f32 %v2158_v49  ;;  %v2063_v41 = vmul.f32 %v2031_v37, %v4534_v13  ;;  %v1330_v8 = vadd.f32 %v1298_v27, %v1230_v22  ;;  %v1398_v54 = vmul.f32 %v1662_v1, %v3802_v10 }
 0x1c5   : > { %v2252_v50 = vmul.f32 %v2220_v57, %v1996_v48  ;;  %v1968_v46 = vadd.f32 %v4428_v6, %v1929_v31  ;;  %v1730_v51 = vadd.f32 %v1698_v25, %v1629_v9  ;;  %v1798_v38 = vmul.f32 %v3815_v28, %v1762_v17 }
 0x1c6   : > { %v2095_v0 = vmul.f32 %v2063_v41, %v4534_v13  ;;  %v1430_v33 = vadd.f32 %v1398_v54, %v1330_v8  ;;  %v1498_v21 = vmul.f32 %v1762_v17, %v3806_v18  ;;  %v1131_v53 = vmul.f32 %v1662_v1, %v3775_v44 }
 0x1c7   : > { %3209 = vmatmul.mubr.msk.f32.gmra.mxu1 %vm933_vm1, %v2252_v50  ;;  %v2032_v4 = vmul.f32 0.044715, %v1968_v46  ;;  %v1830_v11 = vadd.f32 %v1798_v38, %v1730_v51  ;;  %v1898_v12 = vmul.f32 %v3817_v29, %v1862_v5  ;;  %v1199_v34 = vmul.f32 %v1762_v17, %v3777_v45  ;;  %v1664_v17 = vld [vmem:[#allocation2 + $0x220] sm:$0xff] }
 0x1c8   : > { %v1998_v60 = vmul.f32 0.5, %v4511_v59  ;;  %v2127_v30 = vadd.f32 %v2095_v0, %v4534_v13  ;;  %v1530_v36 = vadd.f32 %v1498_v21, %v1430_v33  ;;  %v1598_v47 = vmul.f32 %v1862_v5, %v3808_v19  ;;  %v1864_v33 = vld [vmem:[#allocation2 + $0x222] sm:$0xff] }
 0x1c9   : > { %v2064_v43 = vmul.f32 %v2032_v4, %v1968_v46  ;;  %v1930_v14 = vadd.f32 %v1898_v12, %v1830_v11  ;;  %v1699_v26 = vmul.f32 %v3810_v20, %v1663_v24  ;;  %v1231_v35 = vadd.f32 %v1199_v34, %v1131_v53 }
 0x1ca   : > { %v3343_v3 = vpop.eup %3342  ;;  %v2159_v39 = vmul.f32 0.7978846, %v2127_v30  ;;  %v1630_v42 = vadd.f32 %v1598_v47, %v1530_v36  ;;  %v1299_v32 = vmul.f32 %v1862_v5, %v3786_v52  ;;  %v1399_v62 = vmul.f32 %v1663_v24, %v3802_v10  ;;  %v1764_v5 = vld [vmem:[#allocation2 + $0x221] sm:$0xff] }
 0x1cb   : > { %v2221_v59 = vadd.f32 1.0, %v3343_v3  ;;  %v2096_v7 = vmul.f32 %v2064_v43, %v1968_v46  ;;  %v1969_v15 = vadd.f32 %v4428_v6, %v1930_v14  ;;  %v1799_v48 = vmul.f32 %v3815_v28, %v1763_v2 }
 0x1cc   : > { %3346 = vtanh.f32 %v2159_v39  ;;  %v1731_v40 = vadd.f32 %v1699_v26, %v1630_v42  ;;  %v1899_v1 = vmul.f32 %v3817_v29, %v1863_v23  ;;  %v1331_v63 = vadd.f32 %v1299_v32, %v1231_v35 }
 0x1cd   : > { %v2253_v55 = vmul.f32 %v2221_v59, %v1997_v58  ;;  %v2128_v16 = vadd.f32 %v2096_v7, %v1968_v46  ;;  %v2033_v56 = vmul.f32 0.044715, %v1969_v15  ;;  %v1499_v61 = vmul.f32 %v1763_v2, %v3806_v18 }
 0x1ce   : > { %v1831_v49 = vadd.f32 %v1799_v48, %v1731_v40  ;;  %v1431_v37 = vadd.f32 %v1399_v62, %v1331_v63  ;;  %v1132_v22 = vmul.f32 %v1663_v24, %v3775_v44  ;;  %v1200_v27 = vmul.f32 %v1763_v2, %v3777_v45  ;;  %v1665_v2 = vld [vmem:[#allocation2 + $0x230] sm:$0xff] }
 0x1cf   : > { %3211 = vmatprep.mubr.msk.f32.mxu1 %vm933_vm1, %v2253_v55  ;;  %v1999_v57 = vmul.f32 0.5, %v4534_v13  ;;  %v2160_v31 = vmul.f32 0.7978846, %v2128_v16  ;;  %v2065_v9 = vmul.f32 %v2033_v56, %v1969_v15  ;;  %v1599_v25 = vmul.f32 %v1863_v23, %v3808_v19  ;;  %v1865_v63 = vld [vmem:[#allocation2 + $0x232] sm:$0xff] }
 0x1d0   : > { %v1931_v58 = vadd.f32 %v1899_v1, %v1831_v49  ;;  %v1531_v41 = vadd.f32 %v1499_v61, %v1431_v37  ;;  %v1232_v8 = vadd.f32 %v1200_v27, %v1132_v22  ;;  %v1300_v54 = vmul.f32 %v1863_v23, %v3786_v52 }
 0x1d1   : > { %v3345_v50 = vpop.eup %3344  ;;  %v4568_v51 = vmul.f32 0.5, %v1968_v46  ;;  %3348 = vtanh.f32 %v2160_v31  ;;  %v2097_v38 = vmul.f32 %v2065_v9, %v1969_v15  ;;  %v1700_v0 = vmul.f32 %v3810_v20, %v1664_v17 }
 0x1d2   : > { %v2222_v21 = vadd.f32 1.0, %v3345_v50  ;;  %v4572_v13 = vadd.f32 %v4428_v6, %v1931_v58  ;;  %v1631_v24 = vadd.f32 %v1599_v25, %v1531_v41  ;;  %v1332_v53 = vadd.f32 %v1300_v54, %v1232_v8  ;;  %v1666_v58 = vld [vmem:[#allocation2 + $0x240] sm:$0xff] }
 0x1d3   : > { %v2129_v4 = vadd.f32 %v2097_v38, %v1969_v15  ;;  %v1800_v11 = vmul.f32 %v3815_v28, %v1764_v5  ;;  %v1400_v12 = vmul.f32 %v1664_v17, %v3802_v10  ;;  %v1133_v34 = vmul.f32 %v1664_v17, %v3775_v44 }
 0x1d4   : > { %v2254_v46 = vmul.f32 %v2222_v21, %v1998_v60  ;;  %v2034_v30 = vmul.f32 0.044715, %v4572_v13  ;;  %v1732_v36 = vadd.f32 %v1700_v0, %v1631_v24  ;;  %v1900_v47 = vmul.f32 %v3817_v29, %v1864_v33  ;;  %v1765_v60 = vld [vmem:[#allocation2 + $0x231] sm:$0xff]  ;;  %v1766_v0 = vld [vmem:[#allocation2 + $0x241] sm:$0xff] }
 0x1d5   : > { %v2161_v43 = vmul.f32 0.7978846, %v2129_v4  ;;  %v1432_v14 = vadd.f32 %v1400_v12, %v1332_v53  ;;  %v1500_v26 = vmul.f32 %v1764_v5, %v3806_v18  ;;  %v1201_v23 = vmul.f32 %v1764_v5, %v3777_v45 }
 0x1d6   : > { %3212 = vmatmul.mubr.msk.f32.gmra.mxu1 %vm933_vm1, %v2254_v46  ;;  %v2066_v35 = vmul.f32 %v2034_v30, %v4572_v13  ;;  %v1832_v3 = vadd.f32 %v1800_v11, %v1732_v36  ;;  %v1600_v39 = vmul.f32 %v1864_v33, %v3808_v19  ;;  %v1301_v42 = vmul.f32 %v1864_v33, %v3786_v52  ;;  %v1866_v46 = vld [vmem:[#allocation2 + $0x242] sm:$0xff] }
 0x1d7   : > { %3350 = vtanh.f32 %v2161_v43  ;;  %v1532_v32 = vadd.f32 %v1500_v26, %v1432_v14  ;;  %v1233_v62 = vadd.f32 %v1201_v23, %v1133_v34  ;;  %v1401_v59 = vmul.f32 %v1665_v2, %v3802_v10  ;;  %v1667_v43 = vld [vmem:[#allocation2 + $0x250] sm:$0xff] }
 0x1d8   : > { %v4586_v7 = vmul.f32 0.5, %v1969_v15  ;;  %v2098_v48 = vmul.f32 %v2066_v35, %v4572_v13  ;;  %v1932_v40 = vadd.f32 %v1900_v47, %v1832_v3  ;;  %v1701_v1 = vmul.f32 %v3810_v20, %v1665_v2 }
 0x1d9   : > { %v3347_v55 = vpop.eup %3346  ;;  %v1632_v16 = vadd.f32 %v1600_v39, %v1532_v32  ;;  %v1801_v56 = vmul.f32 %v3815_v28, %v1765_v60  ;;  %v1333_v61 = vadd.f32 %v1301_v42, %v1233_v62  ;;  %v1134_v49 = vmul.f32 %v1665_v2, %v3775_v44 }
 0x1da   : > { %v2223_v37 = vadd.f32 1.0, %v3347_v55  ;;  %v2130_v17 = vadd.f32 %v2098_v48, %v4572_v13  ;;  %v4594_v22 = vadd.f32 %v4428_v6, %v1932_v40  ;;  %v1202_v15 = vmul.f32 %v1765_v60, %v3777_v45  ;;  %v1767_v40 = vld [vmem:[#allocation2 + $0x251] sm:$0xff] }
 0x1db   : > { %v1733_v27 = vadd.f32 %v1701_v1, %v1632_v16  ;;  %v1901_v31 = vmul.f32 %v3817_v29, %v1865_v63  ;;  %v1433_v9 = vadd.f32 %v1401_v59, %v1333_v61  ;;  %v1501_v25 = vmul.f32 %v1765_v60, %v3806_v18 }
 0x1dc   : > { %v2255_v41 = vmul.f32 %v2223_v37, %v1999_v57  ;;  %v2162_v5 = vmul.f32 0.7978846, %v2130_v17  ;;  %v2035_v8 = vmul.f32 0.044715, %v4594_v22  ;;  %v1601_v54 = vmul.f32 %v1865_v63, %v3808_v19 }
 0x1dd   : > { %v1833_v50 = vadd.f32 %v1801_v56, %v1733_v27  ;;  %v1533_v38 = vadd.f32 %v1501_v25, %v1433_v9  ;;  %v1234_v33 = vadd.f32 %v1202_v15, %v1134_v49  ;;  %v1302_v21 = vmul.f32 %v1865_v63, %v3786_v52 }
 0x1de   : > { %v3349_v24 = vpop.eup %3348  ;;  %3214 = vmatprep.mubr.msk.f32.mxu1 %vm933_vm1, %v2255_v41  ;;  %3352 = vtanh.f32 %v2162_v5  ;;  %v2067_v53 = vmul.f32 %v2035_v8, %v4594_v22  ;;  %v1702_v4 = vmul.f32 %v3810_v20, %v1666_v58  ;;  %v1402_v57 = vmul.f32 %v1666_v58, %v3802_v10 }
 0x1df   : > { %v2224_v11 = vadd.f32 1.0, %v3349_v24  ;;  %v1933_v12 = vadd.f32 %v1901_v31, %v1833_v50  ;;  %v1633_v34 = vadd.f32 %v1601_v54, %v1533_v38  ;;  %v1334_v30 = vadd.f32 %v1302_v21, %v1234_v33  ;;  %v1867_v31 = vld [vmem:[#allocation2 + $0x252] sm:$0xff]  ;;  %v1668_v50 = vld [vmem:[#allocation2 + $0x260] sm:$0xff] }
 0x1e0   : > { %v2099_v36 = vmul.f32 %v2067_v53, %v4594_v22  ;;  %v1802_v47 = vmul.f32 %v3815_v28, %v1766_v0  ;;  %v1502_v2 = vmul.f32 %v1766_v0, %v3806_v18  ;;  %v1135_v14 = vmul.f32 %v1666_v58, %v3775_v44 }
 0x1e1   : > { %v2256_v26 = vmul.f32 %v2224_v11, %v4568_v51  ;;  %v4612_v23 = vadd.f32 %v4428_v6, %v1933_v12  ;;  %v1734_v35 = vadd.f32 %v1702_v4, %v1633_v34  ;;  %v1434_v3 = vadd.f32 %v1402_v57, %v1334_v30  ;;  %v1768_v4 = vld [vmem:[#allocation2 + $0x261] sm:$0xff] }
 0x1e2   : > { %v2131_v39 = vadd.f32 %v2099_v36, %v4594_v22  ;;  %v1902_v60 = vmul.f32 %v3817_v29, %v1866_v46  ;;  %v1602_v42 = vmul.f32 %v1866_v46, %v3808_v19  ;;  %v1203_v32 = vmul.f32 %v1766_v0, %v3777_v45 }
 0x1e3   : > { %3215 = vmatmul.mubr.msk.f32.gmra.mxu1 %vm933_vm1, %v2256_v26  ;;  %v2036_v62 = vmul.f32 0.044715, %v4612_v23  ;;  %v1834_v59 = vadd.f32 %v1802_v47, %v1734_v35  ;;  %v1534_v48 = vadd.f32 %v1502_v2, %v1434_v3  ;;  %v1703_v51 = vmul.f32 %v3810_v20, %v1667_v43  ;;  %v1868_v47 = vld [vmem:[#allocation2 + $0x262] sm:$0xff]  ;;  %v1669_v35 = vld [vmem:[#allocation2 + $0x270] sm:$0xff] }
 0x1e4   : > { %v3351_v1 = vpop.eup %3350  ;;  %v2163_v63 = vmul.f32 0.7978846, %v2131_v39  ;;  %v1235_v55 = vadd.f32 %v1203_v32, %v1135_v14  ;;  %v1303_v16 = vmul.f32 %v1866_v46, %v3786_v52  ;;  %v1403_v56 = vmul.f32 %v1667_v43, %v3802_v10 }
 0x1e5   : > { %v2225_v61 = vadd.f32 1.0, %v3351_v1  ;;  %v2068_v49 = vmul.f32 %v2036_v62, %v4612_v23  ;;  %v1934_v37 = vadd.f32 %v1902_v60, %v1834_v59  ;;  %v1634_v17 = vadd.f32 %v1602_v42, %v1534_v48  ;;  %v1769_v48 = vld [vmem:[#allocation2 + $0x271] sm:$0xff] }
 0x1e6   : > { %v2002_v15 = vmul.f32 0.5, %v4572_v13  ;;  %3354 = vtanh.f32 %v2163_v63  ;;  %v1803_v27 = vmul.f32 %v3815_v28, %v1767_v40  ;;  %v1335_v9 = vadd.f32 %v1303_v16, %v1235_v55  ;;  %v1869_v16 = vld [vmem:[#allocation2 + $0x272] sm:$0xff] }
 0x1e7   : > { %v2257_v25 = vmul.f32 %v2225_v61, %v4586_v7  ;;  %v2100_v58 = vmul.f32 %v2068_v49, %v4612_v23  ;;  %v4629_v41 = vadd.f32 %v4428_v6, %v1934_v37  ;;  %v1735_v5 = vadd.f32 %v1703_v51, %v1634_v17 }
 0x1e8   : > { %v1435_v8 = vadd.f32 %v1403_v56, %v1335_v9  ;;  %v1503_v54 = vmul.f32 %v1767_v40, %v3806_v18  ;;  %v1136_v38 = vmul.f32 %v1667_v43, %v3775_v44  ;;  %v1204_v13 = vmul.f32 %v1767_v40, %v3777_v45 }
 0x1e9   : > { %3217 = vmatprep.mubr.msk.f32.mxu1 %vm933_vm1, %v2257_v25  ;;  %v2132_v0 = vadd.f32 %v2100_v58, %v4612_v23  ;;  %v2037_v7 = vmul.f32 0.044715, %v4629_v41  ;;  %v1835_v33 = vadd.f32 %v1803_v27, %v1735_v5  ;;  %v1903_v21 = vmul.f32 %v3817_v29, %v1867_v31 }
 0x1ea   : > { %v1535_v24 = vadd.f32 %v1503_v54, %v1435_v8  ;;  %v1603_v53 = vmul.f32 %v1867_v31, %v3808_v19  ;;  %v1236_v57 = vadd.f32 %v1204_v13, %v1136_v38  ;;  %v1304_v11 = vmul.f32 %v1867_v31, %v3786_v52 }
 0x1eb   : > { %v3353_v12 = vpop.eup %3352  ;;  %v2164_v44 = vmul.f32 0.7978846, %v2132_v0  ;;  %v2069_v45 = vmul.f32 %v2037_v7, %v4629_v41  ;;  %v1935_v34 = vadd.f32 %v1903_v21, %v1835_v33  ;;  %v1704_v46 = vmul.f32 %v3810_v20, %v1668_v50 }
 0x1ec   : > { %v2226_v30 = vadd.f32 1.0, %v3353_v12  ;;  %v1635_v36 = vadd.f32 %v1603_v53, %v1535_v24  ;;  %v1336_v2 = vadd.f32 %v1304_v11, %v1236_v57  ;;  %v1404_v43 = vmul.f32 %v1668_v50, %v3802_v10 }
 0x1ed   : > { %3356 = vtanh.f32 %v2164_v44  ;;  %v2101_v14 = vmul.f32 %v2069_v45, %v4629_v41  ;;  %v1974_v26 = vadd.f32 %v4428_v6, %v1935_v34  ;;  %v1804_v52 = vmul.f32 %v3815_v28, %v1768_v4 }
 0x1ee   : > { %v2258_v3 = vmul.f32 %v2226_v30, %v2002_v15  ;;  %v1736_v39 = vadd.f32 %v1704_v46, %v1635_v36  ;;  %v1436_v60 = vadd.f32 %v1404_v43, %v1336_v2  ;;  %v1504_v42 = vmul.f32 %v1768_v4, %v3806_v18 }
 0x1ef   : > { %v2133_v32 = vadd.f32 %v2101_v14, %v4629_v41  ;;  %v2038_v62 = vmul.f32 0.044715, %v1974_v26  ;;  %v1904_v59 = vmul.f32 %v3817_v29, %v1868_v47  ;;  %v1604_v40 = vmul.f32 %v1868_v47, %v3808_v19 }
 0x1f0   : > { %3218 = vmatmul.mubr.msk.f32.gmra.mxu1 %vm933_vm1, %v2258_v3  ;;  %v1836_v10 = vadd.f32 %v1804_v52, %v1736_v39  ;;  %v1536_v51 = vadd.f32 %v1504_v42, %v1436_v60  ;;  %v1705_v1 = vmul.f32 %v3810_v20, %v1669_v35  ;;  %v1805_v18 = vmul.f32 %v3815_v28, %v1769_v48 }
 0x1f1   : > { %v2165_v63 = vmul.f32 0.7978846, %v2133_v32  ;;  %v2070_v55 = vmul.f32 %v2038_v62, %v1974_v26  ;;  %v2003_v37 = vmul.f32 0.5, %v4594_v22  ;;  %v1905_v19 = vmul.f32 %v3817_v29, %v1869_v16 }
 0x1f2   : > { %v1936_v56 = vadd.f32 %v1904_v59, %v1836_v10  ;;  %v1636_v61 = vadd.f32 %v1604_v40, %v1536_v51  ;;  %v2004_v38 = vmul.f32 0.5, %v4612_v23  ;;  %v2005_v4 = vmul.f32 0.5, %v4629_v41  ;;  %v4666_v41 = vld [vmem:[%s4782_s6] ss:$0 sm:$0xff] }
 0x1f3   : > { %v3355_v49 = vpop.eup %3354  ;;  %3358 = vtanh.f32 %v2165_v63  ;;  %v2102_v17 = vmul.f32 %v2070_v55, %v1974_v26  ;;  %v2006_v23 = vmul.f32 0.5, %v1974_v26 }
 0x1f4   : > { %v2227_v15 = vadd.f32 1.0, %v3355_v49  ;;  %v1975_v27 = vadd.f32 %v4428_v6, %v1936_v56  ;;  %v1737_v31 = vadd.f32 %v1705_v1, %v1636_v61 }
 0x1f5   : > { %v2134_v9 = vadd.f32 %v2102_v17, %v1974_v26 }
 0x1f6   : > { %v2259_v20 = vmul.f32 %v2227_v15, %v2003_v37  ;;  %v2039_v25 = vmul.f32 0.044715, %v1975_v27  ;;  %v1837_v58 = vadd.f32 %v1805_v18, %v1737_v31  ;;  %v2007_v30 = vmul.f32 0.5, %v1975_v27 }
 0x1f7   : > { %v2166_v5 = vmul.f32 0.7978846, %v2134_v9 }
 0x1f8   : > { %3220 = vmatprep.mubr.msk.f32.mxu1 %vm933_vm1, %v2259_v20  ;;  %v2071_v8 = vmul.f32 %v2039_v25, %v1975_v27  ;;  %v1937_v28 = vadd.f32 %v1905_v19, %v1837_v58 }
 0x1f9   : > { %3360 = vtanh.f32 %v2166_v5 }
 0x1fa   : > { %v3357_v54 = vpop.eup %3356  ;;  %v2103_v22 = vmul.f32 %v2071_v8, %v1975_v27  ;;  %v1976_v50 = vadd.f32 %v4428_v6, %v1937_v28 }
 0x1fb   : > { %v2228_v13 = vadd.f32 1.0, %v3357_v54 }
 0x1fc   : > { %v2135_v0 = vadd.f32 %v2103_v22, %v1975_v27  ;;  %v2040_v7 = vmul.f32 0.044715, %v1976_v50  ;;  %v2008_v14 = vmul.f32 0.5, %v1976_v50 }
 0x1fd   : > { %v2260_v29 = vmul.f32 %v2228_v13, %v2004_v38 }
 0x1fe   : > { %v2167_v33 = vmul.f32 0.7978846, %v2135_v0  ;;  %v2072_v21 = vmul.f32 %v2040_v7, %v1976_v50 }
 0x1ff   : > { %3221 = vmatmul.mubr.msk.f32.gmra.mxu1 %vm933_vm1, %v2260_v29 }
 0x200   : > { %v3359_v24 = vpop.eup %3358  ;;  %3362 = vtanh.f32 %v2167_v33  ;;  %v2104_v53 = vmul.f32 %v2072_v21, %v1976_v50 }
 0x201   : > { %v2229_v57 = vadd.f32 1.0, %v3359_v24 }
 0x202   : > { %v2136_v11 = vadd.f32 %v2104_v53, %v1976_v50 }
 0x203   : > { %v2261_v12 = vmul.f32 %v2229_v57, %v2005_v4 }
 0x204   : > { %v2168_v44 = vmul.f32 0.7978846, %v2136_v11 }
 0x205   : > { %3223 = vmatprep.mubr.msk.f32.mxu1 %vm933_vm1, %v2261_v12 }
 0x206   : > { %v3361_v6 = vpop.eup %3360  ;;  %3364 = vtanh.f32 %v2168_v44 }
 0x207   : > { %v2230_v45 = vadd.f32 1.0, %v3361_v6 }
 0x209   : > { %v2262_v34 = vmul.f32 %v2230_v45, %v2006_v23 }
 0x20b   : > { %3224 = vmatmul.mubr.msk.f32.gmra.mxu1 %vm933_vm1, %v2262_v34 }
 0x20d   : > { %v3363_v46 = vpop.eup %3362 }
 0x20e   : > { %v2231_v36 = vadd.f32 1.0, %v3363_v46 }
 0x210   : > { %v2263_v47 = vmul.f32 %v2231_v36, %v2007_v30 }
 0x212   : > { %3226 = vmatprep.mubr.msk.f32.mxu1 %vm933_vm1, %v2263_v47 }
 0x213   : > { %v3365_v2 = vpop.eup %3364 }
 0x214   : > { %v3183_v43 = vpop.f32.mrf.mxu1  ;;  %v2232_v52 = vadd.f32 1.0, %v3365_v2 }
 0x215   : > { %v2444_v26 = vadd.f32 %v3183_v43, %v4666_v41 }
 0x216   : > { %v2438_v35 = vpop.f32.mrf.mxu1  ;;  %v2264_v3 = vmul.f32 %v2232_v52, %v2008_v14 }
 0x217   : > { %v2630_v39 = vmul.f32 0.044715, %v2444_v26  ;;  %v2439_v60 = vadd.f32 %v4666_v41, %v2438_v35  ;;  %v2598_v5 = vmul.f32 0.5, %v2444_v26 }
 0x218   : > { %3227 = vmatmul.mubr.msk.f32.gmra.mxu1 %vm933_vm1, %v2264_v3 }
 0x219   : > { %v2662_v42 = vmul.f32 %v2630_v39, %v2444_v26  ;;  %v2629_v32 = vmul.f32 0.044715, %v2439_v60  ;;  %v2597_v13 = vmul.f32 0.5, %v2439_v60 }
 0x21b   : > { %v2694_v62 = vmul.f32 %v2662_v42, %v2444_v26  ;;  %v2661_v59 = vmul.f32 %v2629_v32, %v2439_v60 }
 0x21d   : > { %v2726_v48 = vadd.f32 %v2694_v62, %v2444_v26  ;;  %v2693_v10 = vmul.f32 %v2661_v59, %v2439_v60 }
 0x21f   : > { %v2758_v51 = vmul.f32 0.7978846, %v2726_v48  ;;  %v2725_v40 = vadd.f32 %v2693_v10, %v2439_v60  ;;  %v3186_v1 = vpop.f32.mrf.mxu1 }
 0x220   : > { %v2454_v63 = vadd.f32 %v3186_v1, %v4666_v41 }
 0x221   : > { %3366 = vtanh.f32 %v2758_v51  ;;  %v2757_v55 = vmul.f32 0.7978846, %v2725_v40  ;;  %v2448_v16 = vpop.f32.mrf.mxu1 }
 0x222   : > { %v2632_v56 = vmul.f32 0.044715, %v2454_v63  ;;  %v2449_v61 = vadd.f32 %v4666_v41, %v2448_v16  ;;  %v2600_v44 = vmul.f32 0.5, %v2454_v63 }
 0x223   : > { %3368 = vtanh.f32 %v2757_v55 }
 0x224   : > { %v2664_v18 = vmul.f32 %v2632_v56, %v2454_v63  ;;  %v2631_v49 = vmul.f32 0.044715, %v2449_v61  ;;  %v2599_v36 = vmul.f32 0.5, %v2449_v61 }
 0x226   : > { %v2696_v37 = vmul.f32 %v2664_v18, %v2454_v63  ;;  %v2663_v17 = vmul.f32 %v2631_v49, %v2449_v61 }
 0x228   : > { %v2728_v15 = vadd.f32 %v2696_v37, %v2454_v63  ;;  %v2695_v27 = vmul.f32 %v2663_v17, %v2449_v61 }
 0x22a   : > { %v2760_v31 = vmul.f32 0.7978846, %v2728_v15  ;;  %v2727_v19 = vadd.f32 %v2695_v27, %v2449_v61 }
 0x22c   : > { %3370 = vtanh.f32 %v2760_v31  ;;  %v2759_v9 = vmul.f32 0.7978846, %v2727_v19 }
 0x22d   : > { %v3189_v20 = vpop.f32.mrf.mxu1 }
 0x22e   : > { %v3367_v25 = vpop.eup %3366  ;;  %3372 = vtanh.f32 %v2759_v9  ;;  %v2464_v58 = vadd.f32 %v3189_v20, %v4666_v41 }
 0x22f   : > { %v2822_v8 = vadd.f32 1.0, %v3367_v25  ;;  %v2458_v28 = vpop.f32.mrf.mxu1 }
 0x230   : > { %v3369_v54 = vpop.eup %3368  ;;  %v2634_v22 = vmul.f32 0.044715, %v2464_v58  ;;  %v2459_v50 = vadd.f32 %v4666_v41, %v2458_v28  ;;  %v2602_v1 = vmul.f32 0.5, %v2464_v58 }
 0x231   : > { %v2854_v38 = vmul.f32 %v2822_v8, %v2598_v5  ;;  %v2821_v0 = vadd.f32 1.0, %v3369_v54 }
 0x232   : > { %v2666_v7 = vmul.f32 %v2634_v22, %v2464_v58  ;;  %v2633_v29 = vmul.f32 0.044715, %v2459_v50  ;;  %v2601_v18 = vmul.f32 0.5, %v2459_v50 }
 0x233   : > { %2886 = vst.msk [vmem:[%s4680_s16 + $0x8] sm:$0xff] %vm323_vm0, %v2854_v38  ;;  %v2853_v33 = vmul.f32 %v2821_v0, %v2597_v13 }
 0x234   : > { %v2698_v21 = vmul.f32 %v2666_v7, %v2464_v58  ;;  %v2665_v24 = vmul.f32 %v2633_v29, %v2459_v50 }
 0x235   : > { %2885 = vst.msk [vmem:[%s4680_s16] sm:$0xff] %vm323_vm0, %v2853_v33 }
 0x236   : > { %v2730_v53 = vadd.f32 %v2698_v21, %v2464_v58  ;;  %v2697_v4 = vmul.f32 %v2665_v24, %v2459_v50 }
 0x238   : > { %v2762_v57 = vmul.f32 0.7978846, %v2730_v53  ;;  %v2729_v11 = vadd.f32 %v2697_v4, %v2459_v50 }
 0x239   : > { %v3371_v12 = vpop.eup %3370 }
 0x23a   : > { %v2824_v6 = vadd.f32 1.0, %v3371_v12  ;;  %3374 = vtanh.f32 %v2762_v57  ;;  %v2761_v23 = vmul.f32 0.7978846, %v2729_v11  ;;  %v3192_v45 = vpop.f32.mrf.mxu1 }
 0x23b   : > { %v3373_v34 = vpop.eup %3372  ;;  %v2474_v46 = vadd.f32 %v3192_v45, %v4666_v41 }
 0x23c   : > { %v2856_v30 = vmul.f32 %v2824_v6, %v2600_v44  ;;  %v2823_v47 = vadd.f32 1.0, %v3373_v34  ;;  %3376 = vtanh.f32 %v2761_v23  ;;  %v2468_v2 = vpop.f32.mrf.mxu1 }
 0x23d   : > { %v2636_v43 = vmul.f32 0.044715, %v2474_v46  ;;  %v2469_v14 = vadd.f32 %v4666_v41, %v2468_v2  ;;  %v2604_v28 = vmul.f32 0.5, %v2474_v46 }
 0x23e   : > { %2888 = vst.msk [vmem:[%s4680_s16 + $0x18] sm:$0xff] %vm323_vm0, %v2856_v30  ;;  %v2855_v52 = vmul.f32 %v2823_v47, %v2599_v36 }
 0x23f   : > { %v2668_v26 = vmul.f32 %v2636_v43, %v2474_v46  ;;  %v2635_v35 = vmul.f32 0.044715, %v2469_v14  ;;  %v2603_v0 = vmul.f32 0.5, %v2469_v14 }
 0x240   : > { %2887 = vst.msk [vmem:[%s4680_s16 + $0x10] sm:$0xff] %vm323_vm0, %v2855_v52 }
 0x241   : > { %v2700_v3 = vmul.f32 %v2668_v26, %v2474_v46  ;;  %v2667_v39 = vmul.f32 %v2635_v35, %v2469_v14 }
 0x243   : > { %v2732_v60 = vadd.f32 %v2700_v3, %v2474_v46  ;;  %v2699_v42 = vmul.f32 %v2667_v39, %v2469_v14 }
 0x244   : > { %v3195_v59 = vpop.f32.mrf.mxu1 }
 0x245   : > { %v2764_v32 = vmul.f32 0.7978846, %v2732_v60  ;;  %v2731_v62 = vadd.f32 %v2699_v42, %v2469_v14  ;;  %v2484_v48 = vadd.f32 %v3195_v59, %v4666_v41 }
 0x246   : > { %v2478_v40 = vpop.f32.mrf.mxu1 }
 0x247   : > { %v3375_v10 = vpop.eup %3374  ;;  %3378 = vtanh.f32 %v2764_v32  ;;  %v2763_v51 = vmul.f32 0.7978846, %v2731_v62  ;;  %v2638_v55 = vmul.f32 0.044715, %v2484_v48  ;;  %v2479_v16 = vadd.f32 %v4666_v41, %v2478_v40 }
 0x248   : > { %v2826_v63 = vadd.f32 1.0, %v3375_v10  ;;  %v2606_v45 = vmul.f32 0.5, %v2484_v48 }
 0x249   : > { %v3377_v56 = vpop.eup %3376  ;;  %3380 = vtanh.f32 %v2763_v51  ;;  %v2670_v37 = vmul.f32 %v2638_v55, %v2484_v48  ;;  %v2637_v17 = vmul.f32 0.044715, %v2479_v16  ;;  %v2605_v52 = vmul.f32 0.5, %v2479_v16 }
 0x24a   : > { %v2858_v61 = vmul.f32 %v2826_v63, %v2602_v1  ;;  %v2825_v49 = vadd.f32 1.0, %v3377_v56 }
 0x24b   : > { %v2702_v27 = vmul.f32 %v2670_v37, %v2484_v48  ;;  %v2669_v31 = vmul.f32 %v2637_v17, %v2479_v16 }
 0x24c   : > { %2890 = vst.msk [vmem:[%s4680_s16 + $0x28] sm:$0xff] %vm323_vm0, %v2858_v61  ;;  %v2857_v15 = vmul.f32 %v2825_v49, %v2601_v18 }
 0x24d   : > { %v2734_v19 = vadd.f32 %v2702_v27, %v2484_v48  ;;  %v2701_v9 = vmul.f32 %v2669_v31, %v2479_v16 }
 0x24e   : > { %2889 = vst.msk [vmem:[%s4680_s16 + $0x20] sm:$0xff] %vm323_vm0, %v2857_v15 }
 0x24f   : > { %v2766_v20 = vmul.f32 0.7978846, %v2734_v19  ;;  %v2733_v25 = vadd.f32 %v2701_v9, %v2479_v16 }
 0x251   : > { %3382 = vtanh.f32 %v2766_v20  ;;  %v2765_v58 = vmul.f32 0.7978846, %v2733_v25 }
 0x253   : > { %3384 = vtanh.f32 %v2765_v58 }
 0x254   : > { %v3379_v5 = vpop.eup %3378  ;;  %v3198_v8 = vpop.f32.mrf.mxu1 }
 0x255   : > { %v2828_v54 = vadd.f32 1.0, %v3379_v5  ;;  %v2494_v22 = vadd.f32 %v3198_v8, %v4666_v41 }
 0x256   : > { %v3381_v50 = vpop.eup %3380  ;;  %v2488_v38 = vpop.f32.mrf.mxu1 }
 0x257   : > { %v2860_v13 = vmul.f32 %v2828_v54, %v2604_v28  ;;  %v2827_v7 = vadd.f32 1.0, %v3381_v50  ;;  %v2640_v29 = vmul.f32 0.044715, %v2494_v22  ;;  %v2489_v33 = vadd.f32 %v4666_v41, %v2488_v38 }
 0x258   : > { %v2608_v63 = vmul.f32 0.5, %v2494_v22 }
 0x259   : > { %2892 = vst.msk [vmem:[%s4680_s16 + $0x38] sm:$0xff] %vm323_vm0, %v2860_v13  ;;  %v2859_v21 = vmul.f32 %v2827_v7, %v2603_v0  ;;  %v2672_v24 = vmul.f32 %v2640_v29, %v2494_v22  ;;  %v2639_v53 = vmul.f32 0.044715, %v2489_v33  ;;  %v2607_v17 = vmul.f32 0.5, %v2489_v33 }
 0x25b   : > { %2891 = vst.msk [vmem:[%s4680_s16 + $0x30] sm:$0xff] %vm323_vm0, %v2859_v21  ;;  %v2704_v4 = vmul.f32 %v2672_v24, %v2494_v22  ;;  %v2671_v57 = vmul.f32 %v2639_v53, %v2489_v33 }
 0x25d   : > { %v2736_v11 = vadd.f32 %v2704_v4, %v2494_v22  ;;  %v2703_v12 = vmul.f32 %v2671_v57, %v2489_v33 }
 0x25e   : > { %v3383_v44 = vpop.eup %3382 }
 0x25f   : > { %v2768_v6 = vmul.f32 0.7978846, %v2736_v11  ;;  %v3201_v23 = vpop.f32.mrf.mxu1  ;;  %v2830_v34 = vadd.f32 1.0, %v3383_v44  ;;  %v2735_v46 = vadd.f32 %v2703_v12, %v2489_v33 }
 0x260   : > { %v2504_v30 = vadd.f32 %v3201_v23, %v4666_v41  ;;  %v3385_v47 = vpop.eup %3384 }
 0x261   : > { %3386 = vtanh.f32 %v2768_v6  ;;  %v2498_v36 = vpop.f32.mrf.mxu1  ;;  %v2862_v2 = vmul.f32 %v2830_v34, %v2606_v45  ;;  %v2767_v43 = vmul.f32 0.7978846, %v2735_v46  ;;  %v2829_v26 = vadd.f32 1.0, %v3385_v47 }
 0x262   : > { %v2642_v14 = vmul.f32 0.044715, %v2504_v30  ;;  %v2499_v35 = vadd.f32 %v4666_v41, %v2498_v36  ;;  %v2610_v54 = vmul.f32 0.5, %v2504_v30 }
 0x263   : > { %2894 = vst.msk [vmem:[%s4680_s16 + $0x48] sm:$0xff] %vm323_vm0, %v2862_v2  ;;  %3388 = vtanh.f32 %v2767_v43  ;;  %v2861_v39 = vmul.f32 %v2829_v26, %v2605_v52 }
 0x264   : > { %v2674_v3 = vmul.f32 %v2642_v14, %v2504_v30  ;;  %v2641_v60 = vmul.f32 0.044715, %v2499_v35  ;;  %v2609_v0 = vmul.f32 0.5, %v2499_v35 }
 0x265   : > { %2893 = vst.msk [vmem:[%s4680_s16 + $0x40] sm:$0xff] %vm323_vm0, %v2861_v39 }
 0x266   : > { %v2706_v42 = vmul.f32 %v2674_v3, %v2504_v30  ;;  %v2673_v32 = vmul.f32 %v2641_v60, %v2499_v35 }
 0x268   : > { %v2738_v62 = vadd.f32 %v2706_v42, %v2504_v30  ;;  %v2705_v59 = vmul.f32 %v2673_v32, %v2499_v35 }
 0x26a   : > { %v2770_v48 = vmul.f32 0.7978846, %v2738_v62  ;;  %v2737_v10 = vadd.f32 %v2705_v59, %v2499_v35 }
 0x26c   : > { %3390 = vtanh.f32 %v2770_v48  ;;  %v2769_v51 = vmul.f32 0.7978846, %v2737_v10 }
 0x26d   : > { %v3204_v1 = vpop.f32.mrf.mxu1 }
 0x26e   : > { %v3387_v40 = vpop.eup %3386  ;;  %3392 = vtanh.f32 %v2769_v51  ;;  %v2514_v16 = vadd.f32 %v3204_v1, %v4666_v41 }
 0x26f   : > { %v2832_v55 = vadd.f32 1.0, %v3387_v40  ;;  %v2508_v56 = vpop.f32.mrf.mxu1 }
 0x270   : > { %v3389_v61 = vpop.eup %3388  ;;  %v2644_v49 = vmul.f32 0.044715, %v2514_v16  ;;  %v2509_v37 = vadd.f32 %v4666_v41, %v2508_v56  ;;  %v2612_v36 = vmul.f32 0.5, %v2514_v16 }
 0x271   : > { %v2864_v18 = vmul.f32 %v2832_v55, %v2608_v63  ;;  %v2831_v15 = vadd.f32 1.0, %v3389_v61 }
 0x272   : > { %v2676_v27 = vmul.f32 %v2644_v49, %v2514_v16  ;;  %v2643_v31 = vmul.f32 0.044715, %v2509_v37  ;;  %v2611_v35 = vmul.f32 0.5, %v2509_v37 }
 0x273   : > { %2896 = vst.msk [vmem:[%s4680_s16 + $0x58] sm:$0xff] %vm323_vm0, %v2864_v18  ;;  %v2863_v19 = vmul.f32 %v2831_v15, %v2607_v17 }
 0x274   : > { %v2708_v9 = vmul.f32 %v2676_v27, %v2514_v16  ;;  %v2675_v20 = vmul.f32 %v2643_v31, %v2509_v37 }
 0x275   : > { %2895 = vst.msk [vmem:[%s4680_s16 + $0x50] sm:$0xff] %vm323_vm0, %v2863_v19 }
 0x276   : > { %v2740_v25 = vadd.f32 %v2708_v9, %v2514_v16  ;;  %v2707_v58 = vmul.f32 %v2675_v20, %v2509_v37 }
 0x278   : > { %v2772_v8 = vmul.f32 0.7978846, %v2740_v25  ;;  %v2739_v28 = vadd.f32 %v2707_v58, %v2509_v37 }
 0x279   : > { %v3391_v5 = vpop.eup %3390 }
 0x27a   : > { %v2834_v22 = vadd.f32 1.0, %v3391_v5  ;;  %3394 = vtanh.f32 %v2772_v8  ;;  %v2771_v50 = vmul.f32 0.7978846, %v2739_v28 }
 0x27b   : > { %v3393_v38 = vpop.eup %3392 }
 0x27c   : > { %v2866_v13 = vmul.f32 %v2834_v22, %v2610_v54  ;;  %v2833_v7 = vadd.f32 1.0, %v3393_v38  ;;  %3396 = vtanh.f32 %v2771_v50  ;;  %v3207_v29 = vpop.f32.mrf.mxu1 }
 0x27d   : > { %v2524_v33 = vadd.f32 %v3207_v29, %v4666_v41 }
 0x27e   : > { %2898 = vst.msk [vmem:[%s4680_s16 + $0x68] sm:$0xff] %vm323_vm0, %v2866_v13  ;;  %v2865_v21 = vmul.f32 %v2833_v7, %v2609_v0  ;;  %v2518_v24 = vpop.f32.mrf.mxu1 }
 0x27f   : > { %v2646_v53 = vmul.f32 0.044715, %v2524_v33  ;;  %v2519_v4 = vadd.f32 %v4666_v41, %v2518_v24  ;;  %v2614_v56 = vmul.f32 0.5, %v2524_v33 }
 0x280   : > { %2897 = vst.msk [vmem:[%s4680_s16 + $0x60] sm:$0xff] %vm323_vm0, %v2865_v21 }
 0x281   : > { %v2678_v57 = vmul.f32 %v2646_v53, %v2524_v33  ;;  %v2645_v11 = vmul.f32 0.044715, %v2519_v4  ;;  %v2613_v15 = vmul.f32 0.5, %v2519_v4 }
 0x283   : > { %v2710_v12 = vmul.f32 %v2678_v57, %v2524_v33  ;;  %v2677_v44 = vmul.f32 %v2645_v11, %v2519_v4 }
 0x285   : > { %v2742_v6 = vadd.f32 %v2710_v12, %v2524_v33  ;;  %v2709_v23 = vmul.f32 %v2677_v44, %v2519_v4 }
 0x287   : > { %v3395_v45 = vpop.eup %3394  ;;  %v2774_v34 = vmul.f32 0.7978846, %v2742_v6  ;;  %v2741_v46 = vadd.f32 %v2709_v23, %v2519_v4  ;;  %v3210_v30 = vpop.f32.mrf.mxu1 }
 0x288   : > { %v2836_v47 = vadd.f32 1.0, %v3395_v45  ;;  %v2534_v2 = vadd.f32 %v3210_v30, %v4666_v41 }
 0x289   : > { %v3397_v43 = vpop.eup %3396  ;;  %3398 = vtanh.f32 %v2774_v34  ;;  %v2773_v14 = vmul.f32 0.7978846, %v2741_v46  ;;  %v2528_v52 = vpop.f32.mrf.mxu1 }
 0x28a   : > { %v2868_v26 = vmul.f32 %v2836_v47, %v2612_v36  ;;  %v2835_v3 = vadd.f32 1.0, %v3397_v43  ;;  %v2648_v39 = vmul.f32 0.044715, %v2534_v2  ;;  %v2529_v60 = vadd.f32 %v4666_v41, %v2528_v52 }
 0x28b   : > { %3400 = vtanh.f32 %v2773_v14  ;;  %v2616_v50 = vmul.f32 0.5, %v2534_v2 }
 0x28c   : > { %2900 = vst.msk [vmem:[%s4680_s16 + $0x78] sm:$0xff] %vm323_vm0, %v2868_v26  ;;  %v2867_v42 = vmul.f32 %v2835_v3, %v2611_v35  ;;  %v2680_v32 = vmul.f32 %v2648_v39, %v2534_v2  ;;  %v2647_v62 = vmul.f32 0.044715, %v2529_v60  ;;  %v2615_v24 = vmul.f32 0.5, %v2529_v60 }
 0x28e   : > { %2899 = vst.msk [vmem:[%s4680_s16 + $0x70] sm:$0xff] %vm323_vm0, %v2867_v42  ;;  %v2712_v59 = vmul.f32 %v2680_v32, %v2534_v2  ;;  %v2679_v48 = vmul.f32 %v2647_v62, %v2529_v60 }
 0x290   : > { %v2744_v10 = vadd.f32 %v2712_v59, %v2534_v2  ;;  %v2711_v51 = vmul.f32 %v2679_v48, %v2529_v60 }
 0x292   : > { %v2776_v40 = vmul.f32 0.7978846, %v2744_v10  ;;  %v2743_v1 = vadd.f32 %v2711_v51, %v2529_v60 }
 0x294   : > { %3402 = vtanh.f32 %v2776_v40  ;;  %v2775_v63 = vmul.f32 0.7978846, %v2743_v1 }
 0x296   : > { %v3399_v55 = vpop.eup %3398  ;;  %v3213_v16 = vpop.f32.mrf.mxu1  ;;  %3404 = vtanh.f32 %v2775_v63 }
 0x297   : > { %v2838_v61 = vadd.f32 1.0, %v3399_v55  ;;  %v2544_v18 = vadd.f32 %v3213_v16, %v4666_v41 }
 0x298   : > { %v3401_v49 = vpop.eup %3400  ;;  %v2538_v37 = vpop.f32.mrf.mxu1 }
 0x299   : > { %v2870_v17 = vmul.f32 %v2838_v61, %v2614_v56  ;;  %v2837_v27 = vadd.f32 1.0, %v3401_v49  ;;  %v2650_v31 = vmul.f32 0.044715, %v2544_v18  ;;  %v2539_v19 = vadd.f32 %v4666_v41, %v2538_v37 }
 0x29a   : > { %v2618_v14 = vmul.f32 0.5, %v2544_v18 }
 0x29b   : > { %2902 = vst.msk [vmem:[%s4680_s16 + $0x88] sm:$0xff] %vm323_vm0, %v2870_v17  ;;  %v2869_v9 = vmul.f32 %v2837_v27, %v2613_v15  ;;  %v2682_v20 = vmul.f32 %v2650_v31, %v2544_v18  ;;  %v2649_v25 = vmul.f32 0.044715, %v2539_v19  ;;  %v2617_v32 = vmul.f32 0.5, %v2539_v19 }
 0x29d   : > { %2901 = vst.msk [vmem:[%s4680_s16 + $0x80] sm:$0xff] %vm323_vm0, %v2869_v9  ;;  %v2714_v58 = vmul.f32 %v2682_v20, %v2544_v18  ;;  %v2681_v5 = vmul.f32 %v2649_v25, %v2539_v19 }
 0x29f   : > { %v2746_v8 = vadd.f32 %v2714_v58, %v2544_v18  ;;  %v2713_v28 = vmul.f32 %v2681_v5, %v2539_v19 }
 0x2a1   : > { %v3403_v54 = vpop.eup %3402  ;;  %v2778_v22 = vmul.f32 0.7978846, %v2746_v8  ;;  %v2745_v13 = vadd.f32 %v2713_v28, %v2539_v19 }
 0x2a2   : > { %v2840_v38 = vadd.f32 1.0, %v3403_v54 }
 0x2a3   : > { %3406 = vtanh.f32 %v2778_v22  ;;  %v3216_v0 = vpop.f32.mrf.mxu1  ;;  %v3405_v7 = vpop.eup %3404  ;;  %v2777_v33 = vmul.f32 0.7978846, %v2745_v13 }
 0x2a4   : > { %v2872_v29 = vmul.f32 %v2840_v38, %v2616_v50  ;;  %v2554_v21 = vadd.f32 %v3216_v0, %v4666_v41  ;;  %v2839_v53 = vadd.f32 1.0, %v3405_v7 }
 0x2a5   : > { %v2548_v4 = vpop.f32.mrf.mxu1  ;;  %3408 = vtanh.f32 %v2777_v33 }
 0x2a6   : > { %2904 = vst.msk [vmem:[%s4680_s16 + $0x98] sm:$0xff] %vm323_vm0, %v2872_v29  ;;  %v2652_v57 = vmul.f32 0.044715, %v2554_v21  ;;  %v2549_v11 = vadd.f32 %v4666_v41, %v2548_v4  ;;  %v2871_v12 = vmul.f32 %v2839_v53, %v2615_v24  ;;  %v2620_v18 = vmul.f32 0.5, %v2554_v21 }
 0x2a8   : > { %v2684_v44 = vmul.f32 %v2652_v57, %v2554_v21  ;;  %v2651_v6 = vmul.f32 0.044715, %v2549_v11  ;;  %2903 = vst.msk [vmem:[%s4680_s16 + $0x90] sm:$0xff] %vm323_vm0, %v2871_v12  ;;  %v2619_v27 = vmul.f32 0.5, %v2549_v11 }
 0x2aa   : > { %v2716_v23 = vmul.f32 %v2684_v44, %v2554_v21  ;;  %v2683_v45 = vmul.f32 %v2651_v6, %v2549_v11 }
 0x2ac   : > { %v2748_v34 = vadd.f32 %v2716_v23, %v2554_v21  ;;  %v2715_v46 = vmul.f32 %v2683_v45, %v2549_v11 }
 0x2ae   : > { %v2780_v30 = vmul.f32 0.7978846, %v2748_v34  ;;  %v2747_v36 = vadd.f32 %v2715_v46, %v2549_v11 }
 0x2b0   : > { %v3407_v47 = vpop.eup %3406  ;;  %3410 = vtanh.f32 %v2780_v30  ;;  %v2779_v2 = vmul.f32 0.7978846, %v2747_v36  ;;  %v3219_v43 = vpop.f32.mrf.mxu1 }
 0x2b1   : > { %v2842_v52 = vadd.f32 1.0, %v3407_v47  ;;  %v2564_v26 = vadd.f32 %v3219_v43, %v4666_v41 }
 0x2b2   : > { %3412 = vtanh.f32 %v2779_v2  ;;  %v2558_v35 = vpop.f32.mrf.mxu1  ;;  %v3409_v3 = vpop.eup %3408 }
 0x2b3   : > { %v2874_v39 = vmul.f32 %v2842_v52, %v2618_v14  ;;  %v2654_v60 = vmul.f32 0.044715, %v2564_v26  ;;  %v2559_v42 = vadd.f32 %v4666_v41, %v2558_v35  ;;  %v2841_v62 = vadd.f32 1.0, %v3409_v3 }
 0x2b4   : > { %v2622_v7 = vmul.f32 0.5, %v2564_v26 }
 0x2b5   : > { %2906 = vst.msk [vmem:[%s4680_s16 + $0xa8] sm:$0xff] %vm323_vm0, %v2874_v39  ;;  %v2686_v59 = vmul.f32 %v2654_v60, %v2564_v26  ;;  %v2653_v48 = vmul.f32 0.044715, %v2559_v42  ;;  %v2873_v10 = vmul.f32 %v2841_v62, %v2617_v32  ;;  %v2621_v57 = vmul.f32 0.5, %v2559_v42 }
 0x2b7   : > { %v2718_v51 = vmul.f32 %v2686_v59, %v2564_v26  ;;  %v2685_v40 = vmul.f32 %v2653_v48, %v2559_v42  ;;  %2905 = vst.msk [vmem:[%s4680_s16 + $0xa0] sm:$0xff] %vm323_vm0, %v2873_v10 }
 0x2b9   : > { %v2750_v1 = vadd.f32 %v2718_v51, %v2564_v26  ;;  %v2717_v63 = vmul.f32 %v2685_v40, %v2559_v42 }
 0x2bb   : > { %v2782_v55 = vmul.f32 0.7978846, %v2750_v1  ;;  %v2749_v16 = vadd.f32 %v2717_v63, %v2559_v42 }
 0x2bd   : > { %v3411_v56 = vpop.eup %3410  ;;  %3414 = vtanh.f32 %v2782_v55  ;;  %v2781_v61 = vmul.f32 0.7978846, %v2749_v16 }
 0x2be   : > { %v2844_v49 = vadd.f32 1.0, %v3411_v56 }
 0x2bf   : > { %v3413_v37 = vpop.eup %3412  ;;  %3416 = vtanh.f32 %v2781_v61  ;;  %v3222_v17 = vpop.f32.mrf.mxu1 }
 0x2c0   : > { %v2876_v15 = vmul.f32 %v2844_v49, %v2620_v18  ;;  %v2843_v31 = vadd.f32 1.0, %v3413_v37  ;;  %v2574_v19 = vadd.f32 %v3222_v17, %v4666_v41 }
 0x2c1   : > { %v2568_v9 = vpop.f32.mrf.mxu1 }
 0x2c2   : > { %2908 = vst.msk [vmem:[%s4680_s16 + $0xb8] sm:$0xff] %vm323_vm0, %v2876_v15  ;;  %v2875_v20 = vmul.f32 %v2843_v31, %v2619_v27  ;;  %v2656_v25 = vmul.f32 0.044715, %v2574_v19  ;;  %v2569_v58 = vadd.f32 %v4666_v41, %v2568_v9  ;;  %v2624_v3 = vmul.f32 0.5, %v2574_v19 }
 0x2c4   : > { %2907 = vst.msk [vmem:[%s4680_s16 + $0xb0] sm:$0xff] %vm323_vm0, %v2875_v20  ;;  %v2688_v5 = vmul.f32 %v2656_v25, %v2574_v19  ;;  %v2655_v8 = vmul.f32 0.044715, %v2569_v58  ;;  %v2623_v48 = vmul.f32 0.5, %v2569_v58 }
 0x2c6   : > { %v2720_v28 = vmul.f32 %v2688_v5, %v2574_v19  ;;  %v2687_v54 = vmul.f32 %v2655_v8, %v2569_v58 }
 0x2c8   : > { %v2752_v22 = vadd.f32 %v2720_v28, %v2574_v19  ;;  %v2719_v50 = vmul.f32 %v2687_v54, %v2569_v58 }
 0x2ca   : > { %v3415_v38 = vpop.eup %3414  ;;  %v2784_v13 = vmul.f32 0.7978846, %v2752_v22  ;;  %v2751_v0 = vadd.f32 %v2719_v50, %v2569_v58 }
 0x2cb   : > { %v2846_v29 = vadd.f32 1.0, %v3415_v38  ;;  %v3225_v33 = vpop.f32.mrf.mxu1 }
 0x2cc   : > { %v3417_v21 = vpop.eup %3416  ;;  %3418 = vtanh.f32 %v2784_v13  ;;  %v2783_v24 = vmul.f32 0.7978846, %v2751_v0  ;;  %v2584_v53 = vadd.f32 %v3225_v33, %v4666_v41 }
 0x2cd   : > { %v2878_v4 = vmul.f32 %v2846_v29, %v2622_v7  ;;  %v2845_v11 = vadd.f32 1.0, %v3417_v21  ;;  %v2578_v12 = vpop.f32.mrf.mxu1 }
 0x2ce   : > { %3420 = vtanh.f32 %v2783_v24  ;;  %v2658_v44 = vmul.f32 0.044715, %v2584_v53  ;;  %v2579_v6 = vadd.f32 %v4666_v41, %v2578_v12  ;;  %v2626_v37 = vmul.f32 0.5, %v2584_v53 }
 0x2cf   : > { %2910 = vst.msk [vmem:[%s4680_s16 + $0xc8] sm:$0xff] %vm323_vm0, %v2878_v4  ;;  %v2877_v23 = vmul.f32 %v2845_v11, %v2621_v57 }
 0x2d0   : > { %v2690_v45 = vmul.f32 %v2658_v44, %v2584_v53  ;;  %v2657_v34 = vmul.f32 0.044715, %v2579_v6  ;;  %v2625_v31 = vmul.f32 0.5, %v2579_v6 }
 0x2d1   : > { %2909 = vst.msk [vmem:[%s4680_s16 + $0xc0] sm:$0xff] %vm323_vm0, %v2877_v23 }
 0x2d2   : > { %v2722_v46 = vmul.f32 %v2690_v45, %v2584_v53  ;;  %v2689_v30 = vmul.f32 %v2657_v34, %v2579_v6 }
 0x2d4   : > { %v2754_v36 = vadd.f32 %v2722_v46, %v2584_v53  ;;  %v2721_v47 = vmul.f32 %v2689_v30, %v2579_v6 }
 0x2d6   : > { %v2786_v2 = vmul.f32 0.7978846, %v2754_v36  ;;  %v2753_v43 = vadd.f32 %v2721_v47, %v2579_v6 }
 0x2d8   : > { %3422 = vtanh.f32 %v2786_v2  ;;  %v2785_v14 = vmul.f32 0.7978846, %v2753_v43  ;;  %v3228_v52 = vpop.f32.mrf.mxu1 }
 0x2d9   : > { %v3419_v26 = vpop.eup %3418  ;;  %v2594_v35 = vadd.f32 %v3228_v52, %v4666_v41 }
 0x2da   : > { %v2848_v39 = vadd.f32 1.0, %v3419_v26  ;;  %3424 = vtanh.f32 %v2785_v14  ;;  %v2588_v60 = vpop.f32.mrf.mxu1 }
 0x2db   : > { %v3421_v42 = vpop.eup %3420  ;;  %v2660_v32 = vmul.f32 0.044715, %v2594_v35  ;;  %v2589_v62 = vadd.f32 %v4666_v41, %v2588_v60  ;;  %v2628_v25 = vmul.f32 0.5, %v2594_v35 }
 0x2dc   : > { %v2880_v59 = vmul.f32 %v2848_v39, %v2624_v3  ;;  %v2847_v10 = vadd.f32 1.0, %v3421_v42 }
 0x2dd   : > { %v2692_v51 = vmul.f32 %v2660_v32, %v2594_v35  ;;  %v2659_v40 = vmul.f32 0.044715, %v2589_v62  ;;  %v2627_v28 = vmul.f32 0.5, %v2589_v62 }
 0x2de   : > { %2912 = vst.msk [vmem:[%s4680_s16 + $0xd8] sm:$0xff] %vm323_vm0, %v2880_v59  ;;  %v2879_v1 = vmul.f32 %v2847_v10, %v2623_v48 }
 0x2df   : > { %v2724_v63 = vmul.f32 %v2692_v51, %v2594_v35  ;;  %v2691_v55 = vmul.f32 %v2659_v40, %v2589_v62 }
 0x2e0   : > { %2911 = vst.msk [vmem:[%s4680_s16 + $0xd0] sm:$0xff] %vm323_vm0, %v2879_v1 }
 0x2e1   : > { %v2756_v16 = vadd.f32 %v2724_v63, %v2594_v35  ;;  %v2723_v56 = vmul.f32 %v2691_v55, %v2589_v62 }
 0x2e3   : > { %v2788_v61 = vmul.f32 0.7978846, %v2756_v16  ;;  %v2755_v18 = vadd.f32 %v2723_v56, %v2589_v62 }
 0x2e5   : > { %v3423_v49 = vpop.eup %3422  ;;  %3426 = vtanh.f32 %v2788_v61  ;;  %v2787_v41 = vmul.f32 0.7978846, %v2755_v18 }
 0x2e6   : > { %v2850_v17 = vadd.f32 1.0, %v3423_v49 }
 0x2e7   : > { %v3425_v15 = vpop.eup %3424  ;;  %3428 = vtanh.f32 %v2787_v41 }
 0x2e8   : > { %v2882_v27 = vmul.f32 %v2850_v17, %v2626_v37  ;;  %v2849_v19 = vadd.f32 1.0, %v3425_v15 }
 0x2ea   : > { %2914 = vst.msk [vmem:[%s4680_s16 + $0xe8] sm:$0xff] %vm323_vm0, %v2882_v27  ;;  %v2881_v9 = vmul.f32 %v2849_v19, %v2625_v31 }
 0x2ec   : > { %2913 = vst.msk [vmem:[%s4680_s16 + $0xe0] sm:$0xff] %vm323_vm0, %v2881_v9 }
 0x2f2   : > { %v3427_v20 = vpop.eup %3426 }
 0x2f3   : > { %v2852_v58 = vadd.f32 1.0, %v3427_v20 }
 0x2f4   : > { %v3429_v5 = vpop.eup %3428 }
 0x2f5   : > { %v2884_v8 = vmul.f32 %v2852_v58, %v2628_v25  ;;  %v2851_v54 = vadd.f32 1.0, %v3429_v5 }
 0x2f7   : > { %2916 = vst.msk [vmem:[%s4680_s16 + $0xf8] sm:$0xff] %vm323_vm0, %v2884_v8  ;;  %v2883_v22 = vmul.f32 %v2851_v54, %v2627_v28 }
 0x2f9   : > { %2915 = vst.msk [vmem:[%s4680_s16 + $0xf0] sm:$0xff] %vm323_vm0, %v2883_v22 }
 0x2fa PF: > { %s17_s24 = sadd.s32 1, %s3437_s24  }
 0x2fb   : > { %p14_p4 = scmp.ge.s32.totalorder %s17_s24, 4  }
 0x2fd   :  { %16 = sbr.rel (!%p14_p4) target bundleno = 1 (0x1), region = 81 }

</bundles_post_ra>
